<compile_context>
chip_gen: v5e
topology: v5e:2x2
jax: 0.10.0
libtpu: 0.0.40
codegen_flags: <defaults>
</compile_context>

<pallas_src>
import math
import functools

import jax
import jax.numpy as jnp
from jax.experimental import pallas as pl
from jax.experimental.pallas import tpu as pltpu

NEG_INF = -1e30
LN_EPS = 1e-5
PAD_BASE = 8  # aligned sublane offset of the "real" rows inside the conv-halo scratch


# ----------------------------- BlockSpec helpers -----------------------------

def _const_spec(shape):
    zeros = (0,) * len(shape)
    return pl.BlockSpec(shape, lambda i: zeros)


def _batch_spec(shape):
    nrest = len(shape) - 1
    return pl.BlockSpec(shape, lambda i: (i,) + (0,) * nrest)


# ----------------------------- in-kernel math helpers -----------------------------

def _ln(x, g, b):
    mu = jnp.mean(x, axis=-1, keepdims=True)
    var = jnp.mean(jnp.square(x - mu), axis=-1, keepdims=True)
    return (x - mu) * jax.lax.rsqrt(var + LN_EPS) * g + b


def _softmax_rows(s):
    s = s - jnp.max(s, axis=-1, keepdims=True)
    p = jnp.exp(s)
    return p * pl.reciprocal(jnp.sum(p, axis=-1, keepdims=True), approx=True)


def _softmax_cols(s):
    s = s - jnp.max(s, axis=0, keepdims=True)
    p = jnp.exp(s)
    return p * pl.reciprocal(jnp.sum(p, axis=0, keepdims=True), approx=True)


ENC_WEIGHT_NAMES = ("conv_ln_g", "conv_ln_b", "conv_dw_w", "conv_dw_b",
                    "conv_pw_w", "conv_pw_b", "attn_ln1_g", "attn_ln1_b",
                    "attn_qkv_w", "attn_qkv_b", "attn_ln2_g", "attn_ln2_b",
                    "attn_o_w", "attn_o_b")
_ENC_KEYS = ("cln_g", "cln_b", "cdw_w", "cdw_b", "cpw_w", "cpw_b",
             "ln1_g", "ln1_b", "qkv_w", "qkv_b", "ln2_g", "ln2_b", "o_w", "o_b")

CQA_WEIGHT_NAMES = ("cqa_w4c", "cqa_w4q", "cqa_w4m", "cqa_bias",
                    "cqa_proj_w", "cqa_proj_b", "wpool_w", "cqc_proj_w", "cqc_proj_b")
PRED_HEAD_NAMES = ("pred_start_ln_g", "pred_start_ln_b", "pred_end_ln_g", "pred_end_ln_b",
                   "pred_start_w1", "pred_start_b1", "pred_start_w2", "pred_start_b2",
                   "pred_end_w1", "pred_end_b1", "pred_end_w2", "pred_end_b2")


def _load_enc_weights(refs):
    return {n: r[...].astype(jnp.float32) for n, r in zip(_ENC_KEYS, refs)}


def _encoder_block(x, key_mask_row, pos, w, pad_ref, *, num_layers, num_heads, ksize):
    """One full VSLNet FeatureEncoder (pos-emb + conv block + MHA block) on values."""
    L, D = x.shape
    dh = D // num_heads
    pad = ksize // 2

    x = x + pos

    # --- depthwise-separable conv block (residual) ---
    for i in range(num_layers):
        res = x
        h = _ln(x, w["cln_g"][i:i + 1, :], w["cln_b"][i:i + 1, :])
        # 'same' zero padding handled via the zero-edged VMEM scratch (no HBM pad).
        pad_ref[PAD_BASE:PAD_BASE + L, :] = h
        xp = pad_ref[...]
        acc = xp[PAD_BASE - pad:PAD_BASE - pad + L, :] * w["cdw_w"][i * ksize:i * ksize + 1, :]
        for k in range(1, ksize):
            off = PAD_BASE - pad + k
            acc = acc + xp[off:off + L, :] * w["cdw_w"][i * ksize + k:i * ksize + k + 1, :]
        h = acc + w["cdw_b"][i:i + 1, :]
        h = jnp.dot(h, w["cpw_w"][i * D:(i + 1) * D, :],
                    preferred_element_type=jnp.float32) + w["cpw_b"][i:i + 1, :]
        h = jnp.maximum(h, 0.0)
        x = res + h

    # --- multi-head self-attention block (fused QKV) ---
    res = x
    h = _ln(x, w["ln1_g"], w["ln1_b"])
    qkv = jnp.dot(h, w["qkv_w"], preferred_element_type=jnp.float32) + w["qkv_b"]  # (L, 3D)
    key_bias = (1.0 - key_mask_row) * NEG_INF                                      # (1, L)
    scale = 1.0 / math.sqrt(dh)
    heads = []
    for hix in range(num_heads):
        q = qkv[:, hix * dh:(hix + 1) * dh]
        k = qkv[:, D + hix * dh:D + (hix + 1) * dh]
        v = qkv[:, 2 * D + hix * dh:2 * D + (hix + 1) * dh]
        s = jax.lax.dot_general(q, k, (((1,), (1,)), ((), ())),
                                preferred_element_type=jnp.float32) * scale
        p = _softmax_rows(s + key_bias)
        heads.append(jnp.dot(p, v, preferred_element_type=jnp.float32))
    h = jnp.concatenate(heads, axis=-1)
    x = res + h

    res = x
    h = _ln(x, w["ln2_g"], w["ln2_b"])
    h = jnp.dot(h, w["o_w"], preferred_element_type=jnp.float32) + w["o_b"]
    return res + h


# ----------------------------- kernel 1: video encoder -----------------------------

def _encoder_kernel(x_ref, m_ref, pos_ref, pre_w_ref, pre_b_ref, *rest,
                    num_layers, num_heads, ksize):
    # rest = 14 encoder weight refs, out_ref, pad scratch
    o_ref, pad_ref = rest[-2], rest[-1]
    w = _load_enc_weights(rest[:-2])
    # VisualAffine fused as a pre-projection
    x = jnp.dot(x_ref[0].astype(jnp.float32), pre_w_ref[...].astype(jnp.float32),
                preferred_element_type=jnp.float32) + pre_b_ref[...]
    key_mask = m_ref[0].astype(jnp.float32)
    pad_ref[...] = jnp.zeros(pad_ref.shape, jnp.float32)
    y = _encoder_block(x, key_mask, pos_ref[...].astype(jnp.float32), w, pad_ref,
                       num_layers=num_layers, num_heads=num_heads, ksize=ksize)
    o_ref[0] = y.astype(o_ref.dtype)


def video_encoder(params, video_features, v_mask, cfg):
    B, Lv, Din = video_features.shape
    D = cfg["dim"]
    pos = params["enc_pos_emb"][:Lv]
    enc_w = [params["enc_" + n] for n in ENC_WEIGHT_NAMES]
    mask3 = v_mask.reshape(B, 1, Lv).astype(jnp.float32)

    in_specs = ([_batch_spec((1, Lv, Din)), _batch_spec((1, 1, Lv)), _const_spec((Lv, D)),
                 _const_spec(params["vaff_w"].shape), _const_spec(params["vaff_b"].shape)]
                + [_const_spec(w.shape) for w in enc_w])

    kernel = functools.partial(_encoder_kernel, num_layers=cfg["num_layers"],
                               num_heads=cfg["num_heads"], ksize=cfg["kernel_size"])
    return pl.pallas_call(
        kernel,
        out_shape=jax.ShapeDtypeStruct((B, Lv, D), jnp.float32),
        grid=(B,),
        in_specs=in_specs,
        out_specs=_batch_spec((1, Lv, D)),
        scratch_shapes=[pltpu.VMEM((Lv + 2 * PAD_BASE, D), jnp.float32)],
        compiler_params=pltpu.CompilerParams(dimension_semantics=("parallel",)),
    )(video_features.astype(jnp.float32), mask3, pos,
      params["vaff_w"], params["vaff_b"], *enc_w)


# ------------------- kernel 2: query embedding + encoder (fused) -------------------

def _query_encoder_kernel(wemb_ref, cemb_ref, m_ref, pos_ref,
                          cconv_w_ref, cconv_b_ref, pre_w_ref, pre_b_ref, *rest,
                          num_layers, num_heads, ksize, num_chars, word_dim, char_dim):
    # rest = 14 encoder weight refs, out_ref, pad scratch
    o_ref, pad_ref = rest[-2], rest[-1]
    w = _load_enc_weights(rest[:-2])
    Lq = wemb_ref.shape[1]

    # TODO(synk): original char Conv2d CNN source not provided; stand-in =
    # pointwise conv + ReLU + max over characters (char-major sublane layout so the
    # max uses aligned static slices instead of a reshape/strided gather).
    cflat = cemb_ref[0].astype(jnp.float32)                              # (C*Lq, cd)
    y = jnp.maximum(
        jnp.dot(cflat, cconv_w_ref[...], preferred_element_type=jnp.float32)
        + cconv_b_ref[...], 0.0)
    cmax = y[0:Lq, :]
    for k in range(1, num_chars):
        cmax = jnp.maximum(cmax, y[k * Lq:(k + 1) * Lq, :])              # (Lq, cd)

    # embedding projection of [word_emb ; char_emb] as a concat-free split matmul
    x = (jnp.dot(wemb_ref[0].astype(jnp.float32), pre_w_ref[0:word_dim, :],
                 preferred_element_type=jnp.float32)
         + jnp.dot(cmax, pre_w_ref[word_dim:word_dim + char_dim, :],
                   preferred_element_type=jnp.float32)
         + pre_b_ref[...])

    key_mask = m_ref[0].astype(jnp.float32)
    pad_ref[...] = jnp.zeros(pad_ref.shape, jnp.float32)
    out = _encoder_block(x, key_mask, pos_ref[...].astype(jnp.float32), w, pad_ref,
                         num_layers=num_layers, num_heads=num_heads, ksize=ksize)
    o_ref[0] = out.astype(o_ref.dtype)


def query_encoder(params, word_ids, char_ids, q_mask, cfg):
    B, Lq = word_ids.shape
    C = char_ids.shape[2]
    cd, wd, D = cfg["char_dim"], cfg["word_dim"], cfg["dim"]

    # embedding gathers stay in XLA (data-dependent gather)
    w_emb = jnp.take(params["word_emb"], word_ids, axis=0).astype(jnp.float32)   # (B,Lq,wd)
    c_emb = jnp.take(params["char_emb"], char_ids, axis=0)                       # (B,Lq,C,cd)
    c_flat = jnp.transpose(c_emb, (0, 2, 1, 3)).reshape(B, C * Lq, cd).astype(jnp.float32)

    mask3 = q_mask.reshape(B, 1, Lq).astype(jnp.float32)
    pos = params["enc_pos_emb"][:Lq]
    enc_w = [params["enc_" + n] for n in ENC_WEIGHT_NAMES]

    in_specs = ([_batch_spec((1, Lq, wd)), _batch_spec((1, C * Lq, cd)),
                 _batch_spec((1, 1, Lq)), _const_spec((Lq, D)),
                 _const_spec(params["char_conv_w"].shape),
                 _const_spec(params["char_conv_b"].shape),
                 _const_spec(params["emb_proj_w"].shape),
                 _const_spec(params["emb_proj_b"].shape)]
                + [_const_spec(w.shape) for w in enc_w])

    kernel = functools.partial(_query_encoder_kernel, num_layers=cfg["num_layers"],
                               num_heads=cfg["num_heads"], ksize=cfg["kernel_size"],
                               num_chars=C, word_dim=wd, char_dim=cd)
    return pl.pallas_call(
        kernel,
        out_shape=jax.ShapeDtypeStruct((B, Lq, D), jnp.float32),
        grid=(B,),
        in_specs=in_specs,
        out_specs=_batch_spec((1, Lq, D)),
        scratch_shapes=[pltpu.VMEM((Lq + 2 * PAD_BASE, D), jnp.float32)],
        compiler_params=pltpu.CompilerParams(dimension_semantics=("parallel",)),
    )(w_emb, c_flat, mask3, pos, params["char_conv_w"], params["char_conv_b"],
      params["emb_proj_w"], params["emb_proj_b"], *enc_w)


# -------- kernel 3: CQAttention + CQConcatenate + ConditionedPredictor (fused) --------

def _cqa_pred_kernel(c_ref, q_ref, vmc_ref, vmr_ref, qmr_ref, qmc_ref, pos_ref,
                     w4c_ref, w4q_ref, w4m_ref, bias_ref,
                     cqa_w_ref, cqa_b_ref, wpool_ref, cqc_w_ref, cqc_b_ref, *rest,
                     num_layers, num_heads, ksize):
    enc_refs = rest[:14]
    (sln_g, sln_b, eln_g, eln_b,
     w1s, b1s, w2s, b2s, w1e, b1e, w2e, b2e) = rest[14:26]
    s_ref, e_ref = rest[26], rest[27]
    pad_ref = rest[28]

    c = c_ref[0].astype(jnp.float32)        # (Lv, D)
    q = q_ref[0].astype(jnp.float32)        # (Lq, D)
    vmc = vmc_ref[0].astype(jnp.float32)    # (Lv, 1)
    vmr = vmr_ref[0].astype(jnp.float32)    # (1, Lv)
    qmr = qmr_ref[0].astype(jnp.float32)    # (1, Lq)
    qmc = qmc_ref[0].astype(jnp.float32)    # (Lq, 1)
    D = c.shape[1]

    # ---- CQAttention: trilinear score (N=1 projections on the VPU as lane reductions)
    s0 = jnp.sum(c * w4c_ref[...], axis=-1, keepdims=True)                # (Lv, 1)
    s1 = jnp.sum(q * w4q_ref[...], axis=-1, keepdims=True).T              # (1, Lq)
    s2 = jax.lax.dot_general(c * w4m_ref[...], q, (((1,), (1,)), ((), ())),
                             preferred_element_type=jnp.float32)           # (Lv, Lq)
    score = s0 + s1 + s2 + bias_ref[...]

    score_q = _softmax_rows(score + (1.0 - qmr) * NEG_INF)                 # over query
    score_c = _softmax_cols(score + (1.0 - vmc) * NEG_INF)                 # over context

    c2q = jnp.dot(score_q, q, preferred_element_type=jnp.float32)          # (Lv, D)
    qq = jax.lax.dot_general(score_q, score_c, (((1,), (1,)), ((), ())),
                             preferred_element_type=jnp.float32)            # (Lv, Lv)
    q2c = jnp.dot(qq, c, preferred_element_type=jnp.float32)               # (Lv, D)

    # [c, c2q, c*c2q, c*q2c] @ W  rewritten as concat-free split matmuls
    cqa_w = cqa_w_ref[...]
    feat = (jnp.dot(c, cqa_w[0:D, :], preferred_element_type=jnp.float32)
            + jnp.dot(c2q, cqa_w[D:2 * D, :], preferred_element_type=jnp.float32)
            + jnp.dot(c * c2q, cqa_w[2 * D:3 * D, :], preferred_element_type=jnp.float32)
            + jnp.dot(c * q2c, cqa_w[3 * D:4 * D, :], preferred_element_type=jnp.float32)
            + cqa_b_ref[...])

    # ---- CQConcatenate: weighted pool of the query, concat-free 1x1 conv ----
    alpha = jnp.sum(q * wpool_ref[...], axis=-1, keepdims=True)            # (Lq, 1)
    alphas = _softmax_cols(alpha + (1.0 - qmc) * NEG_INF)
    pooled = jnp.sum(q * alphas, axis=0, keepdims=True)                    # (1, D)
    cqc_w = cqc_w_ref[...]
    x = (jnp.dot(feat, cqc_w[0:D, :], preferred_element_type=jnp.float32)
         + jnp.dot(pooled, cqc_w[D:2 * D, :], preferred_element_type=jnp.float32)
         + cqc_b_ref[...])                                                 # (Lv, D)

    # ---- ConditionedPredictor: shared encoder applied twice + start/end heads ----
    w = _load_enc_weights(enc_refs)
    pos = pos_ref[...].astype(jnp.float32)
    pad_ref[...] = jnp.zeros(pad_ref.shape, jnp.float32)
    start_feat = _encoder_block(x, vmr, pos, w, pad_ref, num_layers=num_layers,
                                num_heads=num_heads, ksize=ksize)
    end_feat = _encoder_block(start_feat, vmr, pos, w, pad_ref, num_layers=num_layers,
                              num_heads=num_heads, ksize=ksize)

    # [LN(feat), x] @ W1 rewritten as split matmuls; N=1 heads as lane reductions.
    s_hidden = (jnp.dot(_ln(start_feat, sln_g[...], sln_b[...]), w1s[0:D, :],
                        preferred_element_type=jnp.float32)
                + jnp.dot(x, w1s[D:2 * D, :], preferred_element_type=jnp.float32)
                + b1s[...])
    e_hidden = (jnp.dot(_ln(end_feat, eln_g[...], eln_b[...]), w1e[0:D, :],
                        preferred_element_type=jnp.float32)
                + jnp.dot(x, w1e[D:2 * D, :], preferred_element_type=jnp.float32)
                + b1e[...])
    s_hidden = jnp.maximum(s_hidden, 0.0)
    e_hidden = jnp.maximum(e_hidden, 0.0)
    s_logit = jnp.sum(s_hidden * w2s[...], axis=-1, keepdims=True) + b2s[...]
    e_logit = jnp.sum(e_hidden * w2e[...], axis=-1, keepdims=True) + b2e[...]

    mask_bias = (1.0 - vmc) * NEG_INF
    s_ref[0] = (s_logit + mask_bias).astype(s_ref.dtype)
    e_ref[0] = (e_logit + mask_bias).astype(e_ref.dtype)


def cqa_predictor(params, context, query, v_mask, q_mask, cfg):
    B, Lv, D = context.shape
    Lq = query.shape[1]
    vmc = v_mask.reshape(B, Lv, 1).astype(jnp.float32)
    vmr = v_mask.reshape(B, 1, Lv).astype(jnp.float32)
    qmr = q_mask.reshape(B, 1, Lq).astype(jnp.float32)
    qmc = q_mask.reshape(B, Lq, 1).astype(jnp.float32)
    pos = params["pred_pos_emb"][:Lv]
    cqa_w = [params[n] for n in CQA_WEIGHT_NAMES]
    enc_w = [params["pred_" + n] for n in ENC_WEIGHT_NAMES]
    head_w = [params[n] for n in PRED_HEAD_NAMES]

    in_specs = ([_batch_spec((1, Lv, D)), _batch_spec((1, Lq, D)),
                 _batch_spec((1, Lv, 1)), _batch_spec((1, 1, Lv)),
                 _batch_spec((1, 1, Lq)), _batch_spec((1, Lq, 1)),
                 _const_spec((Lv, D))]
                + [_const_spec(w.shape) for w in cqa_w]
                + [_const_spec(w.shape) for w in enc_w]
                + [_const_spec(w.shape) for w in head_w])

    kernel = functools.partial(_cqa_pred_kernel, num_layers=cfg["num_layers"],
                               num_heads=cfg["num_heads"], ksize=cfg["kernel_size"])
    s, e = pl.pallas_call(
        kernel,
        out_shape=(jax.ShapeDtypeStruct((B, Lv, 1), jnp.float32),
                   jax.ShapeDtypeStruct((B, Lv, 1), jnp.float32)),
        grid=(B,),
        in_specs=in_specs,
        out_specs=(_batch_spec((1, Lv, 1)), _batch_spec((1, Lv, 1))),
        scratch_shapes=[pltpu.VMEM((Lv + 2 * PAD_BASE, D), jnp.float32)],
        compiler_params=pltpu.CompilerParams(dimension_semantics=("parallel",)),
    )(context, query, vmc, vmr, qmr, qmc, pos, *cqa_w, *enc_w, *head_w)
    return s[..., 0], e[..., 0]


# ----------------------------- full forward -----------------------------

def localizer_forward(params, word_ids, char_ids, video_features, v_mask, q_mask, cfg):
    video = video_encoder(params, video_features, v_mask, cfg)
    query = query_encoder(params, word_ids, char_ids, q_mask, cfg)
    # TODO(synk): video_query_loss / video_video_loss (vq_mi / vv_mi branches) source not
    # provided; flags treated as False, losses returned as 0.
    vq_mi_loss = 0.0
    vv_mi_loss = 0.0
    start_logits, end_logits = cqa_predictor(params, video, query, v_mask, q_mask, cfg)
    return start_logits, end_logits, vq_mi_loss, vv_mi_loss


# ----------------------------- parameter init -----------------------------

def _xavier(key, shape, fan_in, fan_out):
    bound = math.sqrt(6.0 / (fan_in + fan_out))
    return jax.random.uniform(key, shape, jnp.float32, -bound, bound)


def build_params(key, cfg):
    keys = iter([jax.random.fold_in(key, i) for i in range(512)])
    nk = lambda: next(keys)
    D, K, NL = cfg["dim"], cfg["kernel_size"], cfg["num_layers"]
    p = {}
    p["word_emb"] = 0.1 * jax.random.normal(nk(), (cfg["num_words"], cfg["word_dim"]), jnp.float32)
    p["char_emb"] = 0.1 * jax.random.normal(nk(), (cfg["num_chars"], cfg["char_dim"]), jnp.float32)
    p["char_conv_w"] = _xavier(nk(), (cfg["char_dim"], cfg["char_dim"]),
                               cfg["char_dim"], cfg["char_dim"])
    p["char_conv_b"] = jnp.zeros((1, cfg["char_dim"]))
    emb_in = cfg["word_dim"] + cfg["char_dim"]
    p["emb_proj_w"] = _xavier(nk(), (emb_in, D), emb_in, D)
    p["emb_proj_b"] = jnp.zeros((1, D))
    p["vaff_w"] = _xavier(nk(), (cfg["visual_dim"], D), cfg["visual_dim"], D)
    p["vaff_b"] = jnp.zeros((1, D))

    def add_encoder(prefix):
        p[prefix + "pos_emb"] = 0.02 * jax.random.normal(nk(), (cfg["max_pos_len"], D), jnp.float32)
        p[prefix + "conv_ln_g"] = jnp.ones((NL, D))
        p[prefix + "conv_ln_b"] = jnp.zeros((NL, D))
        p[prefix + "conv_dw_w"] = _xavier(nk(), (NL * K, D), K, K)      # stacked depthwise taps
        p[prefix + "conv_dw_b"] = jnp.zeros((NL, D))
        p[prefix + "conv_pw_w"] = _xavier(nk(), (NL * D, D), D, D)      # stacked pointwise mats
        p[prefix + "conv_pw_b"] = jnp.zeros((NL, D))
        p[prefix + "attn_ln1_g"] = jnp.ones((1, D))
        p[prefix + "attn_ln1_b"] = jnp.zeros((1, D))
        p[prefix + "attn_ln2_g"] = jnp.ones((1, D))
        p[prefix + "attn_ln2_b"] = jnp.zeros((1, D))
        p[prefix + "attn_qkv_w"] = _xavier(nk(), (D, 3 * D), D, D)      # fused Q|K|V projection
        p[prefix + "attn_qkv_b"] = jnp.zeros((1, 3 * D))
        p[prefix + "attn_o_w"] = _xavier(nk(), (D, D), D, D)
        p[prefix + "attn_o_b"] = jnp.zeros((1, D))

    add_encoder("enc_")    # shared encoder for video + query
    add_encoder("pred_")   # encoder inside the conditioned predictor

    p["cqa_w4c"] = _xavier(nk(), (1, D), D, 1)
    p["cqa_w4q"] = _xavier(nk(), (1, D), D, 1)
    p["cqa_w4m"] = _xavier(nk(), (1, D), 1, D)
    p["cqa_bias"] = jnp.zeros((1, 1))
    p["cqa_proj_w"] = _xavier(nk(), (4 * D, D), 4 * D, D)
    p["cqa_proj_b"] = jnp.zeros((1, D))
    p["wpool_w"] = _xavier(nk(), (1, D), D, 1)
    p["cqc_proj_w"] = _xavier(nk(), (2 * D, D), 2 * D, D)
    p["cqc_proj_b"] = jnp.zeros((1, D))
    p["pred_start_ln_g"] = jnp.ones((1, D)); p["pred_start_ln_b"] = jnp.zeros((1, D))
    p["pred_end_ln_g"] = jnp.ones((1, D));   p["pred_end_ln_b"] = jnp.zeros((1, D))
    p["pred_start_w1"] = _xavier(nk(), (2 * D, D), 2 * D, D); p["pred_start_b1"] = jnp.zeros((1, D))
    p["pred_start_w2"] = _xavier(nk(), (1, D), D, 1);         p["pred_start_b2"] = jnp.zeros((1, 1))
    p["pred_end_w1"] = _xavier(nk(), (2 * D, D), 2 * D, D);   p["pred_end_b1"] = jnp.zeros((1, D))
    p["pred_end_w2"] = _xavier(nk(), (1, D), D, 1);           p["pred_end_b2"] = jnp.zeros((1, 1))
    return p


# ----------------------------- main -----------------------------

if __name__ == "__main__":
    cfg = dict(dim=32, num_heads=4, num_layers=4, kernel_size=7, max_pos_len=16,
               visual_dim=64, word_dim=32, char_dim=16, num_words=100, num_chars=20,
               drop_rate=0.0)
    B, Lv, Lq, C = 2, 16, 8, 4

    key = jax.random.PRNGKey(0)
    params = build_params(key, cfg)

    k1, k2, k3 = jax.random.split(jax.random.fold_in(key, 999), 3)
    word_ids = jax.random.randint(k1, (B, Lq), 1, cfg["num_words"])
    char_ids = jax.random.randint(k2, (B, Lq, C), 1, cfg["num_chars"])
    video_features = jax.random.normal(k3, (B, Lv, cfg["visual_dim"]), jnp.float32)

    v_len = jnp.array([Lv, 12])
    q_len = jnp.array([Lq, 5])
    v_mask = (jnp.arange(Lv)[None, :] < v_len[:, None]).astype(jnp.float32)
    q_mask = (jnp.arange(Lq)[None, :] < q_len[:, None]).astype(jnp.float32)

    start_logits, end_logits, vq_mi, vv_mi = localizer_forward(
        params, word_ids, char_ids, video_features, v_mask, q_mask, cfg)
    jax.block_until_ready((start_logits, end_logits))

    assert start_logits.shape == (B, Lv) and end_logits.shape == (B, Lv)
    assert bool(jnp.all(jnp.isfinite(start_logits))) and bool(jnp.all(jnp.isfinite(end_logits)))
    print("KERNEL_OK")
</pallas_src>

<mosaic_0001>
module attributes {stable_mosaic.version = 11 : i64} {
  func.func @_encoder_kernel(%arg0: i32, %arg1: memref<1x16x64xf32, #tpu.memory_space<vmem>>, %arg2: memref<1x1x16xf32, #tpu.memory_space<vmem>>, %arg3: memref<16x32xf32, #tpu.memory_space<vmem>>, %arg4: memref<64x32xf32, #tpu.memory_space<vmem>>, %arg5: memref<1x32xf32, #tpu.memory_space<vmem>>, %arg6: memref<4x32xf32, #tpu.memory_space<vmem>>, %arg7: memref<4x32xf32, #tpu.memory_space<vmem>>, %arg8: memref<28x32xf32, #tpu.memory_space<vmem>>, %arg9: memref<4x32xf32, #tpu.memory_space<vmem>>, %arg10: memref<128x32xf32, #tpu.memory_space<vmem>>, %arg11: memref<4x32xf32, #tpu.memory_space<vmem>>, %arg12: memref<1x32xf32, #tpu.memory_space<vmem>>, %arg13: memref<1x32xf32, #tpu.memory_space<vmem>>, %arg14: memref<32x96xf32, #tpu.memory_space<vmem>>, %arg15: memref<1x96xf32, #tpu.memory_space<vmem>>, %arg16: memref<1x32xf32, #tpu.memory_space<vmem>>, %arg17: memref<1x32xf32, #tpu.memory_space<vmem>>, %arg18: memref<32x32xf32, #tpu.memory_space<vmem>>, %arg19: memref<1x32xf32, #tpu.memory_space<vmem>>, %arg20: memref<1x16x32xf32, #tpu.memory_space<vmem>>, %arg21: memref<32x32xf32, #tpu.memory_space<vmem>>) attributes {dimension_semantics = [#tpu.dimension_semantics<parallel>], iteration_bounds = array<i64: 2>, scalar_prefetch = 0 : i64, scratch_operands = 1 : i64, tpu.core_type = #tpu.core_type<tc>, window_params = [{transform_indices = @transform_0, window_bounds = array<i64: 1, 16, 64>}, {transform_indices = @transform_1, window_bounds = array<i64: 1, 1, 16>}, {pipeline_mode = #tpu.pipeline_mode<synchronous>, transform_indices = @transform_2, window_bounds = array<i64: 16, 32>}, {pipeline_mode = #tpu.pipeline_mode<synchronous>, transform_indices = @transform_3, window_bounds = array<i64: 64, 32>}, {pipeline_mode = #tpu.pipeline_mode<synchronous>, transform_indices = @transform_4, window_bounds = array<i64: 1, 32>}, {pipeline_mode = #tpu.pipeline_mode<synchronous>, transform_indices = @transform_5, window_bounds = array<i64: 4, 32>}, {pipeline_mode = #tpu.pipeline_mode<synchronous>, transform_indices = @transform_6, window_bounds = array<i64: 4, 32>}, {pipeline_mode = #tpu.pipeline_mode<synchronous>, transform_indices = @transform_7, window_bounds = array<i64: 28, 32>}, {pipeline_mode = #tpu.pipeline_mode<synchronous>, transform_indices = @transform_8, window_bounds = array<i64: 4, 32>}, {pipeline_mode = #tpu.pipeline_mode<synchronous>, transform_indices = @transform_9, window_bounds = array<i64: 128, 32>}, {pipeline_mode = #tpu.pipeline_mode<synchronous>, transform_indices = @transform_10, window_bounds = array<i64: 4, 32>}, {pipeline_mode = #tpu.pipeline_mode<synchronous>, transform_indices = @transform_11, window_bounds = array<i64: 1, 32>}, {pipeline_mode = #tpu.pipeline_mode<synchronous>, transform_indices = @transform_12, window_bounds = array<i64: 1, 32>}, {pipeline_mode = #tpu.pipeline_mode<synchronous>, transform_indices = @transform_13, window_bounds = array<i64: 32, 96>}, {pipeline_mode = #tpu.pipeline_mode<synchronous>, transform_indices = @transform_14, window_bounds = array<i64: 1, 96>}, {pipeline_mode = #tpu.pipeline_mode<synchronous>, transform_indices = @transform_15, window_bounds = array<i64: 1, 32>}, {pipeline_mode = #tpu.pipeline_mode<synchronous>, transform_indices = @transform_16, window_bounds = array<i64: 1, 32>}, {pipeline_mode = #tpu.pipeline_mode<synchronous>, transform_indices = @transform_17, window_bounds = array<i64: 32, 32>}, {pipeline_mode = #tpu.pipeline_mode<synchronous>, transform_indices = @transform_18, window_bounds = array<i64: 1, 32>}, {transform_indices = @transform_19, window_bounds = array<i64: 1, 16, 32>}]} {
    %c0 = arith.constant 0 : index
    %c0_0 = arith.constant 0 : index
    %0 = vector.load %arg6[%c0, %c0_0] : memref<4x32xf32, #tpu.memory_space<vmem>>, vector<4x32xf32>
    %c0_1 = arith.constant 0 : index
    %c0_2 = arith.constant 0 : index
    %1 = vector.load %arg7[%c0_1, %c0_2] : memref<4x32xf32, #tpu.memory_space<vmem>>, vector<4x32xf32>
    %c0_3 = arith.constant 0 : index
    %c0_4 = arith.constant 0 : index
    %2 = vector.load %arg8[%c0_3, %c0_4] : memref<28x32xf32, #tpu.memory_space<vmem>>, vector<28x32xf32>
    %c0_5 = arith.constant 0 : index
    %c0_6 = arith.constant 0 : index
    %3 = vector.load %arg9[%c0_5, %c0_6] : memref<4x32xf32, #tpu.memory_space<vmem>>, vector<4x32xf32>
    %c0_7 = arith.constant 0 : index
    %c0_8 = arith.constant 0 : index
    %4 = vector.load %arg10[%c0_7, %c0_8] : memref<128x32xf32, #tpu.memory_space<vmem>>, vector<128x32xf32>
    %c0_9 = arith.constant 0 : index
    %c0_10 = arith.constant 0 : index
    %5 = vector.load %arg11[%c0_9, %c0_10] : memref<4x32xf32, #tpu.memory_space<vmem>>, vector<4x32xf32>
    %c0_11 = arith.constant 0 : index
    %c0_12 = arith.constant 0 : index
    %6 = vector.load %arg12[%c0_11, %c0_12] : memref<1x32xf32, #tpu.memory_space<vmem>>, vector<1x32xf32>
    %c0_13 = arith.constant 0 : index
    %c0_14 = arith.constant 0 : index
    %7 = vector.load %arg13[%c0_13, %c0_14] : memref<1x32xf32, #tpu.memory_space<vmem>>, vector<1x32xf32>
    %c0_15 = arith.constant 0 : index
    %c0_16 = arith.constant 0 : index
    %8 = vector.load %arg14[%c0_15, %c0_16] : memref<32x96xf32, #tpu.memory_space<vmem>>, vector<32x96xf32>
    %c0_17 = arith.constant 0 : index
    %c0_18 = arith.constant 0 : index
    %9 = vector.load %arg15[%c0_17, %c0_18] : memref<1x96xf32, #tpu.memory_space<vmem>>, vector<1x96xf32>
    %c0_19 = arith.constant 0 : index
    %c0_20 = arith.constant 0 : index
    %10 = vector.load %arg16[%c0_19, %c0_20] : memref<1x32xf32, #tpu.memory_space<vmem>>, vector<1x32xf32>
    %c0_21 = arith.constant 0 : index
    %c0_22 = arith.constant 0 : index
    %11 = vector.load %arg17[%c0_21, %c0_22] : memref<1x32xf32, #tpu.memory_space<vmem>>, vector<1x32xf32>
    %c0_23 = arith.constant 0 : index
    %c0_24 = arith.constant 0 : index
    %12 = vector.load %arg18[%c0_23, %c0_24] : memref<32x32xf32, #tpu.memory_space<vmem>>, vector<32x32xf32>
    %c0_25 = arith.constant 0 : index
    %c0_26 = arith.constant 0 : index
    %13 = vector.load %arg19[%c0_25, %c0_26] : memref<1x32xf32, #tpu.memory_space<vmem>>, vector<1x32xf32>
    %c0_27 = arith.constant 0 : index
    %c0_28 = arith.constant 0 : index
    %c0_29 = arith.constant 0 : index
    %14 = vector.load %arg1[%c0_27, %c0_28, %c0_29] : memref<1x16x64xf32, #tpu.memory_space<vmem>>, vector<1x16x64xf32>
    %15 = vector.shape_cast %14 : vector<1x16x64xf32> to vector<16x64xf32>
    %c0_30 = arith.constant 0 : index
    %c0_31 = arith.constant 0 : index
    %16 = vector.load %arg4[%c0_30, %c0_31] : memref<64x32xf32, #tpu.memory_space<vmem>>, vector<64x32xf32>
    %cst = arith.constant dense<0.000000e+00> : vector<16x32xf32>
    %17 = tpu.matmul %15, %16, %cst {dimension_numbers = #tpu.dot_dimension_numbers<[1], [0], [0], [1], [0, 0, 1, 1], [], []>} : vector<16x64xf32>, vector<64x32xf32>, vector<16x32xf32> -> vector<16x32xf32>
    %c0_32 = arith.constant 0 : index
    %c0_33 = arith.constant 0 : index
    %18 = vector.load %arg5[%c0_32, %c0_33] : memref<1x32xf32, #tpu.memory_space<vmem>>, vector<1x32xf32>
    %19 = vector.broadcast %18 : vector<1x32xf32> to vector<16x32xf32>
    %20 = arith.addf %17, %19 : vector<16x32xf32>
    %c0_34 = arith.constant 0 : index
    %c0_35 = arith.constant 0 : index
    %c0_36 = arith.constant 0 : index
    %21 = vector.load %arg2[%c0_34, %c0_35, %c0_36] : memref<1x1x16xf32, #tpu.memory_space<vmem>>, vector<1x1x16xf32>
    %22 = vector.shape_cast %21 : vector<1x1x16xf32> to vector<1x16xf32>
    %cst_37 = arith.constant 0.000000e+00 : f32
    %23 = vector.broadcast %cst_37 : f32 to vector<32x32xf32>
    %c0_38 = arith.constant 0 : index
    %c0_39 = arith.constant 0 : index
    %24 = vector.load %arg21[%c0_38, %c0_39] : memref<32x32xf32, #tpu.memory_space<vmem>>, vector<32x32xf32>
    tpu.vector_store %arg21[%c0_38, %c0_39], %23 {strides = array<i32>} : memref<32x32xf32, #tpu.memory_space<vmem>>, vector<32x32xf32>,
    %c0_40 = arith.constant 0 : index
    %c0_41 = arith.constant 0 : index
    %25 = vector.load %arg3[%c0_40, %c0_41] : memref<16x32xf32, #tpu.memory_space<vmem>>, vector<16x32xf32>
    %26 = arith.addf %20, %25 : vector<16x32xf32>
    %27 = vector.extract_strided_slice %0 {offsets = [0, 0], sizes = [1, 32], strides = [1, 1]} : vector<4x32xf32> to vector<1x32xf32>
    %28 = vector.extract_strided_slice %1 {offsets = [0, 0], sizes = [1, 32], strides = [1, 1]} : vector<4x32xf32> to vector<1x32xf32>
    %cst_42 = arith.constant dense<0.000000e+00> : vector<16xf32>
    %29 = vector.multi_reduction <add>, %26, %cst_42 [1] : vector<16x32xf32> to vector<16xf32>
    %30 = vector.shape_cast %29 : vector<16xf32> to vector<16x1xf32>
    %cst_43 = arith.constant 3.200000e+01 : f32
    %31 = vector.broadcast %cst_43 : f32 to vector<16x1xf32>
    %32 = arith.divf %30, %31 : vector<16x1xf32>
    %33 = vector.broadcast %32 : vector<16x1xf32> to vector<16x32xf32>
    %34 = arith.subf %26, %33 : vector<16x32xf32>
    %35 = arith.mulf %34, %34 : vector<16x32xf32>
    %cst_44 = arith.constant dense<0.000000e+00> : vector<16xf32>
    %36 = vector.multi_reduction <add>, %35, %cst_44 [1] : vector<16x32xf32> to vector<16xf32>
    %37 = vector.shape_cast %36 : vector<16xf32> to vector<16x1xf32>
    %cst_45 = arith.constant 3.200000e+01 : f32
    %38 = vector.broadcast %cst_45 : f32 to vector<16x1xf32>
    %39 = arith.divf %37, %38 : vector<16x1xf32>
    %40 = vector.broadcast %32 : vector<16x1xf32> to vector<16x32xf32>
    %41 = arith.subf %26, %40 : vector<16x32xf32>
    %cst_46 = arith.constant 9.99999974E-6 : f32
    %42 = vector.broadcast %cst_46 : f32 to vector<16x1xf32>
    %43 = arith.addf %39, %42 : vector<16x1xf32>
    %44 = math.rsqrt %43 : vector<16x1xf32>
    %45 = vector.broadcast %44 : vector<16x1xf32> to vector<16x32xf32>
    %46 = arith.mulf %41, %45 : vector<16x32xf32>
    %47 = vector.broadcast %27 : vector<1x32xf32> to vector<16x32xf32>
    %48 = arith.mulf %46, %47 : vector<16x32xf32>
    %49 = vector.broadcast %28 : vector<1x32xf32> to vector<16x32xf32>
    %50 = arith.addf %48, %49 : vector<16x32xf32>
    %c8 = arith.constant 8 : index
    %c0_47 = arith.constant 0 : index
    %51 = vector.load %arg21[%c8, %c0_47] : memref<32x32xf32, #tpu.memory_space<vmem>>, vector<16x32xf32>
    tpu.vector_store %arg21[%c8, %c0_47], %50 {strides = array<i32>} : memref<32x32xf32, #tpu.memory_space<vmem>>, vector<16x32xf32>,
    %c0_48 = arith.constant 0 : index
    %c0_49 = arith.constant 0 : index
    %52 = vector.load %arg21[%c0_48, %c0_49] : memref<32x32xf32, #tpu.memory_space<vmem>>, vector<32x32xf32>
    %53 = vector.extract_strided_slice %52 {offsets = [5, 0], sizes = [16, 32], strides = [1, 1]} : vector<32x32xf32> to vector<16x32xf32>
    %54 = vector.extract_strided_slice %2 {offsets = [0, 0], sizes = [1, 32], strides = [1, 1]} : vector<28x32xf32> to vector<1x32xf32>
    %55 = vector.broadcast %54 : vector<1x32xf32> to vector<16x32xf32>
    %56 = arith.mulf %53, %55 : vector<16x32xf32>
    %57 = vector.extract_strided_slice %52 {offsets = [6, 0], sizes = [16, 32], strides = [1, 1]} : vector<32x32xf32> to vector<16x32xf32>
    %58 = vector.extract_strided_slice %2 {offsets = [1, 0], sizes = [1, 32], strides = [1, 1]} : vector<28x32xf32> to vector<1x32xf32>
    %59 = vector.broadcast %58 : vector<1x32xf32> to vector<16x32xf32>
    %60 = arith.mulf %57, %59 : vector<16x32xf32>
    %61 = arith.addf %56, %60 : vector<16x32xf32>
    %62 = vector.extract_strided_slice %52 {offsets = [7, 0], sizes = [16, 32], strides = [1, 1]} : vector<32x32xf32> to vector<16x32xf32>
    %63 = vector.extract_strided_slice %2 {offsets = [2, 0], sizes = [1, 32], strides = [1, 1]} : vector<28x32xf32> to vector<1x32xf32>
    %64 = vector.broadcast %63 : vector<1x32xf32> to vector<16x32xf32>
    %65 = arith.mulf %62, %64 : vector<16x32xf32>
    %66 = arith.addf %61, %65 : vector<16x32xf32>
    %67 = vector.extract_strided_slice %52 {offsets = [8, 0], sizes = [16, 32], strides = [1, 1]} : vector<32x32xf32> to vector<16x32xf32>
    %68 = vector.extract_strided_slice %2 {offsets = [3, 0], sizes = [1, 32], strides = [1, 1]} : vector<28x32xf32> to vector<1x32xf32>
    %69 = vector.broadcast %68 : vector<1x32xf32> to vector<16x32xf32>
    %70 = arith.mulf %67, %69 : vector<16x32xf32>
    %71 = arith.addf %66, %70 : vector<16x32xf32>
    %72 = vector.extract_strided_slice %52 {offsets = [9, 0], sizes = [16, 32], strides = [1, 1]} : vector<32x32xf32> to vector<16x32xf32>
    %73 = vector.extract_strided_slice %2 {offsets = [4, 0], sizes = [1, 32], strides = [1, 1]} : vector<28x32xf32> to vector<1x32xf32>
    %74 = vector.broadcast %73 : vector<1x32xf32> to vector<16x32xf32>
    %75 = arith.mulf %72, %74 : vector<16x32xf32>
    %76 = arith.addf %71, %75 : vector<16x32xf32>
    %77 = vector.extract_strided_slice %52 {offsets = [10, 0], sizes = [16, 32], strides = [1, 1]} : vector<32x32xf32> to vector<16x32xf32>
    %78 = vector.extract_strided_slice %2 {offsets = [5, 0], sizes = [1, 32], strides = [1, 1]} : vector<28x32xf32> to vector<1x32xf32>
    %79 = vector.broadcast %78 : vector<1x32xf32> to vector<16x32xf32>
    %80 = arith.mulf %77, %79 : vector<16x32xf32>
    %81 = arith.addf %76, %80 : vector<16x32xf32>
    %82 = vector.extract_strided_slice %52 {offsets = [11, 0], sizes = [16, 32], strides = [1, 1]} : vector<32x32xf32> to vector<16x32xf32>
    %83 = vector.extract_strided_slice %2 {offsets = [6, 0], sizes = [1, 32], strides = [1, 1]} : vector<28x32xf32> to vector<1x32xf32>
    %84 = vector.broadcast %83 : vector<1x32xf32> to vector<16x32xf32>
    %85 = arith.mulf %82, %84 : vector<16x32xf32>
    %86 = arith.addf %81, %85 : vector<16x32xf32>
    %87 = vector.extract_strided_slice %3 {offsets = [0, 0], sizes = [1, 32], strides = [1, 1]} : vector<4x32xf32> to vector<1x32xf32>
    %88 = vector.broadcast %87 : vector<1x32xf32> to vector<16x32xf32>
    %89 = arith.addf %86, %88 : vector<16x32xf32>
    %90 = vector.extract_strided_slice %4 {offsets = [0, 0], sizes = [32, 32], strides = [1, 1]} : vector<128x32xf32> to vector<32x32xf32>
    %cst_50 = arith.constant dense<0.000000e+00> : vector<16x32xf32>
    %91 = tpu.matmul %89, %90, %cst_50 {dimension_numbers = #tpu.dot_dimension_numbers<[1], [0], [0], [1], [0, 0, 1, 1], [], []>} : vector<16x32xf32>, vector<32x32xf32>, vector<16x32xf32> -> vector<16x32xf32>
    %92 = vector.extract_strided_slice %5 {offsets = [0, 0], sizes = [1, 32], strides = [1, 1]} : vector<4x32xf32> to vector<1x32xf32>
    %93 = vector.broadcast %92 : vector<1x32xf32> to vector<16x32xf32>
    %94 = arith.addf %91, %93 : vector<16x32xf32>
    %cst_51 = arith.constant 0.000000e+00 : f32
    %95 = vector.broadcast %cst_51 : f32 to vector<16x32xf32>
    %96 = arith.maximumf %94, %95 : vector<16x32xf32>
    %97 = arith.addf %26, %96 : vector<16x32xf32>
    %98 = vector.extract_strided_slice %0 {offsets = [1, 0], sizes = [1, 32], strides = [1, 1]} : vector<4x32xf32> to vector<1x32xf32>
    %99 = vector.extract_strided_slice %1 {offsets = [1, 0], sizes = [1, 32], strides = [1, 1]} : vector<4x32xf32> to vector<1x32xf32>
    %cst_52 = arith.constant dense<0.000000e+00> : vector<16xf32>
    %100 = vector.multi_reduction <add>, %97, %cst_52 [1] : vector<16x32xf32> to vector<16xf32>
    %101 = vector.shape_cast %100 : vector<16xf32> to vector<16x1xf32>
    %cst_53 = arith.constant 3.200000e+01 : f32
    %102 = vector.broadcast %cst_53 : f32 to vector<16x1xf32>
    %103 = arith.divf %101, %102 : vector<16x1xf32>
    %104 = vector.broadcast %103 : vector<16x1xf32> to vector<16x32xf32>
    %105 = arith.subf %97, %104 : vector<16x32xf32>
    %106 = arith.mulf %105, %105 : vector<16x32xf32>
    %cst_54 = arith.constant dense<0.000000e+00> : vector<16xf32>
    %107 = vector.multi_reduction <add>, %106, %cst_54 [1] : vector<16x32xf32> to vector<16xf32>
    %108 = vector.shape_cast %107 : vector<16xf32> to vector<16x1xf32>
    %cst_55 = arith.constant 3.200000e+01 : f32
    %109 = vector.broadcast %cst_55 : f32 to vector<16x1xf32>
    %110 = arith.divf %108, %109 : vector<16x1xf32>
    %111 = vector.broadcast %103 : vector<16x1xf32> to vector<16x32xf32>
    %112 = arith.subf %97, %111 : vector<16x32xf32>
    %cst_56 = arith.constant 9.99999974E-6 : f32
    %113 = vector.broadcast %cst_56 : f32 to vector<16x1xf32>
    %114 = arith.addf %110, %113 : vector<16x1xf32>
    %115 = math.rsqrt %114 : vector<16x1xf32>
    %116 = vector.broadcast %115 : vector<16x1xf32> to vector<16x32xf32>
    %117 = arith.mulf %112, %116 : vector<16x32xf32>
    %118 = vector.broadcast %98 : vector<1x32xf32> to vector<16x32xf32>
    %119 = arith.mulf %117, %118 : vector<16x32xf32>
    %120 = vector.broadcast %99 : vector<1x32xf32> to vector<16x32xf32>
    %121 = arith.addf %119, %120 : vector<16x32xf32>
    %c8_57 = arith.constant 8 : index
    %c0_58 = arith.constant 0 : index
    %122 = vector.load %arg21[%c8_57, %c0_58] : memref<32x32xf32, #tpu.memory_space<vmem>>, vector<16x32xf32>
    tpu.vector_store %arg21[%c8_57, %c0_58], %121 {strides = array<i32>} : memref<32x32xf32, #tpu.memory_space<vmem>>, vector<16x32xf32>,
    %c0_59 = arith.constant 0 : index
    %c0_60 = arith.constant 0 : index
    %123 = vector.load %arg21[%c0_59, %c0_60] : memref<32x32xf32, #tpu.memory_space<vmem>>, vector<32x32xf32>
    %124 = vector.extract_strided_slice %123 {offsets = [5, 0], sizes = [16, 32], strides = [1, 1]} : vector<32x32xf32> to vector<16x32xf32>
    %125 = vector.extract_strided_slice %2 {offsets = [7, 0], sizes = [1, 32], strides = [1, 1]} : vector<28x32xf32> to vector<1x32xf32>
    %126 = vector.broadcast %125 : vector<1x32xf32> to vector<16x32xf32>
    %127 = arith.mulf %124, %126 : vector<16x32xf32>
    %128 = vector.extract_strided_slice %123 {offsets = [6, 0], sizes = [16, 32], strides = [1, 1]} : vector<32x32xf32> to vector<16x32xf32>
    %129 = vector.extract_strided_slice %2 {offsets = [8, 0], sizes = [1, 32], strides = [1, 1]} : vector<28x32xf32> to vector<1x32xf32>
    %130 = vector.broadcast %129 : vector<1x32xf32> to vector<16x32xf32>
    %131 = arith.mulf %128, %130 : vector<16x32xf32>
    %132 = arith.addf %127, %131 : vector<16x32xf32>
    %133 = vector.extract_strided_slice %123 {offsets = [7, 0], sizes = [16, 32], strides = [1, 1]} : vector<32x32xf32> to vector<16x32xf32>
    %134 = vector.extract_strided_slice %2 {offsets = [9, 0], sizes = [1, 32], strides = [1, 1]} : vector<28x32xf32> to vector<1x32xf32>
    %135 = vector.broadcast %134 : vector<1x32xf32> to vector<16x32xf32>
    %136 = arith.mulf %133, %135 : vector<16x32xf32>
    %137 = arith.addf %132, %136 : vector<16x32xf32>
    %138 = vector.extract_strided_slice %123 {offsets = [8, 0], sizes = [16, 32], strides = [1, 1]} : vector<32x32xf32> to vector<16x32xf32>
    %139 = vector.extract_strided_slice %2 {offsets = [10, 0], sizes = [1, 32], strides = [1, 1]} : vector<28x32xf32> to vector<1x32xf32>
    %140 = vector.broadcast %139 : vector<1x32xf32> to vector<16x32xf32>
    %141 = arith.mulf %138, %140 : vector<16x32xf32>
    %142 = arith.addf %137, %141 : vector<16x32xf32>
    %143 = vector.extract_strided_slice %123 {offsets = [9, 0], sizes = [16, 32], strides = [1, 1]} : vector<32x32xf32> to vector<16x32xf32>
    %144 = vector.extract_strided_slice %2 {offsets = [11, 0], sizes = [1, 32], strides = [1, 1]} : vector<28x32xf32> to vector<1x32xf32>
    %145 = vector.broadcast %144 : vector<1x32xf32> to vector<16x32xf32>
    %146 = arith.mulf %143, %145 : vector<16x32xf32>
    %147 = arith.addf %142, %146 : vector<16x32xf32>
    %148 = vector.extract_strided_slice %123 {offsets = [10, 0], sizes = [16, 32], strides = [1, 1]} : vector<32x32xf32> to vector<16x32xf32>
    %149 = vector.extract_strided_slice %2 {offsets = [12, 0], sizes = [1, 32], strides = [1, 1]} : vector<28x32xf32> to vector<1x32xf32>
    %150 = vector.broadcast %149 : vector<1x32xf32> to vector<16x32xf32>
    %151 = arith.mulf %148, %150 : vector<16x32xf32>
    %152 = arith.addf %147, %151 : vector<16x32xf32>
    %153 = vector.extract_strided_slice %123 {offsets = [11, 0], sizes = [16, 32], strides = [1, 1]} : vector<32x32xf32> to vector<16x32xf32>
    %154 = vector.extract_strided_slice %2 {offsets = [13, 0], sizes = [1, 32], strides = [1, 1]} : vector<28x32xf32> to vector<1x32xf32>
    %155 = vector.broadcast %154 : vector<1x32xf32> to vector<16x32xf32>
    %156 = arith.mulf %153, %155 : vector<16x32xf32>
    %157 = arith.addf %152, %156 : vector<16x32xf32>
    %158 = vector.extract_strided_slice %3 {offsets = [1, 0], sizes = [1, 32], strides = [1, 1]} : vector<4x32xf32> to vector<1x32xf32>
    %159 = vector.broadcast %158 : vector<1x32xf32> to vector<16x32xf32>
    %160 = arith.addf %157, %159 : vector<16x32xf32>
    %161 = vector.extract_strided_slice %4 {offsets = [32, 0], sizes = [32, 32], strides = [1, 1]} : vector<128x32xf32> to vector<32x32xf32>
    %cst_61 = arith.constant dense<0.000000e+00> : vector<16x32xf32>
    %162 = tpu.matmul %160, %161, %cst_61 {dimension_numbers = #tpu.dot_dimension_numbers<[1], [0], [0], [1], [0, 0, 1, 1], [], []>} : vector<16x32xf32>, vector<32x32xf32>, vector<16x32xf32> -> vector<16x32xf32>
    %163 = vector.extract_strided_slice %5 {offsets = [1, 0], sizes = [1, 32], strides = [1, 1]} : vector<4x32xf32> to vector<1x32xf32>
    %164 = vector.broadcast %163 : vector<1x32xf32> to vector<16x32xf32>
    %165 = arith.addf %162, %164 : vector<16x32xf32>
    %cst_62 = arith.constant 0.000000e+00 : f32
    %166 = vector.broadcast %cst_62 : f32 to vector<16x32xf32>
    %167 = arith.maximumf %165, %166 : vector<16x32xf32>
    %168 = arith.addf %97, %167 : vector<16x32xf32>
    %169 = vector.extract_strided_slice %0 {offsets = [2, 0], sizes = [1, 32], strides = [1, 1]} : vector<4x32xf32> to vector<1x32xf32>
    %170 = vector.extract_strided_slice %1 {offsets = [2, 0], sizes = [1, 32], strides = [1, 1]} : vector<4x32xf32> to vector<1x32xf32>
    %cst_63 = arith.constant dense<0.000000e+00> : vector<16xf32>
    %171 = vector.multi_reduction <add>, %168, %cst_63 [1] : vector<16x32xf32> to vector<16xf32>
    %172 = vector.shape_cast %171 : vector<16xf32> to vector<16x1xf32>
    %cst_64 = arith.constant 3.200000e+01 : f32
    %173 = vector.broadcast %cst_64 : f32 to vector<16x1xf32>
    %174 = arith.divf %172, %173 : vector<16x1xf32>
    %175 = vector.broadcast %174 : vector<16x1xf32> to vector<16x32xf32>
    %176 = arith.subf %168, %175 : vector<16x32xf32>
    %177 = arith.mulf %176, %176 : vector<16x32xf32>
    %cst_65 = arith.constant dense<0.000000e+00> : vector<16xf32>
    %178 = vector.multi_reduction <add>, %177, %cst_65 [1] : vector<16x32xf32> to vector<16xf32>
    %179 = vector.shape_cast %178 : vector<16xf32> to vector<16x1xf32>
    %cst_66 = arith.constant 3.200000e+01 : f32
    %180 = vector.broadcast %cst_66 : f32 to vector<16x1xf32>
    %181 = arith.divf %179, %180 : vector<16x1xf32>
    %182 = vector.broadcast %174 : vector<16x1xf32> to vector<16x32xf32>
    %183 = arith.subf %168, %182 : vector<16x32xf32>
    %cst_67 = arith.constant 9.99999974E-6 : f32
    %184 = vector.broadcast %cst_67 : f32 to vector<16x1xf32>
    %185 = arith.addf %181, %184 : vector<16x1xf32>
    %186 = math.rsqrt %185 : vector<16x1xf32>
    %187 = vector.broadcast %186 : vector<16x1xf32> to vector<16x32xf32>
    %188 = arith.mulf %183, %187 : vector<16x32xf32>
    %189 = vector.broadcast %169 : vector<1x32xf32> to vector<16x32xf32>
    %190 = arith.mulf %188, %189 : vector<16x32xf32>
    %191 = vector.broadcast %170 : vector<1x32xf32> to vector<16x32xf32>
    %192 = arith.addf %190, %191 : vector<16x32xf32>
    %c8_68 = arith.constant 8 : index
    %c0_69 = arith.constant 0 : index
    %193 = vector.load %arg21[%c8_68, %c0_69] : memref<32x32xf32, #tpu.memory_space<vmem>>, vector<16x32xf32>
    tpu.vector_store %arg21[%c8_68, %c0_69], %192 {strides = array<i32>} : memref<32x32xf32, #tpu.memory_space<vmem>>, vector<16x32xf32>,
    %c0_70 = arith.constant 0 : index
    %c0_71 = arith.constant 0 : index
    %194 = vector.load %arg21[%c0_70, %c0_71] : memref<32x32xf32, #tpu.memory_space<vmem>>, vector<32x32xf32>
    %195 = vector.extract_strided_slice %194 {offsets = [5, 0], sizes = [16, 32], strides = [1, 1]} : vector<32x32xf32> to vector<16x32xf32>
    %196 = vector.extract_strided_slice %2 {offsets = [14, 0], sizes = [1, 32], strides = [1, 1]} : vector<28x32xf32> to vector<1x32xf32>
    %197 = vector.broadcast %196 : vector<1x32xf32> to vector<16x32xf32>
    %198 = arith.mulf %195, %197 : vector<16x32xf32>
    %199 = vector.extract_strided_slice %194 {offsets = [6, 0], sizes = [16, 32], strides = [1, 1]} : vector<32x32xf32> to vector<16x32xf32>
    %200 = vector.extract_strided_slice %2 {offsets = [15, 0], sizes = [1, 32], strides = [1, 1]} : vector<28x32xf32> to vector<1x32xf32>
    %201 = vector.broadcast %200 : vector<1x32xf32> to vector<16x32xf32>
    %202 = arith.mulf %199, %201 : vector<16x32xf32>
    %203 = arith.addf %198, %202 : vector<16x32xf32>
    %204 = vector.extract_strided_slice %194 {offsets = [7, 0], sizes = [16, 32], strides = [1, 1]} : vector<32x32xf32> to vector<16x32xf32>
    %205 = vector.extract_strided_slice %2 {offsets = [16, 0], sizes = [1, 32], strides = [1, 1]} : vector<28x32xf32> to vector<1x32xf32>
    %206 = vector.broadcast %205 : vector<1x32xf32> to vector<16x32xf32>
    %207 = arith.mulf %204, %206 : vector<16x32xf32>
    %208 = arith.addf %203, %207 : vector<16x32xf32>
    %209 = vector.extract_strided_slice %194 {offsets = [8, 0], sizes = [16, 32], strides = [1, 1]} : vector<32x32xf32> to vector<16x32xf32>
    %210 = vector.extract_strided_slice %2 {offsets = [17, 0], sizes = [1, 32], strides = [1, 1]} : vector<28x32xf32> to vector<1x32xf32>
    %211 = vector.broadcast %210 : vector<1x32xf32> to vector<16x32xf32>
    %212 = arith.mulf %209, %211 : vector<16x32xf32>
    %213 = arith.addf %208, %212 : vector<16x32xf32>
    %214 = vector.extract_strided_slice %194 {offsets = [9, 0], sizes = [16, 32], strides = [1, 1]} : vector<32x32xf32> to vector<16x32xf32>
    %215 = vector.extract_strided_slice %2 {offsets = [18, 0], sizes = [1, 32], strides = [1, 1]} : vector<28x32xf32> to vector<1x32xf32>
    %216 = vector.broadcast %215 : vector<1x32xf32> to vector<16x32xf32>
    %217 = arith.mulf %214, %216 : vector<16x32xf32>
    %218 = arith.addf %213, %217 : vector<16x32xf32>
    %219 = vector.extract_strided_slice %194 {offsets = [10, 0], sizes = [16, 32], strides = [1, 1]} : vector<32x32xf32> to vector<16x32xf32>
    %220 = vector.extract_strided_slice %2 {offsets = [19, 0], sizes = [1, 32], strides = [1, 1]} : vector<28x32xf32> to vector<1x32xf32>
    %221 = vector.broadcast %220 : vector<1x32xf32> to vector<16x32xf32>
    %222 = arith.mulf %219, %221 : vector<16x32xf32>
    %223 = arith.addf %218, %222 : vector<16x32xf32>
    %224 = vector.extract_strided_slice %194 {offsets = [11, 0], sizes = [16, 32], strides = [1, 1]} : vector<32x32xf32> to vector<16x32xf32>
    %225 = vector.extract_strided_slice %2 {offsets = [20, 0], sizes = [1, 32], strides = [1, 1]} : vector<28x32xf32> to vector<1x32xf32>
    %226 = vector.broadcast %225 : vector<1x32xf32> to vector<16x32xf32>
    %227 = arith.mulf %224, %226 : vector<16x32xf32>
    %228 = arith.addf %223, %227 : vector<16x32xf32>
    %229 = vector.extract_strided_slice %3 {offsets = [2, 0], sizes = [1, 32], strides = [1, 1]} : vector<4x32xf32> to vector<1x32xf32>
    %230 = vector.broadcast %229 : vector<1x32xf32> to vector<16x32xf32>
    %231 = arith.addf %228, %230 : vector<16x32xf32>
    %232 = vector.extract_strided_slice %4 {offsets = [64, 0], sizes = [32, 32], strides = [1, 1]} : vector<128x32xf32> to vector<32x32xf32>
    %cst_72 = arith.constant dense<0.000000e+00> : vector<16x32xf32>
    %233 = tpu.matmul %231, %232, %cst_72 {dimension_numbers = #tpu.dot_dimension_numbers<[1], [0], [0], [1], [0, 0, 1, 1], [], []>} : vector<16x32xf32>, vector<32x32xf32>, vector<16x32xf32> -> vector<16x32xf32>
    %234 = vector.extract_strided_slice %5 {offsets = [2, 0], sizes = [1, 32], strides = [1, 1]} : vector<4x32xf32> to vector<1x32xf32>
    %235 = vector.broadcast %234 : vector<1x32xf32> to vector<16x32xf32>
    %236 = arith.addf %233, %235 : vector<16x32xf32>
    %cst_73 = arith.constant 0.000000e+00 : f32
    %237 = vector.broadcast %cst_73 : f32 to vector<16x32xf32>
    %238 = arith.maximumf %236, %237 : vector<16x32xf32>
    %239 = arith.addf %168, %238 : vector<16x32xf32>
    %240 = vector.extract_strided_slice %0 {offsets = [3, 0], sizes = [1, 32], strides = [1, 1]} : vector<4x32xf32> to vector<1x32xf32>
    %241 = vector.extract_strided_slice %1 {offsets = [3, 0], sizes = [1, 32], strides = [1, 1]} : vector<4x32xf32> to vector<1x32xf32>
    %cst_74 = arith.constant dense<0.000000e+00> : vector<16xf32>
    %242 = vector.multi_reduction <add>, %239, %cst_74 [1] : vector<16x32xf32> to vector<16xf32>
    %243 = vector.shape_cast %242 : vector<16xf32> to vector<16x1xf32>
    %cst_75 = arith.constant 3.200000e+01 : f32
    %244 = vector.broadcast %cst_75 : f32 to vector<16x1xf32>
    %245 = arith.divf %243, %244 : vector<16x1xf32>
    %246 = vector.broadcast %245 : vector<16x1xf32> to vector<16x32xf32>
    %247 = arith.subf %239, %246 : vector<16x32xf32>
    %248 = arith.mulf %247, %247 : vector<16x32xf32>
    %cst_76 = arith.constant dense<0.000000e+00> : vector<16xf32>
    %249 = vector.multi_reduction <add>, %248, %cst_76 [1] : vector<16x32xf32> to vector<16xf32>
    %250 = vector.shape_cast %249 : vector<16xf32> to vector<16x1xf32>
    %cst_77 = arith.constant 3.200000e+01 : f32
    %251 = vector.broadcast %cst_77 : f32 to vector<16x1xf32>
    %252 = arith.divf %250, %251 : vector<16x1xf32>
    %253 = vector.broadcast %245 : vector<16x1xf32> to vector<16x32xf32>
    %254 = arith.subf %239, %253 : vector<16x32xf32>
    %cst_78 = arith.constant 9.99999974E-6 : f32
    %255 = vector.broadcast %cst_78 : f32 to vector<16x1xf32>
    %256 = arith.addf %252, %255 : vector<16x1xf32>
    %257 = math.rsqrt %256 : vector<16x1xf32>
    %258 = vector.broadcast %257 : vector<16x1xf32> to vector<16x32xf32>
    %259 = arith.mulf %254, %258 : vector<16x32xf32>
    %260 = vector.broadcast %240 : vector<1x32xf32> to vector<16x32xf32>
    %261 = arith.mulf %259, %260 : vector<16x32xf32>
    %262 = vector.broadcast %241 : vector<1x32xf32> to vector<16x32xf32>
    %263 = arith.addf %261, %262 : vector<16x32xf32>
    %c8_79 = arith.constant 8 : index
    %c0_80 = arith.constant 0 : index
    %264 = vector.load %arg21[%c8_79, %c0_80] : memref<32x32xf32, #tpu.memory_space<vmem>>, vector<16x32xf32>
    tpu.vector_store %arg21[%c8_79, %c0_80], %263 {strides = array<i32>} : memref<32x32xf32, #tpu.memory_space<vmem>>, vector<16x32xf32>,
    %c0_81 = arith.constant 0 : index
    %c0_82 = arith.constant 0 : index
    %265 = vector.load %arg21[%c0_81, %c0_82] : memref<32x32xf32, #tpu.memory_space<vmem>>, vector<32x32xf32>
    %266 = vector.extract_strided_slice %265 {offsets = [5, 0], sizes = [16, 32], strides = [1, 1]} : vector<32x32xf32> to vector<16x32xf32>
    %267 = vector.extract_strided_slice %2 {offsets = [21, 0], sizes = [1, 32], strides = [1, 1]} : vector<28x32xf32> to vector<1x32xf32>
    %268 = vector.broadcast %267 : vector<1x32xf32> to vector<16x32xf32>
    %269 = arith.mulf %266, %268 : vector<16x32xf32>
    %270 = vector.extract_strided_slice %265 {offsets = [6, 0], sizes = [16, 32], strides = [1, 1]} : vector<32x32xf32> to vector<16x32xf32>
    %271 = vector.extract_strided_slice %2 {offsets = [22, 0], sizes = [1, 32], strides = [1, 1]} : vector<28x32xf32> to vector<1x32xf32>
    %272 = vector.broadcast %271 : vector<1x32xf32> to vector<16x32xf32>
    %273 = arith.mulf %270, %272 : vector<16x32xf32>
    %274 = arith.addf %269, %273 : vector<16x32xf32>
    %275 = vector.extract_strided_slice %265 {offsets = [7, 0], sizes = [16, 32], strides = [1, 1]} : vector<32x32xf32> to vector<16x32xf32>
    %276 = vector.extract_strided_slice %2 {offsets = [23, 0], sizes = [1, 32], strides = [1, 1]} : vector<28x32xf32> to vector<1x32xf32>
    %277 = vector.broadcast %276 : vector<1x32xf32> to vector<16x32xf32>
    %278 = arith.mulf %275, %277 : vector<16x32xf32>
    %279 = arith.addf %274, %278 : vector<16x32xf32>
    %280 = vector.extract_strided_slice %265 {offsets = [8, 0], sizes = [16, 32], strides = [1, 1]} : vector<32x32xf32> to vector<16x32xf32>
    %281 = vector.extract_strided_slice %2 {offsets = [24, 0], sizes = [1, 32], strides = [1, 1]} : vector<28x32xf32> to vector<1x32xf32>
    %282 = vector.broadcast %281 : vector<1x32xf32> to vector<16x32xf32>
    %283 = arith.mulf %280, %282 : vector<16x32xf32>
    %284 = arith.addf %279, %283 : vector<16x32xf32>
    %285 = vector.extract_strided_slice %265 {offsets = [9, 0], sizes = [16, 32], strides = [1, 1]} : vector<32x32xf32> to vector<16x32xf32>
    %286 = vector.extract_strided_slice %2 {offsets = [25, 0], sizes = [1, 32], strides = [1, 1]} : vector<28x32xf32> to vector<1x32xf32>
    %287 = vector.broadcast %286 : vector<1x32xf32> to vector<16x32xf32>
    %288 = arith.mulf %285, %287 : vector<16x32xf32>
    %289 = arith.addf %284, %288 : vector<16x32xf32>
    %290 = vector.extract_strided_slice %265 {offsets = [10, 0], sizes = [16, 32], strides = [1, 1]} : vector<32x32xf32> to vector<16x32xf32>
    %291 = vector.extract_strided_slice %2 {offsets = [26, 0], sizes = [1, 32], strides = [1, 1]} : vector<28x32xf32> to vector<1x32xf32>
    %292 = vector.broadcast %291 : vector<1x32xf32> to vector<16x32xf32>
    %293 = arith.mulf %290, %292 : vector<16x32xf32>
    %294 = arith.addf %289, %293 : vector<16x32xf32>
    %295 = vector.extract_strided_slice %265 {offsets = [11, 0], sizes = [16, 32], strides = [1, 1]} : vector<32x32xf32> to vector<16x32xf32>
    %296 = vector.extract_strided_slice %2 {offsets = [27, 0], sizes = [1, 32], strides = [1, 1]} : vector<28x32xf32> to vector<1x32xf32>
    %297 = vector.broadcast %296 : vector<1x32xf32> to vector<16x32xf32>
    %298 = arith.mulf %295, %297 : vector<16x32xf32>
    %299 = arith.addf %294, %298 : vector<16x32xf32>
    %300 = vector.extract_strided_slice %3 {offsets = [3, 0], sizes = [1, 32], strides = [1, 1]} : vector<4x32xf32> to vector<1x32xf32>
    %301 = vector.broadcast %300 : vector<1x32xf32> to vector<16x32xf32>
    %302 = arith.addf %299, %301 : vector<16x32xf32>
    %303 = vector.extract_strided_slice %4 {offsets = [96, 0], sizes = [32, 32], strides = [1, 1]} : vector<128x32xf32> to vector<32x32xf32>
    %cst_83 = arith.constant dense<0.000000e+00> : vector<16x32xf32>
    %304 = tpu.matmul %302, %303, %cst_83 {dimension_numbers = #tpu.dot_dimension_numbers<[1], [0], [0], [1], [0, 0, 1, 1], [], []>} : vector<16x32xf32>, vector<32x32xf32>, vector<16x32xf32> -> vector<16x32xf32>
    %305 = vector.extract_strided_slice %5 {offsets = [3, 0], sizes = [1, 32], strides = [1, 1]} : vector<4x32xf32> to vector<1x32xf32>
    %306 = vector.broadcast %305 : vector<1x32xf32> to vector<16x32xf32>
    %307 = arith.addf %304, %306 : vector<16x32xf32>
    %cst_84 = arith.constant 0.000000e+00 : f32
    %308 = vector.broadcast %cst_84 : f32 to vector<16x32xf32>
    %309 = arith.maximumf %307, %308 : vector<16x32xf32>
    %310 = arith.addf %239, %309 : vector<16x32xf32>
    %cst_85 = arith.constant dense<0.000000e+00> : vector<16xf32>
    %311 = vector.multi_reduction <add>, %310, %cst_85 [1] : vector<16x32xf32> to vector<16xf32>
    %312 = vector.shape_cast %311 : vector<16xf32> to vector<16x1xf32>
    %cst_86 = arith.constant 3.200000e+01 : f32
    %313 = vector.broadcast %cst_86 : f32 to vector<16x1xf32>
    %314 = arith.divf %312, %313 : vector<16x1xf32>
    %315 = vector.broadcast %314 : vector<16x1xf32> to vector<16x32xf32>
    %316 = arith.subf %310, %315 : vector<16x32xf32>
    %317 = arith.mulf %316, %316 : vector<16x32xf32>
    %cst_87 = arith.constant dense<0.000000e+00> : vector<16xf32>
    %318 = vector.multi_reduction <add>, %317, %cst_87 [1] : vector<16x32xf32> to vector<16xf32>
    %319 = vector.shape_cast %318 : vector<16xf32> to vector<16x1xf32>
    %cst_88 = arith.constant 3.200000e+01 : f32
    %320 = vector.broadcast %cst_88 : f32 to vector<16x1xf32>
    %321 = arith.divf %319, %320 : vector<16x1xf32>
    %322 = vector.broadcast %314 : vector<16x1xf32> to vector<16x32xf32>
    %323 = arith.subf %310, %322 : vector<16x32xf32>
    %cst_89 = arith.constant 9.99999974E-6 : f32
    %324 = vector.broadcast %cst_89 : f32 to vector<16x1xf32>
    %325 = arith.addf %321, %324 : vector<16x1xf32>
    %326 = math.rsqrt %325 : vector<16x1xf32>
    %327 = vector.broadcast %326 : vector<16x1xf32> to vector<16x32xf32>
    %328 = arith.mulf %323, %327 : vector<16x32xf32>
    %329 = vector.broadcast %6 : vector<1x32xf32> to vector<16x32xf32>
    %330 = arith.mulf %328, %329 : vector<16x32xf32>
    %331 = vector.broadcast %7 : vector<1x32xf32> to vector<16x32xf32>
    %332 = arith.addf %330, %331 : vector<16x32xf32>
    %cst_90 = arith.constant dense<0.000000e+00> : vector<16x96xf32>
    %333 = tpu.matmul %332, %8, %cst_90 {dimension_numbers = #tpu.dot_dimension_numbers<[1], [0], [0], [1], [0, 0, 1, 1], [], []>} : vector<16x32xf32>, vector<32x96xf32>, vector<16x96xf32> -> vector<16x96xf32>
    %334 = vector.broadcast %9 : vector<1x96xf32> to vector<16x96xf32>
    %335 = arith.addf %333, %334 : vector<16x96xf32>
    %cst_91 = arith.constant 1.000000e+00 : f32
    %336 = vector.broadcast %cst_91 : f32 to vector<1x16xf32>
    %337 = arith.subf %336, %22 : vector<1x16xf32>
    %cst_92 = arith.constant -1.000000e+30 : f32
    %338 = vector.broadcast %cst_92 : f32 to vector<1x16xf32>
    %339 = arith.mulf %337, %338 : vector<1x16xf32>
    %340 = vector.extract_strided_slice %335 {offsets = [0, 0], sizes = [16, 8], strides = [1, 1]} : vector<16x96xf32> to vector<16x8xf32>
    %341 = vector.extract_strided_slice %335 {offsets = [0, 32], sizes = [16, 8], strides = [1, 1]} : vector<16x96xf32> to vector<16x8xf32>
    %342 = vector.extract_strided_slice %335 {offsets = [0, 64], sizes = [16, 8], strides = [1, 1]} : vector<16x96xf32> to vector<16x8xf32>
    %cst_93 = arith.constant dense<0.000000e+00> : vector<16x16xf32>
    %343 = tpu.matmul %340, %341, %cst_93 {dimension_numbers = #tpu.dot_dimension_numbers<[1], [1], [0], [0], [0, 0, 1, 0], [], []>} : vector<16x8xf32>, vector<16x8xf32>, vector<16x16xf32> -> vector<16x16xf32>
    %cst_94 = arith.constant 0.353553385 : f32
    %344 = vector.broadcast %cst_94 : f32 to vector<16x16xf32>
    %345 = arith.mulf %343, %344 : vector<16x16xf32>
    %346 = vector.broadcast %339 : vector<1x16xf32> to vector<16x16xf32>
    %347 = arith.addf %345, %346 : vector<16x16xf32>
    %cst_95 = arith.constant dense<0xFF800000> : vector<16xf32>
    %348 = vector.multi_reduction <maximumf>, %347, %cst_95 [1] : vector<16x16xf32> to vector<16xf32>
    %349 = vector.shape_cast %348 : vector<16xf32> to vector<16x1xf32>
    %350 = vector.broadcast %349 : vector<16x1xf32> to vector<16x16xf32>
    %351 = arith.subf %347, %350 : vector<16x16xf32>
    %352 = math.exp %351 : vector<16x16xf32>
    %cst_96 = arith.constant dense<0.000000e+00> : vector<16xf32>
    %353 = vector.multi_reduction <add>, %352, %cst_96 [1] : vector<16x16xf32> to vector<16xf32>
    %354 = vector.shape_cast %353 : vector<16xf32> to vector<16x1xf32>
    %355 = tpu.reciprocal %354 {approx = true} : vector<16x1xf32> -> vector<16x1xf32>
    %356 = vector.broadcast %355 : vector<16x1xf32> to vector<16x16xf32>
    %357 = arith.mulf %352, %356 : vector<16x16xf32>
    %cst_97 = arith.constant dense<0.000000e+00> : vector<16x8xf32>
    %358 = tpu.matmul %357, %342, %cst_97 {dimension_numbers = #tpu.dot_dimension_numbers<[1], [0], [0], [1], [0, 0, 1, 1], [], []>} : vector<16x16xf32>, vector<16x8xf32>, vector<16x8xf32> -> vector<16x8xf32>
    %359 = vector.extract_strided_slice %335 {offsets = [0, 8], sizes = [16, 8], strides = [1, 1]} : vector<16x96xf32> to vector<16x8xf32>
    %360 = vector.extract_strided_slice %335 {offsets = [0, 40], sizes = [16, 8], strides = [1, 1]} : vector<16x96xf32> to vector<16x8xf32>
    %361 = vector.extract_strided_slice %335 {offsets = [0, 72], sizes = [16, 8], strides = [1, 1]} : vector<16x96xf32> to vector<16x8xf32>
    %cst_98 = arith.constant dense<0.000000e+00> : vector<16x16xf32>
    %362 = tpu.matmul %359, %360, %cst_98 {dimension_numbers = #tpu.dot_dimension_numbers<[1], [1], [0], [0], [0, 0, 1, 0], [], []>} : vector<16x8xf32>, vector<16x8xf32>, vector<16x16xf32> -> vector<16x16xf32>
    %cst_99 = arith.constant 0.353553385 : f32
    %363 = vector.broadcast %cst_99 : f32 to vector<16x16xf32>
    %364 = arith.mulf %362, %363 : vector<16x16xf32>
    %365 = vector.broadcast %339 : vector<1x16xf32> to vector<16x16xf32>
    %366 = arith.addf %364, %365 : vector<16x16xf32>
    %cst_100 = arith.constant dense<0xFF800000> : vector<16xf32>
    %367 = vector.multi_reduction <maximumf>, %366, %cst_100 [1] : vector<16x16xf32> to vector<16xf32>
    %368 = vector.shape_cast %367 : vector<16xf32> to vector<16x1xf32>
    %369 = vector.broadcast %368 : vector<16x1xf32> to vector<16x16xf32>
    %370 = arith.subf %366, %369 : vector<16x16xf32>
    %371 = math.exp %370 : vector<16x16xf32>
    %cst_101 = arith.constant dense<0.000000e+00> : vector<16xf32>
    %372 = vector.multi_reduction <add>, %371, %cst_101 [1] : vector<16x16xf32> to vector<16xf32>
    %373 = vector.shape_cast %372 : vector<16xf32> to vector<16x1xf32>
    %374 = tpu.reciprocal %373 {approx = true} : vector<16x1xf32> -> vector<16x1xf32>
    %375 = vector.broadcast %374 : vector<16x1xf32> to vector<16x16xf32>
    %376 = arith.mulf %371, %375 : vector<16x16xf32>
    %cst_102 = arith.constant dense<0.000000e+00> : vector<16x8xf32>
    %377 = tpu.matmul %376, %361, %cst_102 {dimension_numbers = #tpu.dot_dimension_numbers<[1], [0], [0], [1], [0, 0, 1, 1], [], []>} : vector<16x16xf32>, vector<16x8xf32>, vector<16x8xf32> -> vector<16x8xf32>
    %378 = vector.extract_strided_slice %335 {offsets = [0, 16], sizes = [16, 8], strides = [1, 1]} : vector<16x96xf32> to vector<16x8xf32>
    %379 = vector.extract_strided_slice %335 {offsets = [0, 48], sizes = [16, 8], strides = [1, 1]} : vector<16x96xf32> to vector<16x8xf32>
    %380 = vector.extract_strided_slice %335 {offsets = [0, 80], sizes = [16, 8], strides = [1, 1]} : vector<16x96xf32> to vector<16x8xf32>
    %cst_103 = arith.constant dense<0.000000e+00> : vector<16x16xf32>
    %381 = tpu.matmul %378, %379, %cst_103 {dimension_numbers = #tpu.dot_dimension_numbers<[1], [1], [0], [0], [0, 0, 1, 0], [], []>} : vector<16x8xf32>, vector<16x8xf32>, vector<16x16xf32> -> vector<16x16xf32>
    %cst_104 = arith.constant 0.353553385 : f32
    %382 = vector.broadcast %cst_104 : f32 to vector<16x16xf32>
    %383 = arith.mulf %381, %382 : vector<16x16xf32>
    %384 = vector.broadcast %339 : vector<1x16xf32> to vector<16x16xf32>
    %385 = arith.addf %383, %384 : vector<16x16xf32>
    %cst_105 = arith.constant dense<0xFF800000> : vector<16xf32>
    %386 = vector.multi_reduction <maximumf>, %385, %cst_105 [1] : vector<16x16xf32> to vector<16xf32>
    %387 = vector.shape_cast %386 : vector<16xf32> to vector<16x1xf32>
    %388 = vector.broadcast %387 : vector<16x1xf32> to vector<16x16xf32>
    %389 = arith.subf %385, %388 : vector<16x16xf32>
    %390 = math.exp %389 : vector<16x16xf32>
    %cst_106 = arith.constant dense<0.000000e+00> : vector<16xf32>
    %391 = vector.multi_reduction <add>, %390, %cst_106 [1] : vector<16x16xf32> to vector<16xf32>
    %392 = vector.shape_cast %391 : vector<16xf32> to vector<16x1xf32>
    %393 = tpu.reciprocal %392 {approx = true} : vector<16x1xf32> -> vector<16x1xf32>
    %394 = vector.broadcast %393 : vector<16x1xf32> to vector<16x16xf32>
    %395 = arith.mulf %390, %394 : vector<16x16xf32>
    %cst_107 = arith.constant dense<0.000000e+00> : vector<16x8xf32>
    %396 = tpu.matmul %395, %380, %cst_107 {dimension_numbers = #tpu.dot_dimension_numbers<[1], [0], [0], [1], [0, 0, 1, 1], [], []>} : vector<16x16xf32>, vector<16x8xf32>, vector<16x8xf32> -> vector<16x8xf32>
    %397 = vector.extract_strided_slice %335 {offsets = [0, 24], sizes = [16, 8], strides = [1, 1]} : vector<16x96xf32> to vector<16x8xf32>
    %398 = vector.extract_strided_slice %335 {offsets = [0, 56], sizes = [16, 8], strides = [1, 1]} : vector<16x96xf32> to vector<16x8xf32>
    %399 = vector.extract_strided_slice %335 {offsets = [0, 88], sizes = [16, 8], strides = [1, 1]} : vector<16x96xf32> to vector<16x8xf32>
    %cst_108 = arith.constant dense<0.000000e+00> : vector<16x16xf32>
    %400 = tpu.matmul %397, %398, %cst_108 {dimension_numbers = #tpu.dot_dimension_numbers<[1], [1], [0], [0], [0, 0, 1, 0], [], []>} : vector<16x8xf32>, vector<16x8xf32>, vector<16x16xf32> -> vector<16x16xf32>
    %cst_109 = arith.constant 0.353553385 : f32
    %401 = vector.broadcast %cst_109 : f32 to vector<16x16xf32>
    %402 = arith.mulf %400, %401 : vector<16x16xf32>
    %403 = vector.broadcast %339 : vector<1x16xf32> to vector<16x16xf32>
    %404 = arith.addf %402, %403 : vector<16x16xf32>
    %cst_110 = arith.constant dense<0xFF800000> : vector<16xf32>
    %405 = vector.multi_reduction <maximumf>, %404, %cst_110 [1] : vector<16x16xf32> to vector<16xf32>
    %406 = vector.shape_cast %405 : vector<16xf32> to vector<16x1xf32>
    %407 = vector.broadcast %406 : vector<16x1xf32> to vector<16x16xf32>
    %408 = arith.subf %404, %407 : vector<16x16xf32>
    %409 = math.exp %408 : vector<16x16xf32>
    %cst_111 = arith.constant dense<0.000000e+00> : vector<16xf32>
    %410 = vector.multi_reduction <add>, %409, %cst_111 [1] : vector<16x16xf32> to vector<16xf32>
    %411 = vector.shape_cast %410 : vector<16xf32> to vector<16x1xf32>
    %412 = tpu.reciprocal %411 {approx = true} : vector<16x1xf32> -> vector<16x1xf32>
    %413 = vector.broadcast %412 : vector<16x1xf32> to vector<16x16xf32>
    %414 = arith.mulf %409, %413 : vector<16x16xf32>
    %cst_112 = arith.constant dense<0.000000e+00> : vector<16x8xf32>
    %415 = tpu.matmul %414, %399, %cst_112 {dimension_numbers = #tpu.dot_dimension_numbers<[1], [0], [0], [1], [0, 0, 1, 1], [], []>} : vector<16x16xf32>, vector<16x8xf32>, vector<16x8xf32> -> vector<16x8xf32>
    %416 = tpu.concatenate %358, %377, %396, %415 in 1 : vector<16x8xf32>, vector<16x8xf32>, vector<16x8xf32>, vector<16x8xf32> -> vector<16x32xf32>
    %417 = arith.addf %310, %416 : vector<16x32xf32>
    %cst_113 = arith.constant dense<0.000000e+00> : vector<16xf32>
    %418 = vector.multi_reduction <add>, %417, %cst_113 [1] : vector<16x32xf32> to vector<16xf32>
    %419 = vector.shape_cast %418 : vector<16xf32> to vector<16x1xf32>
    %cst_114 = arith.constant 3.200000e+01 : f32
    %420 = vector.broadcast %cst_114 : f32 to vector<16x1xf32>
    %421 = arith.divf %419, %420 : vector<16x1xf32>
    %422 = vector.broadcast %421 : vector<16x1xf32> to vector<16x32xf32>
    %423 = arith.subf %417, %422 : vector<16x32xf32>
    %424 = arith.mulf %423, %423 : vector<16x32xf32>
    %cst_115 = arith.constant dense<0.000000e+00> : vector<16xf32>
    %425 = vector.multi_reduction <add>, %424, %cst_115 [1] : vector<16x32xf32> to vector<16xf32>
    %426 = vector.shape_cast %425 : vector<16xf32> to vector<16x1xf32>
    %cst_116 = arith.constant 3.200000e+01 : f32
    %427 = vector.broadcast %cst_116 : f32 to vector<16x1xf32>
    %428 = arith.divf %426, %427 : vector<16x1xf32>
    %429 = vector.broadcast %421 : vector<16x1xf32> to vector<16x32xf32>
    %430 = arith.subf %417, %429 : vector<16x32xf32>
    %cst_117 = arith.constant 9.99999974E-6 : f32
    %431 = vector.broadcast %cst_117 : f32 to vector<16x1xf32>
    %432 = arith.addf %428, %431 : vector<16x1xf32>
    %433 = math.rsqrt %432 : vector<16x1xf32>
    %434 = vector.broadcast %433 : vector<16x1xf32> to vector<16x32xf32>
    %435 = arith.mulf %430, %434 : vector<16x32xf32>
    %436 = vector.broadcast %10 : vector<1x32xf32> to vector<16x32xf32>
    %437 = arith.mulf %435, %436 : vector<16x32xf32>
    %438 = vector.broadcast %11 : vector<1x32xf32> to vector<16x32xf32>
    %439 = arith.addf %437, %438 : vector<16x32xf32>
    %cst_118 = arith.constant dense<0.000000e+00> : vector<16x32xf32>
    %440 = tpu.matmul %439, %12, %cst_118 {dimension_numbers = #tpu.dot_dimension_numbers<[1], [0], [0], [1], [0, 0, 1, 1], [], []>} : vector<16x32xf32>, vector<32x32xf32>, vector<16x32xf32> -> vector<16x32xf32>
    %441 = vector.broadcast %13 : vector<1x32xf32> to vector<16x32xf32>
    %442 = arith.addf %440, %441 : vector<16x32xf32>
    %443 = arith.addf %417, %442 : vector<16x32xf32>
    %c0_119 = arith.constant 0 : index
    %c0_120 = arith.constant 0 : index
    %c0_121 = arith.constant 0 : index
    %444 = vector.load %arg20[%c0_119, %c0_120, %c0_121] : memref<1x16x32xf32, #tpu.memory_space<vmem>>, vector<1x16x32xf32>
    %445 = vector.shape_cast %444 : vector<1x16x32xf32> to vector<16x32xf32>
    %446 = vector.shape_cast %443 : vector<16x32xf32> to vector<1x16x32xf32>
    tpu.vector_store %arg20[%c0_119, %c0_120, %c0_121], %446 {strides = array<i32>} : memref<1x16x32xf32, #tpu.memory_space<vmem>>, vector<1x16x32xf32>,
    return
  }
  func.func @transform_0(%arg0: i32) -> (i32, i32, i32) {
    %c0_i32 = arith.constant 0 : i32
    %c0_i32_0 = arith.constant 0 : i32
    %c0_i32_1 = arith.constant 0 : i32
    return %arg0, %c0_i32, %c0_i32_0 : i32, i32, i32
  }
  func.func @transform_1(%arg0: i32) -> (i32, i32, i32) {
    %c0_i32 = arith.constant 0 : i32
    %c0_i32_0 = arith.constant 0 : i32
    %c0_i32_1 = arith.constant 0 : i32
    return %arg0, %c0_i32, %c0_i32_0 : i32, i32, i32
  }
  func.func @transform_2(%arg0: i32) -> (i32, i32) {
    %c0_i32 = arith.constant 0 : i32
    %c0_i32_0 = arith.constant 0 : i32
    %c0_i32_1 = arith.constant 0 : i32
    return %c0_i32, %c0_i32_0 : i32, i32
  }
  func.func @transform_3(%arg0: i32) -> (i32, i32) {
    %c0_i32 = arith.constant 0 : i32
    %c0_i32_0 = arith.constant 0 : i32
    %c0_i32_1 = arith.constant 0 : i32
    return %c0_i32, %c0_i32_0 : i32, i32
  }
  func.func @transform_4(%arg0: i32) -> (i32, i32) {
    %c0_i32 = arith.constant 0 : i32
    %c0_i32_0 = arith.constant 0 : i32
    %c0_i32_1 = arith.constant 0 : i32
    return %c0_i32, %c0_i32_0 : i32, i32
  }
  func.func @transform_5(%arg0: i32) -> (i32, i32) {
    %c0_i32 = arith.constant 0 : i32
    %c0_i32_0 = arith.constant 0 : i32
    %c0_i32_1 = arith.constant 0 : i32
    return %c0_i32, %c0_i32_0 : i32, i32
  }
  func.func @transform_6(%arg0: i32) -> (i32, i32) {
    %c0_i32 = arith.constant 0 : i32
    %c0_i32_0 = arith.constant 0 : i32
    %c0_i32_1 = arith.constant 0 : i32
    return %c0_i32, %c0_i32_0 : i32, i32
  }
  func.func @transform_7(%arg0: i32) -> (i32, i32) {
    %c0_i32 = arith.constant 0 : i32
    %c0_i32_0 = arith.constant 0 : i32
    %c0_i32_1 = arith.constant 0 : i32
    return %c0_i32, %c0_i32_0 : i32, i32
  }
  func.func @transform_8(%arg0: i32) -> (i32, i32) {
    %c0_i32 = arith.constant 0 : i32
    %c0_i32_0 = arith.constant 0 : i32
    %c0_i32_1 = arith.constant 0 : i32
    return %c0_i32, %c0_i32_0 : i32, i32
  }
  func.func @transform_9(%arg0: i32) -> (i32, i32) {
    %c0_i32 = arith.constant 0 : i32
    %c0_i32_0 = arith.constant 0 : i32
    %c0_i32_1 = arith.constant 0 : i32
    return %c0_i32, %c0_i32_0 : i32, i32
  }
  func.func @transform_10(%arg0: i32) -> (i32, i32) {
    %c0_i32 = arith.constant 0 : i32
    %c0_i32_0 = arith.constant 0 : i32
    %c0_i32_1 = arith.constant 0 : i32
    return %c0_i32, %c0_i32_0 : i32, i32
  }
  func.func @transform_11(%arg0: i32) -> (i32, i32) {
    %c0_i32 = arith.constant 0 : i32
    %c0_i32_0 = arith.constant 0 : i32
    %c0_i32_1 = arith.constant 0 : i32
    return %c0_i32, %c0_i32_0 : i32, i32
  }
  func.func @transform_12(%arg0: i32) -> (i32, i32) {
    %c0_i32 = arith.constant 0 : i32
    %c0_i32_0 = arith.constant 0 : i32
    %c0_i32_1 = arith.constant 0 : i32
    return %c0_i32, %c0_i32_0 : i32, i32
  }
  func.func @transform_13(%arg0: i32) -> (i32, i32) {
    %c0_i32 = arith.constant 0 : i32
    %c0_i32_0 = arith.constant 0 : i32
    %c0_i32_1 = arith.constant 0 : i32
    return %c0_i32, %c0_i32_0 : i32, i32
  }
  func.func @transform_14(%arg0: i32) -> (i32, i32) {
    %c0_i32 = arith.constant 0 : i32
    %c0_i32_0 = arith.constant 0 : i32
    %c0_i32_1 = arith.constant 0 : i32
    return %c0_i32, %c0_i32_0 : i32, i32
  }
  func.func @transform_15(%arg0: i32) -> (i32, i32) {
    %c0_i32 = arith.constant 0 : i32
    %c0_i32_0 = arith.constant 0 : i32
    %c0_i32_1 = arith.constant 0 : i32
    return %c0_i32, %c0_i32_0 : i32, i32
  }
  func.func @transform_16(%arg0: i32) -> (i32, i32) {
    %c0_i32 = arith.constant 0 : i32
    %c0_i32_0 = arith.constant 0 : i32
    %c0_i32_1 = arith.constant 0 : i32
    return %c0_i32, %c0_i32_0 : i32, i32
  }
  func.func @transform_17(%arg0: i32) -> (i32, i32) {
    %c0_i32 = arith.constant 0 : i32
    %c0_i32_0 = arith.constant 0 : i32
    %c0_i32_1 = arith.constant 0 : i32
    return %c0_i32, %c0_i32_0 : i32, i32
  }
  func.func @transform_18(%arg0: i32) -> (i32, i32) {
    %c0_i32 = arith.constant 0 : i32
    %c0_i32_0 = arith.constant 0 : i32
    %c0_i32_1 = arith.constant 0 : i32
    return %c0_i32, %c0_i32_0 : i32, i32
  }
  func.func @transform_19(%arg0: i32) -> (i32, i32, i32) {
    %c0_i32 = arith.constant 0 : i32
    %c0_i32_0 = arith.constant 0 : i32
    %c0_i32_1 = arith.constant 0 : i32
    return %arg0, %c0_i32, %c0_i32_0 : i32, i32, i32
  }
}

</mosaic_0001>

<bundles_post_ra>
// kernel: tpu_custom_call.1
= control target key start
LH: loop header
LB: loop body
LE: loop exit
PB: predicated region body
PF: predicated region fallthrough
CT: control target
= control target key end

     0   :  { %s3229_s0 = inlined_call_operand.vmem [shape: f32[2,16,64], index: 0, kind: input, shape index: {}]   ;;  %s3230_s1 = inlined_call_operand.vmem [shape: f32[2,1,16], index: 1, kind: input, shape index: {}]   ;;  %s3231_s2 = inlined_call_operand.vmem [shape: f32[16,32], index: 2, kind: input, shape index: {}]   ;;  %s3232_s3 = inlined_call_operand.vmem [shape: f32[64,32], index: 3, kind: input, shape index: {}]   ;;  %s3233_s4 = inlined_call_operand.vmem [shape: f32[1,32], index: 4, kind: input, shape index: {}]   ;;  %s3234_s5 = inlined_call_operand.vmem [shape: f32[4,32], index: 5, kind: input, shape index: {}]   ;;  %s3235_s6 = inlined_call_operand.vmem [shape: f32[4,32], index: 6, kind: input, shape index: {}]   ;;  %s3236_s7 = inlined_call_operand.vmem [shape: f32[28,32], index: 7, kind: input, shape index: {}]   ;;  %s3237_s8 = inlined_call_operand.vmem [shape: f32[4,32], index: 8, kind: input, shape index: {}]   ;;  %s3238_s9 = inlined_call_operand.vmem [shape: f32[128,32], index: 9, kind: input, shape index: {}]   ;;  %s3239_s10 = inlined_call_operand.vmem [shape: f32[4,32], index: 10, kind: input, shape index: {}]   ;;  %s3240_s11 = inlined_call_operand.vmem [shape: f32[1,32], index: 11, kind: input, shape index: {}]   ;;  %s3241_s12 = inlined_call_operand.vmem [shape: f32[1,32], index: 12, kind: input, shape index: {}]   ;;  %s3242_s13 = inlined_call_operand.vmem [shape: f32[32,96], index: 13, kind: input, shape index: {}]   ;;  %s3243_s14 = inlined_call_operand.vmem [shape: f32[1,96], index: 14, kind: input, shape index: {}]   ;;  %s3244_s15 = inlined_call_operand.vmem [shape: f32[1,32], index: 15, kind: input, shape index: {}]   ;;  %s3245_s16 = inlined_call_operand.vmem [shape: f32[1,32], index: 16, kind: input, shape index: {}]   ;;  %s3246_s17 = inlined_call_operand.vmem [shape: f32[32,32], index: 17, kind: input, shape index: {}]   ;;  %s3247_s18 = inlined_call_operand.vmem [shape: f32[1,32], index: 18, kind: input, shape index: {}]   ;;  %s3248_s19 = inlined_call_operand.hbm [shape: f32[2,16,32], index: 19, kind: output, shape index: {}]  }
   0x1   :  { %3261 = sst [smem:[#allocation13_spill]] %s3229_s0 }
   0x2   :  { %3262 = sst [smem:[#allocation14_spill]] %s3230_s1 }
   0x3   :  { %3263 = sst [smem:[#allocation15_spill]] %s3231_s2 }
   0x4   :  { %3264 = sst [smem:[#allocation16_spill]] %s3232_s3 }
   0x5   :  { %3265 = sst [smem:[#allocation17_spill]] %s3233_s4 }
   0x6   :  { %3266 = sst [smem:[#allocation18_spill]] %s3234_s5 }
   0x7   :  { %3267 = sst [smem:[#allocation19_spill]] %s3235_s6 }
   0x8   :  { %3268 = sst [smem:[#allocation20_spill]] %s3247_s18 }
   0x9   :  { %3269 = sst [smem:[#allocation21_spill]] %s3248_s19 }
   0xa   :  { %24 = vsyncpa [#allocation4], 0 }
   0xb   :  { %26 = vsyncpa [#allocation4 + $0x1], 0  ;;  %s2627_s0 = smov 0   ;;  %s2629_s30 = smov 0  }
   0xc   :  { %s2631_s20 = smov 0   ;;  %s2633_s21 = smov 0  }
   0xd LB: > { %3270 = sst [smem:[#allocation6_spill]] %s2496_s0  ;;  %s2648_s1 = sadd.s32 4294967295, %s2508_s21   ;;  %s2508_s21 = sphi %s2633_s21, %s3293_s21   ;;  %s2504_s20 = sphi %s2631_s20, %s3295_s20   ;;  %s2500_s30 = sphi %s2629_s30, %s3297_s30   ;;  %s2496_s0 = sphi %s2627_s0, %s3296_s0  }
   0xe   : > { %3271 = sst [smem:[#allocation7_spill]] %s2504_s20  ;;  %s2253_s22 = sadd.s32 4294967294, %s2508_s21  }
   0xf   : > { %3272 = sst [smem:[#allocation8_spill]] %s2508_s21  ;;  %s2652_s2 = sadd.s32 1, %s2508_s21  }
  0x10   : > { %3273 = sst [smem:[#allocation9_spill]] %s2652_s2  ;;  %s448_s23 = sadd.s32 1, %s2504_s20 }
  0x11   : > { %s445_s24 = ssub.s32 %s2508_s21, %s2652_s2  ;;  %p458_p0 = scmp.ne.s32.totalorder %s2504_s20, %s2500_s30 }
  0x12   : > { %p446_p1 = scmp.eq.s32.totalorder %s445_s24, 0  ;;  %p459_p2 = scmp.eq.s32.totalorder %s2648_s1, 1 }
  0x13   : > { %p464_p3 = scmp.ne.s32.totalorder %s2500_s30, %s2496_s0  ;;  %p465_p4 = scmp.eq.s32.totalorder %s2253_s22, 1 }
  0x14   : > { %s2663_s25 = scalar_select %p446_p1, %s2504_s20, %s448_s23  }
  0x15   : > { %p2665_p5 = por %p459_p2, %p458_p0  ;;  %p2669_p6 = por %p465_p4, %p464_p3 }
  0x16   : > { %3274 = sst [smem:[#allocation10_spill]] %s2663_s25  ;;  %p2256_p7 = scmp.ge.s32.totalorder %s2508_s21, 1 }
  0x17   : > { %s3275_s3 = scalar_select %p2665_p5, 1, 0 }
  0x18   : > { %s3277_s26 = scalar_select %p2669_p6, 1, 0 }
  0x19   : > { %3276 = sst [smem:[#allocation11_spill]] %s3275_s3  ;;  %p548_p8 = scmp.lt.s32.totalorder %s2508_s21, 3 }
  0x1a   : > { %3278 = sst [smem:[#allocation12_spill]] %s3277_s26 }
  0x1b   : > { %p549_p9 = pnand %p2256_p7, %p548_p8 }
  0x1c   : > { %s3279_s29 = sld [smem:[#allocation16_spill]] (!%p549_p9)  ;;  %p607_p10 = scmp.lt.s32.totalorder (!%p549_p9), %s2648_s1, 1 }
  0x1d   : > { %552 = sbr.rel (%p549_p9) target bundleno = 3608 (0xe18), region = 96  ;;  %s3280_s26 = sld [smem:[#allocation13_spill]] (!%p549_p9) }
  0x1e   : > { %s3281_s4 = sld [smem:[#allocation17_spill]] (!%p549_p9)  ;;  %s2512_s25 = smov (!%p549_p9), 88  }
  0x1f   : > { %s3283_s5 = sld [smem:[#allocation18_spill]] (!%p549_p9)  ;;  %s2513_s24 = smov (!%p549_p9), 96  }
  0x20   : > { %s3284_s6 = sld [smem:[#allocation19_spill]] (!%p549_p9)  ;;  %s2514_s2 = smov (!%p549_p9), 80  }
  0x21   : > { %s2516_s0 = smov (!%p549_p9), 120   ;;  %s2517_s27 = smov (!%p549_p9), 112  }
  0x22   : > { %v662_v0 = vld [vmem:[%s3279_s29 + $0x38] sm:$0xff]  ;;  %v661_v1 = vld [vmem:[%s3279_s29 + $0x30] sm:$0xff]  ;;  %v660_v2 = vld [vmem:[%s3279_s29 + $0x28] sm:$0xff]  ;;  %s2686_s20 = scalar_select %p607_p10, %s2648_s1, 1  ;;  %vm667_vm0 = vcmask 523264   ;;  %vm698_vm1 = vcmask 261120  }
  0x23   : > { %682 = vmatpush.msra.mxu0 %v662_v0  ;;  %v659_v3 = vld [vmem:[%s3279_s29 + $0x20] sm:$0xff]  ;;  %v658_v4 = vld [vmem:[%s3279_s29 + $0x18] sm:$0xff]  ;;  %v657_v5 = vld [vmem:[%s3279_s29 + $0x10] sm:$0xff]  ;;  %v2510_v21 = vmov 32.0   ;;  %v2511_v24 = vmov 0.0   ;;  %vm781_vm9 = vcmask 1046528  }
  0x24   : > { %s2303_s22 = sshll.u32 %s2686_s20, 4  ;;  %v656_v6 = vld [vmem:[%s3279_s29 + $0x8] sm:$0xff]  ;;  %v655_v7 = vld [vmem:[%s3279_s29] sm:$0xff]  ;;  %2388 = vrcp.f32 %v2510_v21  ;;  %699 = vst.msk [vmem:[#allocation2] sm:$0xff] %vm698_vm1, %v2511_v24  ;;  %v625_v42 = vld [vmem:[%s3238_s9 + $0x18] sm:$0xff]  ;;  %vm800_vm10 = vcmask 1045504  }
  0x25   : > { %683 = vmatpush.msra.mxu0 %v661_v1  ;;  %s611_s19 = scalar_lea.vmem %s3280_s26, %s2303_s22  ;;  %v2381_v10 = vld [vmem:[%s3281_s4] ss:$0 sm:$0xff]  ;;  %s3282_s22 = sld [smem:[#allocation15_spill]]  ;;  %700 = vst.msk [vmem:[#allocation2 + $0x8] sm:$0xff] %vm698_vm1, %v2511_v24  ;;  %v624_v43 = vld [vmem:[%s3238_s9 + $0x10] sm:$0xff]  ;;  %913 = vmatpush.msra.mxu1 %v625_v42  ;;  %v623_v44 = vld [vmem:[%s3238_s9 + $0x8] sm:$0xff] }
  0x26   : > { %v653_v8 = vld [vmem:[%s611_s19] sm:$0xff]  ;;  %v654_v9 = vld [vmem:[%s611_s19 + $0x8] sm:$0xff]  ;;  %702 = vst.msk [vmem:[#allocation2 + $0x18] sm:$0xff] %vm698_vm1, %v2511_v24  ;;  %vm817_vm11 = vcmask 1044480   ;;  %vm834_vm12 = vcmask 1043456   ;;  %vm853_vm13 = vcmask 1042432  }
  0x27   : > { %684 = vmatpush.msra.mxu0 %v660_v2  ;;  %701 = vst.msk [vmem:[#allocation2 + $0x10] sm:$0xff] %vm698_vm1, %v2511_v24  ;;  %914 = vmatpush.msra.mxu1 %v624_v43  ;;  %v622_v47 = vld [vmem:[%s3238_s9] sm:$0xff]  ;;  %vm872_vm14 = vcmask 1041408   ;;  %s2515_s26 = smov 72   ;;  %s2518_s28 = smov 104  }
  0x28   : > { %v2753_v53 = vld [vmem:[%s3283_s5] sm:$0xf]  ;;  %s3285_s19 = sld [smem:[#allocation14_spill]]  ;;  %s2520_s23 = smov 64  }
  0x29   : > { %685 = vmatpush.msra.mxu0 %v659_v3  ;;  %915 = vmatpush.msra.mxu1 %v623_v44  ;;  %v2758_v56 = vld [vmem:[%s3284_s6] sm:$0xf]  ;;  %v758_v59 = vperm.slane %v2753_v53, 0  ;;  %s3286_s18 = sld [smem:[#allocation20_spill]] }
  0x2a   : > { %v2389_v22 = vpop.eup %2388  ;;  %v761_v62 = vperm.slane %v2758_v56, 0  ;;  %v2765_v3 = vld [vmem:[%s3236_s7] sm:$0xff] }
  0x2b   : > { %686 = vmatpush.msra.mxu0 %v658_v4  ;;  %v703_v12 = vld [vmem:[%s3282_s22] sm:$0xff]  ;;  %v704_v17 = vld [vmem:[%s3282_s22 + $0x8] sm:$0xff]  ;;  %v714_v23 = vmul.f32 32.0, %v2389_v22  ;;  %vm718_vm2 = vweird.f32 %v2389_v22  ;;  %916 = vmatpush.msra.mxu1 %v622_v47  ;;  %v827_v24 = vperm.slane %v2765_v3, 4 }
  0x2d   : > { %687 = vmatpush.msra.mxu0 %v657_v5  ;;  %v715_v25 = vsub.f32 1.0, %v714_v23 }
  0x2e   : > { %s614_s3 = scalar_lea.vmem %s3285_s19, %s2686_s20  ;;  %s2519_s20 = smov 56  }
  0x2f   : > { %688 = vmatpush.msra.mxu0 %v656_v6  ;;  %v716_v26 = vmul.f32 %v2389_v22, %v715_v25  ;;  %v774_v6 = vperm.slane %v2765_v3, 1 }
  0x31   : > { %689 = vmatpush.msra.mxu0 %v655_v7  ;;  %v717_v27 = vadd.f32 %v2389_v22, %v716_v26 }
  0x32   : > { %2260 = vmatmul.msk.f32.vlgmr.msra.gmra.mxu0 %vm667_vm0, %v653_v8  ;;  %v2769_v8 = vld [vmem:[#allocation2] sm:$0xff] }
  0x33   : > { %v2728_v28 = vsel %vm718_vm2, %v2389_v22, %v717_v27 }
  0x3a   : > { %2261 = vmatmul.msk.f32.gmra.mxu0 %vm667_vm0, %v654_v9 }
  0xaf   : > { %v691_v11 = vpop.f32.mrf.mxu0 }
  0xb0   : > { %v692_v13 = vadd.f32 %v2381_v10, %v691_v11 }
  0xb2   : > { %v2713_v14 = vadd.f32 %v703_v12, %v692_v13  ;;  %v775_v12 = vmul.f32 %v774_v6, %v2769_v8 }
  0xb4   : > { %v707_v15 = vsel %vm698_vm1, %v2713_v14, 0.0  ;;  %v782_v21 = vrot.slane %v775_v12, 1 }
  0xb5   : > { %708 = vadd.xlane.f32.xlu0 %v707_v15 }
  0xb7   : > { %v694_v16 = vpop.f32.mrf.mxu0 }
  0xb8   : > { %v695_v18 = vadd.f32 %v2381_v10, %v694_v16  ;;  %v793_v10 = vperm.slane %v2765_v3, 2 }
  0xba   : > { %v2720_v19 = vadd.f32 %v704_v17, %v695_v18  ;;  %v794_v15 = vmul.f32 %v793_v10, %v2769_v8  ;;  %v770_v17 = vperm.slane %v2765_v3, 0  ;;  %v812_v18 = vperm.slane %v2765_v3, 3 }
  0xbc   : > { %v710_v20 = vsel %vm698_vm1, %v2720_v19, 0.0  ;;  %v771_v23 = vmul.f32 %v770_v17, %v2769_v8  ;;  %v801_v26 = vrot.slane %v794_v15, 2 }
  0xbd   : > { %711 = vadd.xlane.f32.xlu0 %v710_v20 }
 0x128   : > { %v709_v29 = vpop.xlane.xlu0 %708 }
 0x129   : > { %v720_v30 = vmul.f32 %v2728_v28, %v709_v29 }
 0x12b   : > { %v722_v31 = vsub.f32 %v2713_v14, %v720_v30 }
 0x12d   : > { %v724_v32 = vmul.f32 %v722_v31, %v722_v31 }
 0x12f   : > { %v726_v33 = vsel %vm698_vm1, %v724_v32, 0.0 }
 0x130   : > { %727 = vadd.xlane.f32.xlu1 %v726_v33  ;;  %v712_v34 = vpop.xlane.xlu0 %711  ;;  %v846_v33 = vperm.slane %v2765_v3, 5 }
 0x131   : > { %v721_v35 = vmul.f32 %v2728_v28, %v712_v34 }
 0x133   : > { %v723_v36 = vsub.f32 %v2720_v19, %v721_v35 }
 0x135   : > { %v725_v37 = vmul.f32 %v723_v36, %v723_v36 }
 0x137   : > { %v729_v38 = vsel %vm698_vm1, %v725_v37, 0.0 }
 0x138   : > { %730 = vadd.xlane.f32.xlu1 %v729_v38 }
 0x1a3   : > { %v728_v39 = vpop.xlane.xlu1 %727 }
 0x1a4   : > { %v732_v40 = vmul.f32 %v728_v39, %v2728_v28 }
 0x1a6   : > { %v734_v41 = vadd.f32 1e-05, %v732_v40 }
 0x1a8   : > { %2390 = vrsqrt.f32 %v734_v41  ;;  %vm742_vm4 = vweird.f32 %v734_v41 }
 0x1ab   : > { %v731_v45 = vpop.xlane.xlu1 %730 }
 0x1ac   : > { %v733_v46 = vmul.f32 %v731_v45, %v2728_v28  ;;  %v865_v45 = vperm.slane %v2765_v3, 6 }
 0x1ae   : > { %v2391_v48 = vpop.eup %2390  ;;  %v735_v49 = vadd.f32 1e-05, %v733_v46 }
 0x1af   : > { %v737_v50 = vmul.f32 %v2391_v48, %v734_v41  ;;  %vm743_vm3 = vweird.f32 %v2391_v48  ;;  %v2782_v41 = vld [vmem:[#allocation2 + $0x18] sm:$0xff] }
 0x1b0   : > { %2392 = vrsqrt.f32 %v735_v49  ;;  %vm744_vm5 = vmor %vm742_vm4, %vm743_vm3  ;;  %vm752_vm7 = vweird.f32 %v735_v49 }
 0x1b1   : > { %v738_v51 = vmul.f32 %v2391_v48, %v737_v50 }
 0x1b3   : > { %v739_v52 = vmul.f32 0.5, %v738_v51  ;;  %v830_v51 = vmul.f32 %v827_v24, %v2782_v41 }
 0x1b5   : > { %v740_v54 = vsub.f32 1.5, %v739_v52  ;;  %v849_v52 = vmul.f32 %v846_v33, %v2782_v41 }
 0x1b6   : > { %v2393_v55 = vpop.eup %2392 }
 0x1b7   : > { %v741_v57 = vmul.f32 %v2391_v48, %v740_v54  ;;  %v747_v58 = vmul.f32 %v2393_v55, %v735_v49  ;;  %vm753_vm6 = vweird.f32 %v2393_v55  ;;  %v857_v15 = vrot.slane %v849_v52, 5 }
 0x1b8   : > { %vm754_vm8 = vmor %vm752_vm7, %vm753_vm6 }
 0x1b9   : > { %v745_v60 = vsel %vm744_vm5, %v2391_v48, %v741_v57  ;;  %v748_v61 = vmul.f32 %v2393_v55, %v747_v58 }
 0x1ba   : > { %v756_v63 = vmul.f32 %v745_v60, %v722_v31 }
 0x1bb   : > { %v749_v0 = vmul.f32 0.5, %v748_v61 }
 0x1bc   : > { %v759_v1 = vmul.f32 %v758_v59, %v756_v63 }
 0x1bd   : > { %v750_v2 = vsub.f32 1.5, %v749_v0 }
 0x1be   : > { %v762_v4 = vadd.f32 %v761_v62, %v759_v1 }
 0x1bf   : > { %v751_v5 = vmul.f32 %v2393_v55, %v750_v2 }
 0x1c0   : > { %764 = vst.msk [vmem:[#allocation2 + $0x8] sm:$0xff] %vm698_vm1, %v762_v4 }
 0x1c1   : > { %v755_v7 = vsel %vm754_vm8, %v2393_v55, %v751_v5  ;;  %v838_v5 = vrot.slane %v830_v51, 4 }
 0x1c2   : > { %v757_v9 = vmul.f32 %v755_v7, %v723_v36 }
 0x1c4   : > { %v760_v11 = vmul.f32 %v758_v59, %v757_v9 }
 0x1c6   : > { %v763_v13 = vadd.f32 %v761_v62, %v760_v11  ;;  %v868_v11 = vmul.f32 %v865_v45, %v2782_v41 }
 0x1c7   : > { %v767_v16 = vld [vmem:[#allocation2 + $0x8] sm:$0xff] }
 0x1c8   : > { %765 = vst.msk [vmem:[#allocation2 + $0x10] sm:$0xff] %vm698_vm1, %v763_v13  ;;  %v776_v20 = vmul.f32 %v774_v6, %v767_v16  ;;  %v795_v22 = vmul.f32 %v793_v10, %v767_v16  ;;  %v813_v29 = vmul.f32 %v812_v18, %v767_v16  ;;  %v828_v32 = vmul.f32 %v827_v24, %v767_v16 }
 0x1c9   : > { %v847_v44 = vmul.f32 %v846_v33, %v767_v16  ;;  %v772_v49 = vmul.f32 %v770_v17, %v767_v16  ;;  %v866_v61 = vmul.f32 %v865_v45, %v767_v16 }
 0x1ca   : > { %v783_v25 = vrot.slane %v776_v20, 1  ;;  %v802_v27 = vrot.slane %v795_v22, 2  ;;  %v818_v37 = vrot.slane %v813_v29, 3  ;;  %v835_v43 = vrot.slane %v828_v32, 4 }
 0x1cb   : > { %v854_v60 = vrot.slane %v847_v44, 5  ;;  %v873_v13 = vrot.slane %v866_v61, 6  ;;  %v2810_v44 = vld [vmem:[%s3239_s10] sm:$0xf] }
 0x1cc   : > { %v784_v30 = vsel %vm781_vm9, %v782_v21, %v783_v25  ;;  %v803_v34 = vsel %vm800_vm10, %v801_v26, %v802_v27  ;;  %v876_v26 = vrot.slane %v868_v11, 6 }
 0x1cd   : > { %v790_v31 = vadd.f32 %v784_v30, %v771_v23 }
 0x1cf   : > { %v768_v35 = vld [vmem:[#allocation2 + $0x10] sm:$0xff]  ;;  %v809_v36 = vadd.f32 %v803_v34, %v790_v31 }
 0x1d0   : > { %v777_v38 = vmul.f32 %v774_v6, %v768_v35  ;;  %v796_v39 = vmul.f32 %v793_v10, %v768_v35  ;;  %v814_v40 = vmul.f32 %v812_v18, %v768_v35  ;;  %v829_v48 = vmul.f32 %v827_v24, %v768_v35  ;;  %v2792_v6 = vld [vmem:[%s3237_s8] sm:$0xf] }
 0x1d1   : > { %v824_v42 = vadd.f32 %v818_v37, %v809_v36  ;;  %v848_v57 = vmul.f32 %v846_v33, %v768_v35  ;;  %v773_v58 = vmul.f32 %v770_v17, %v768_v35  ;;  %v867_v0 = vmul.f32 %v865_v45, %v768_v35 }
 0x1d2   : > { %v785_v46 = vrot.slane %v777_v38, 1  ;;  %v804_v47 = vrot.slane %v796_v39, 2  ;;  %v819_v55 = vrot.slane %v814_v40, 3  ;;  %v836_v63 = vrot.slane %v829_v48, 4 }
 0x1d3   : > { %v843_v50 = vadd.f32 %v835_v43, %v824_v42  ;;  %v855_v9 = vrot.slane %v848_v57, 5  ;;  %v874_v17 = vrot.slane %v867_v0, 6  ;;  %v884_v22 = vperm.slane %v2792_v6, 0 }
 0x1d4   : > { %v786_v54 = vsel %vm781_vm9, %v783_v25, %v785_v46  ;;  %v805_v62 = vsel %vm800_vm10, %v802_v27, %v804_v47  ;;  %v792_v1 = vadd.f32 %v785_v46, %v773_v58  ;;  %v820_v7 = vsel %vm817_vm11, %v818_v37, %v819_v55 }
 0x1d5   : > { %v791_v59 = vadd.f32 %v786_v54, %v772_v49  ;;  %v862_v4 = vadd.f32 %v854_v60, %v843_v50  ;;  %v837_v16 = vsel %vm834_vm12, %v835_v43, %v836_v63  ;;  %v839_v23 = vsel %vm834_vm12, %v836_v63, %v838_v5 }
 0x1d6   : > { %v811_v10 = vadd.f32 %v804_v47, %v792_v1  ;;  %v856_v24 = vsel %vm853_vm13, %v854_v60, %v855_v9  ;;  %v858_v29 = vsel %vm853_vm13, %v855_v9, %v857_v15  ;;  %v875_v30 = vsel %vm872_vm14, %v873_v13, %v874_v17  ;;  %v628_v9 = vld [vmem:[%s3238_s9 + $0x30] sm:$0xff] }
 0x1d7   : > { %v810_v2 = vadd.f32 %v805_v62, %v791_v59  ;;  %v881_v21 = vadd.f32 %v873_v13, %v862_v4  ;;  %v877_v34 = vsel %vm872_vm14, %v874_v17, %v876_v26  ;;  %v888_v45 = vperm.slane %v2810_v44, 0  ;;  %v626_v13 = vld [vmem:[%s3238_s9 + $0x20] sm:$0xff] }
 0x1d8   : > { %v826_v18 = vadd.f32 %v819_v55, %v811_v10  ;;  %v627_v10 = vld [vmem:[%s3238_s9 + $0x28] sm:$0xff] }
 0x1d9   : > { %v825_v12 = vadd.f32 %v820_v7, %v810_v2  ;;  %v885_v33 = vadd.f32 %v884_v22, %v881_v21  ;;  %v629_v7 = vld [vmem:[%s3238_s9 + $0x38] sm:$0xff] }
 0x1da   : > { %v845_v25 = vadd.f32 %v839_v23, %v826_v18  ;;  %1121 = vmatpush.msra.mxu2 %v629_v7 }
 0x1db   : > { %v844_v20 = vadd.f32 %v837_v16, %v825_v12  ;;  %v892_v37 = vrot.slane %v885_v33, 5 }
 0x1dc   : > { %v864_v31 = vadd.f32 %v858_v29, %v845_v25  ;;  %1122 = vmatpush.msra.mxu2 %v628_v9  ;;  %v972_v25 = vperm.slane %v2753_v53, 1  ;;  %v975_v29 = vperm.slane %v2758_v56, 1 }
 0x1dd   : > { %v863_v27 = vadd.f32 %v856_v24, %v844_v20 }
 0x1de   : > { %v883_v36 = vadd.f32 %v877_v34, %v864_v31  ;;  %1123 = vmatpush.msra.mxu2 %v627_v10  ;;  %v2848_v34 = vld [vmem:[%s3236_s7 + $0x8] sm:$0xff] }
 0x1df   : > { %v882_v32 = vadd.f32 %v875_v30, %v863_v27 }
 0x1e0   : > { %v887_v40 = vadd.f32 %v884_v22, %v883_v36  ;;  %1124 = vmatpush.msra.mxu2 %v626_v13  ;;  %v1074_v13 = vperm.slane %v2848_v34, 5 }
 0x1e1   : > { %v886_v35 = vadd.f32 %v884_v22, %v882_v32 }
 0x1e2   : > { %v895_v42 = vrot.slane %v887_v40, 5  ;;  %v1006_v40 = vperm.slane %v2848_v34, 1 }
 0x1e3   : > { %v893_v38 = vrot.slane %v886_v35, 5 }
 0x1e5   : > { %v894_v39 = vsel %vm853_vm13, %v892_v37, %v893_v38  ;;  %v896_v43 = vsel %vm853_vm13, %v893_v38, %v895_v42  ;;  %v988_v37 = vperm.slane %v2848_v34, 0 }
 0x1e6   : > { %2262 = vmatmul.msk.f32.vlgmr.msra.gmra.mxu1 %vm698_vm1, %v894_v39 }
 0x1ee   : > { %2263 = vmatmul.msk.f32.gmra.mxu1 %vm698_vm1, %v896_v43  ;;  %v989_v43 = vmul.f32 %v988_v37, %v2769_v8 }
 0x263   : > { %v918_v46 = vpop.f32.mrf.mxu1 }
 0x264   : > { %v919_v47 = vadd.f32 %v918_v46, %v888_v45  ;;  %v1007_v46 = vmul.f32 %v1006_v40, %v2769_v8 }
 0x266   : > { %v924_v48 = vmax.f32 %v919_v47, 0.0 }
 0x268   : > { %v2814_v49 = vadd.f32 %v924_v48, %v2713_v14  ;;  %v984_v48 = vperm.slane %v2765_v3, 7  ;;  %v1056_v3 = vperm.slane %v2848_v34, 4 }
 0x26a   : > { %v928_v50 = vsel %vm698_vm1, %v2814_v49, 0.0 }
 0x26b   : > { %929 = vadd.xlane.f32.xlu2 %v928_v50  ;;  %v921_v51 = vpop.f32.mrf.mxu1  ;;  %v1024_v50 = vperm.slane %v2848_v34, 2 }
 0x26c   : > { %v922_v52 = vadd.f32 %v921_v51, %v888_v45 }
 0x26e   : > { %v925_v54 = vmax.f32 %v922_v52, 0.0  ;;  %v995_v52 = vrot.slane %v989_v43, 1  ;;  %v1077_v43 = vmul.f32 %v1074_v13, %v2782_v41 }
 0x270   : > { %v2819_v55 = vadd.f32 %v925_v54, %v2720_v19 }
 0x272   : > { %v931_v57 = vsel %vm698_vm1, %v2819_v55, 0.0 }
 0x273   : > { %932 = vadd.xlane.f32.xlu2 %v931_v57  ;;  %v985_v57 = vmul.f32 %v984_v48, %v2769_v8 }
 0x2de   : > { %v930_v58 = vpop.xlane.xlu2 %929 }
 0x2df   : > { %v934_v59 = vmul.f32 %v930_v58, %v2728_v28  ;;  %v1038_v58 = vperm.slane %v2848_v34, 3 }
 0x2e1   : > { %v936_v14 = vsub.f32 %v2814_v49, %v934_v59 }
 0x2e3   : > { %v938_v60 = vmul.f32 %v936_v14, %v936_v14 }
 0x2e5   : > { %v940_v61 = vsel %vm698_vm1, %v938_v60, 0.0 }
 0x2e6   : > { %941 = vadd.xlane.f32.xlu0 %v940_v61  ;;  %v933_v62 = vpop.xlane.xlu2 %932 }
 0x2e7   : > { %v935_v63 = vmul.f32 %v933_v62, %v2728_v28 }
 0x2e9   : > { %v937_v0 = vsub.f32 %v2819_v55, %v935_v63 }
 0x2eb   : > { %v939_v19 = vmul.f32 %v937_v0, %v937_v0 }
 0x2ed   : > { %v943_v1 = vsel %vm698_vm1, %v939_v19, 0.0 }
 0x2ee   : > { %944 = vadd.xlane.f32.xlu1 %v943_v1 }
 0x359   : > { %v942_v2 = vpop.xlane.xlu0 %941 }
 0x35a   : > { %v946_v4 = vmul.f32 %v942_v2, %v2728_v28 }
 0x35c   : > { %v948_v5 = vadd.f32 1e-05, %v946_v4 }
 0x35e   : > { %2394 = vrsqrt.f32 %v948_v5  ;;  %vm956_vm0 = vweird.f32 %v948_v5 }
 0x361   : > { %v945_v11 = vpop.xlane.xlu1 %944 }
 0x362   : > { %v947_v12 = vmul.f32 %v945_v11, %v2728_v28 }
 0x364   : > { %v2395_v15 = vpop.eup %2394  ;;  %v949_v16 = vadd.f32 1e-05, %v947_v12 }
 0x365   : > { %v951_v17 = vmul.f32 %v2395_v15, %v948_v5  ;;  %vm957_vm15 = vweird.f32 %v2395_v15 }
 0x366   : > { %2396 = vrsqrt.f32 %v949_v16  ;;  %vm958_vm2 = vmor %vm956_vm0, %vm957_vm15  ;;  %vm966_vm4 = vweird.f32 %v949_v16 }
 0x367   : > { %v952_v18 = vmul.f32 %v2395_v15, %v951_v17 }
 0x369   : > { %v953_v20 = vmul.f32 0.5, %v952_v18 }
 0x36b   : > { %v954_v21 = vsub.f32 1.5, %v953_v20 }
 0x36c   : > { %v2397_v22 = vpop.eup %2396 }
 0x36d   : > { %v955_v23 = vmul.f32 %v2395_v15, %v954_v21  ;;  %v961_v24 = vmul.f32 %v2397_v22, %v949_v16  ;;  %vm967_vm3 = vweird.f32 %v2397_v22  ;;  %v1041_v21 = vmul.f32 %v1038_v58, %v2782_v41 }
 0x36e   : > { %vm968_vm5 = vmor %vm966_vm4, %vm967_vm3 }
 0x36f   : > { %v959_v26 = vsel %vm958_vm2, %v2395_v15, %v955_v23  ;;  %v962_v27 = vmul.f32 %v2397_v22, %v961_v24 }
 0x370   : > { %v970_v30 = vmul.f32 %v959_v26, %v936_v14  ;;  %v1013_v14 = vrot.slane %v1007_v46, 2 }
 0x371   : > { %v963_v31 = vmul.f32 0.5, %v962_v27 }
 0x372   : > { %v973_v32 = vmul.f32 %v972_v25, %v970_v30  ;;  %v1059_v30 = vmul.f32 %v1056_v3, %v2782_v41 }
 0x373   : > { %v964_v33 = vsub.f32 1.5, %v963_v31 }
 0x374   : > { %v976_v35 = vadd.f32 %v975_v29, %v973_v32 }
 0x375   : > { %v965_v36 = vmul.f32 %v2397_v22, %v964_v33 }
 0x376   : > { %978 = vst.msk [vmem:[#allocation2 + $0x8] sm:$0xff] %vm698_vm1, %v976_v35 }
 0x377   : > { %v969_v38 = vsel %vm968_vm5, %v2397_v22, %v965_v36 }
 0x378   : > { %v971_v39 = vmul.f32 %v969_v38, %v937_v0  ;;  %v1048_v38 = vrot.slane %v1041_v21, 4 }
 0x37a   : > { %v974_v42 = vmul.f32 %v972_v25, %v971_v39 }
 0x37c   : > { %v977_v45 = vadd.f32 %v975_v29, %v974_v42 }
 0x37d   : > { %v981_v47 = vld [vmem:[#allocation2 + $0x8] sm:$0xff] }
 0x37e   : > { %979 = vst.msk [vmem:[#allocation2 + $0x10] sm:$0xff] %vm698_vm1, %v977_v45  ;;  %v990_v51 = vmul.f32 %v988_v37, %v981_v47  ;;  %v1008_v54 = vmul.f32 %v1006_v40, %v981_v47  ;;  %v1025_v61 = vmul.f32 %v1024_v50, %v981_v47  ;;  %v1039_v0 = vmul.f32 %v1038_v58, %v981_v47 }
 0x37f   : > { %v1057_v12 = vmul.f32 %v1056_v3, %v981_v47  ;;  %v986_v18 = vmul.f32 %v984_v48, %v981_v47  ;;  %v1075_v29 = vmul.f32 %v1074_v13, %v981_v47 }
 0x380   : > { %v996_v59 = vrot.slane %v990_v51, 1  ;;  %v1014_v60 = vrot.slane %v1008_v54, 2  ;;  %v1029_v4 = vrot.slane %v1025_v61, 3  ;;  %v1045_v11 = vrot.slane %v1039_v0, 4 }
 0x381   : > { %v1063_v27 = vrot.slane %v1057_v12, 5  ;;  %v1081_v46 = vrot.slane %v1075_v29, 6 }
 0x382   : > { %v997_v62 = vsel %vm781_vm9, %v995_v52, %v996_v59  ;;  %v1015_v19 = vsel %vm800_vm10, %v1013_v14, %v1014_v60 }
 0x383   : > { %v1003_v63 = vadd.f32 %v997_v62, %v985_v57  ;;  %v1092_v57 = vperm.slane %v2792_v6, 1 }
 0x385   : > { %v982_v1 = vld [vmem:[#allocation2 + $0x10] sm:$0xff]  ;;  %v1021_v2 = vadd.f32 %v1015_v19, %v1003_v63 }
 0x386   : > { %v991_v5 = vmul.f32 %v988_v37, %v982_v1  ;;  %v1009_v7 = vmul.f32 %v1006_v40, %v982_v1  ;;  %v1026_v9 = vmul.f32 %v1024_v50, %v982_v1  ;;  %v1040_v17 = vmul.f32 %v1038_v58, %v982_v1 }
 0x387   : > { %v1035_v10 = vadd.f32 %v1029_v4, %v1021_v2  ;;  %v1058_v24 = vmul.f32 %v1056_v3, %v982_v1  ;;  %v987_v25 = vmul.f32 %v984_v48, %v982_v1  ;;  %v1076_v33 = vmul.f32 %v1074_v13, %v982_v1 }
 0x388   : > { %v998_v15 = vrot.slane %v991_v5, 1  ;;  %v1016_v16 = vrot.slane %v1009_v7, 2  ;;  %v1030_v23 = vrot.slane %v1026_v9, 3  ;;  %v1046_v32 = vrot.slane %v1040_v17, 4 }
 0x389   : > { %v1053_v20 = vadd.f32 %v1045_v11, %v1035_v10  ;;  %v1064_v40 = vrot.slane %v1058_v24, 5  ;;  %v1066_v48 = vrot.slane %v1059_v30, 5  ;;  %v1082_v50 = vrot.slane %v1076_v33, 6 }
 0x38a   : > { %v999_v22 = vsel %vm781_vm9, %v996_v59, %v998_v15  ;;  %v1017_v31 = vsel %vm800_vm10, %v1014_v60, %v1016_v16  ;;  %v1005_v35 = vadd.f32 %v998_v15, %v987_v25  ;;  %v1031_v39 = vsel %vm817_vm11, %v1029_v4, %v1030_v23 }
 0x38b   : > { %v1004_v26 = vadd.f32 %v999_v22, %v986_v18  ;;  %v1071_v37 = vadd.f32 %v1063_v27, %v1053_v20  ;;  %v1047_v47 = vsel %vm834_vm12, %v1045_v11, %v1046_v32  ;;  %v1049_v58 = vsel %vm834_vm12, %v1046_v32, %v1048_v38 }
 0x38c   : > { %v1023_v42 = vadd.f32 %v1016_v16, %v1005_v35  ;;  %v1065_v59 = vsel %vm853_vm13, %v1063_v27, %v1064_v40  ;;  %v1084_v60 = vrot.slane %v1077_v43, 6  ;;  %v1067_v62 = vsel %vm853_vm13, %v1064_v40, %v1066_v48  ;;  %v632_v40 = vld [vmem:[%s3238_s9 + $0x50] sm:$0xff] }
 0x38d   : > { %v1022_v36 = vadd.f32 %v1017_v31, %v1004_v26  ;;  %v1089_v54 = vadd.f32 %v1081_v46, %v1071_v37  ;;  %v1083_v63 = vsel %vm872_vm14, %v1081_v46, %v1082_v50  ;;  %v1096_v13 = vperm.slane %v2810_v44, 1  ;;  %v630_v46 = vld [vmem:[%s3238_s9 + $0x40] sm:$0xff] }
 0x38e   : > { %v1037_v51 = vadd.f32 %v1030_v23, %v1023_v42  ;;  %v1085_v1 = vsel %vm872_vm14, %v1082_v50, %v1084_v60  ;;  %v631_v42 = vld [vmem:[%s3238_s9 + $0x48] sm:$0xff] }
 0x38f   : > { %v1036_v45 = vadd.f32 %v1031_v39, %v1022_v36  ;;  %v1093_v19 = vadd.f32 %v1092_v57, %v1089_v54  ;;  %v633_v39 = vld [vmem:[%s3238_s9 + $0x58] sm:$0xff] }
 0x390   : > { %v1055_v14 = vadd.f32 %v1049_v58, %v1037_v51  ;;  %1329 = vmatpush.msra.mxu3 %v633_v39 }
 0x391   : > { %v1054_v52 = vadd.f32 %v1047_v47, %v1036_v45  ;;  %v1100_v5 = vrot.slane %v1093_v19, 5 }
 0x392   : > { %v1073_v0 = vadd.f32 %v1067_v62, %v1055_v14  ;;  %1330 = vmatpush.msra.mxu3 %v632_v40  ;;  %v1180_v14 = vperm.slane %v2753_v53, 2  ;;  %v1183_v62 = vperm.slane %v2758_v56, 2 }
 0x393   : > { %v1072_v61 = vadd.f32 %v1065_v59, %v1054_v52 }
 0x394   : > { %v1091_v4 = vadd.f32 %v1085_v1, %v1073_v0  ;;  %1331 = vmatpush.msra.mxu3 %v631_v42 }
 0x395   : > { %v1090_v3 = vadd.f32 %v1083_v63, %v1072_v61 }
 0x396   : > { %v1095_v10 = vadd.f32 %v1092_v57, %v1091_v4  ;;  %1332 = vmatpush.msra.mxu3 %v630_v46  ;;  %v2917_v4 = vld [vmem:[%s3236_s7 + $0x10] sm:$0xff] }
 0x397   : > { %v1094_v2 = vadd.f32 %v1092_v57, %v1090_v3  ;;  %v1282_v46 = vperm.slane %v2917_v4, 4 }
 0x398   : > { %v1103_v11 = vrot.slane %v1095_v10, 5  ;;  %v1214_v10 = vperm.slane %v2917_v4, 0 }
 0x399   : > { %v1101_v7 = vrot.slane %v1094_v2, 5 }
 0x39b   : > { %v1102_v9 = vsel %vm853_vm13, %v1100_v5, %v1101_v7  ;;  %v1104_v12 = vsel %vm853_vm13, %v1101_v7, %v1103_v11  ;;  %v1196_v5 = vperm.slane %v2848_v34, 7 }
 0x39c   : > { %2264 = vmatmul.msk.f32.vlgmr.msra.gmra.mxu2 %vm698_vm1, %v1102_v9 }
 0x3a4   : > { %2265 = vmatmul.msk.f32.gmra.mxu2 %vm698_vm1, %v1104_v12  ;;  %v1197_v12 = vmul.f32 %v1196_v5, %v2769_v8 }
 0x41f   : > { %v1126_v15 = vpop.f32.mrf.mxu2 }
 0x420   : > { %v1127_v16 = vadd.f32 %v1126_v15, %v1096_v13  ;;  %v1215_v15 = vmul.f32 %v1214_v10, %v2769_v8 }
 0x422   : > { %v1132_v17 = vmax.f32 %v1127_v16, 0.0 }
 0x424   : > { %v2883_v18 = vadd.f32 %v1132_v17, %v2814_v49  ;;  %v1192_v17 = vperm.slane %v2848_v34, 6  ;;  %v1264_v34 = vperm.slane %v2917_v4, 3 }
 0x426   : > { %v1136_v20 = vsel %vm698_vm1, %v2883_v18, 0.0 }
 0x427   : > { %1137 = vadd.xlane.f32.xlu2 %v1136_v20  ;;  %v1129_v21 = vpop.f32.mrf.mxu2  ;;  %v1232_v20 = vperm.slane %v2917_v4, 1 }
 0x428   : > { %v1130_v22 = vadd.f32 %v1129_v21, %v1096_v13 }
 0x42a   : > { %v1133_v23 = vmax.f32 %v1130_v22, 0.0  ;;  %v1203_v22 = vrot.slane %v1197_v12, 1  ;;  %v1285_v12 = vmul.f32 %v1282_v46, %v2782_v41 }
 0x42c   : > { %v2888_v24 = vadd.f32 %v1133_v23, %v2819_v55 }
 0x42e   : > { %v1139_v25 = vsel %vm698_vm1, %v2888_v24, 0.0 }
 0x42f   : > { %1140 = vadd.xlane.f32.xlu0 %v1139_v25  ;;  %v1193_v25 = vmul.f32 %v1192_v17, %v2769_v8 }
 0x49a   : > { %v1138_v26 = vpop.xlane.xlu2 %1137 }
 0x49b   : > { %v1142_v27 = vmul.f32 %v1138_v26, %v2728_v28  ;;  %v1246_v26 = vperm.slane %v2917_v4, 2 }
 0x49d   : > { %v1144_v49 = vsub.f32 %v2883_v18, %v1142_v27 }
 0x49f   : > { %v1146_v29 = vmul.f32 %v1144_v49, %v1144_v49 }
 0x4a1   : > { %v1148_v30 = vsel %vm698_vm1, %v1146_v29, 0.0 }
 0x4a2   : > { %1149 = vadd.xlane.f32.xlu1 %v1148_v30  ;;  %v1141_v31 = vpop.xlane.xlu0 %1140 }
 0x4a3   : > { %v1143_v32 = vmul.f32 %v1141_v31, %v2728_v28 }
 0x4a5   : > { %v1145_v33 = vsub.f32 %v2888_v24, %v1143_v32 }
 0x4a7   : > { %v1147_v55 = vmul.f32 %v1145_v33, %v1145_v33 }
 0x4a9   : > { %v1151_v35 = vsel %vm698_vm1, %v1147_v55, 0.0 }
 0x4aa   : > { %1152 = vadd.xlane.f32.xlu2 %v1151_v35 }
 0x515   : > { %v1150_v36 = vpop.xlane.xlu1 %1149 }
 0x516   : > { %v1154_v37 = vmul.f32 %v1150_v36, %v2728_v28 }
 0x518   : > { %v1156_v38 = vadd.f32 1e-05, %v1154_v37 }
 0x51a   : > { %2398 = vrsqrt.f32 %v1156_v38  ;;  %vm1164_vm7 = vweird.f32 %v1156_v38 }
 0x51d   : > { %v1153_v43 = vpop.xlane.xlu2 %1152 }
 0x51e   : > { %v1155_v45 = vmul.f32 %v1153_v43, %v2728_v28 }
 0x520   : > { %v2399_v48 = vpop.eup %2398  ;;  %v1157_v47 = vadd.f32 1e-05, %v1155_v45 }
 0x521   : > { %v1159_v50 = vmul.f32 %v2399_v48, %v1156_v38  ;;  %vm1165_vm6 = vweird.f32 %v2399_v48 }
 0x522   : > { %2400 = vrsqrt.f32 %v1157_v47  ;;  %vm1166_vm8 = vmor %vm1164_vm7, %vm1165_vm6  ;;  %vm1174_vm0 = vweird.f32 %v1157_v47 }
 0x523   : > { %v1160_v51 = vmul.f32 %v2399_v48, %v1159_v50 }
 0x525   : > { %v1161_v52 = vmul.f32 0.5, %v1160_v51 }
 0x527   : > { %v1162_v54 = vsub.f32 1.5, %v1161_v52 }
 0x528   : > { %v2401_v57 = vpop.eup %2400 }
 0x529   : > { %v1163_v58 = vmul.f32 %v2399_v48, %v1162_v54  ;;  %v1169_v59 = vmul.f32 %v2401_v57, %v1157_v47  ;;  %vm1175_vm15 = vweird.f32 %v2401_v57  ;;  %v1249_v54 = vmul.f32 %v1246_v26, %v2782_v41 }
 0x52a   : > { %vm1176_vm2 = vmor %vm1174_vm0, %vm1175_vm15  ;;  %vm1646_vm15 = vcmask 64512   ;;  %vm1685_vm0 = vcmask 130048  }
 0x52b   : > { %v1167_v60 = vsel %vm1166_vm8, %v2399_v48, %v1163_v58  ;;  %v1170_v61 = vmul.f32 %v2401_v57, %v1169_v59 }
 0x52c   : > { %v1178_v63 = vmul.f32 %v1167_v60, %v1144_v49  ;;  %v1221_v49 = vrot.slane %v1215_v15, 2 }
 0x52d   : > { %v1171_v0 = vmul.f32 0.5, %v1170_v61 }
 0x52e   : > { %v1181_v3 = vmul.f32 %v1180_v14, %v1178_v63  ;;  %v1267_v63 = vmul.f32 %v1264_v34, %v2782_v41 }
 0x52f   : > { %v1172_v19 = vsub.f32 1.5, %v1171_v0 }
 0x530   : > { %v1184_v1 = vadd.f32 %v1183_v62, %v1181_v3 }
 0x531   : > { %v1173_v2 = vmul.f32 %v2401_v57, %v1172_v19 }
 0x532   : > { %1186 = vst.msk [vmem:[#allocation2 + $0x8] sm:$0xff] %vm698_vm1, %v1184_v1 }
 0x533   : > { %v1177_v7 = vsel %vm1176_vm2, %v2401_v57, %v1173_v2  ;;  %vm2071_vm2 = vcmask 195584  }
 0x534   : > { %v1179_v9 = vmul.f32 %v1177_v7, %v1145_v33  ;;  %v1256_v7 = vrot.slane %v1249_v54, 4 }
 0x536   : > { %v1182_v11 = vmul.f32 %v1180_v14, %v1179_v9 }
 0x538   : > { %v1185_v13 = vadd.f32 %v1183_v62, %v1182_v11 }
 0x539   : > { %v1189_v16 = vld [vmem:[#allocation2 + $0x8] sm:$0xff] }
 0x53a   : > { %1187 = vst.msk [vmem:[#allocation2 + $0x10] sm:$0xff] %vm698_vm1, %v1185_v13  ;;  %v1198_v21 = vmul.f32 %v1196_v5, %v1189_v16  ;;  %v1216_v23 = vmul.f32 %v1214_v10, %v1189_v16  ;;  %v1233_v30 = vmul.f32 %v1232_v20, %v1189_v16  ;;  %v1247_v33 = vmul.f32 %v1246_v26, %v1189_v16 }
 0x53b   : > { %v1265_v45 = vmul.f32 %v1264_v34, %v1189_v16  ;;  %v1194_v51 = vmul.f32 %v1192_v17, %v1189_v16  ;;  %v1283_v62 = vmul.f32 %v1282_v46, %v1189_v16 }
 0x53c   : > { %v1204_v27 = vrot.slane %v1198_v21, 1  ;;  %v1222_v29 = vrot.slane %v1216_v23, 2  ;;  %v1237_v37 = vrot.slane %v1233_v30, 3  ;;  %v1253_v43 = vrot.slane %v1247_v33, 4 }
 0x53d   : > { %v1271_v61 = vrot.slane %v1265_v45, 5  ;;  %v1289_v15 = vrot.slane %v1283_v62, 6 }
 0x53e   : > { %v1205_v31 = vsel %vm781_vm9, %v1203_v22, %v1204_v27  ;;  %v1223_v55 = vsel %vm800_vm10, %v1221_v49, %v1222_v29 }
 0x53f   : > { %v1211_v32 = vadd.f32 %v1205_v31, %v1193_v25  ;;  %v1300_v25 = vperm.slane %v2792_v6, 2 }
 0x541   : > { %v1190_v35 = vld [vmem:[#allocation2 + $0x10] sm:$0xff]  ;;  %v1229_v36 = vadd.f32 %v1223_v55, %v1211_v32 }
 0x542   : > { %v1199_v38 = vmul.f32 %v1196_v5, %v1190_v35  ;;  %v1217_v39 = vmul.f32 %v1214_v10, %v1190_v35  ;;  %v1234_v40 = vmul.f32 %v1232_v20, %v1190_v35  ;;  %v1248_v50 = vmul.f32 %v1246_v26, %v1190_v35 }
 0x543   : > { %v1243_v42 = vadd.f32 %v1237_v37, %v1229_v36  ;;  %v1266_v59 = vmul.f32 %v1264_v34, %v1190_v35  ;;  %v1195_v14 = vmul.f32 %v1192_v17, %v1190_v35  ;;  %v1284_v19 = vmul.f32 %v1282_v46, %v1190_v35 }
 0x544   : > { %v1206_v48 = vrot.slane %v1199_v38, 1  ;;  %v1224_v47 = vrot.slane %v1217_v39, 2  ;;  %v1238_v58 = vrot.slane %v1234_v40, 3  ;;  %v1254_v3 = vrot.slane %v1248_v50, 4 }
 0x545   : > { %v1261_v52 = vadd.f32 %v1253_v43, %v1243_v42  ;;  %v1272_v10 = vrot.slane %v1266_v59, 5  ;;  %v1274_v17 = vrot.slane %v1267_v63, 5  ;;  %v1290_v20 = vrot.slane %v1284_v19, 6 }
 0x546   : > { %v1207_v57 = vsel %vm781_vm9, %v1204_v27, %v1206_v48  ;;  %v1225_v0 = vsel %vm800_vm10, %v1222_v29, %v1224_v47  ;;  %v1213_v1 = vadd.f32 %v1206_v48, %v1195_v14  ;;  %v1239_v9 = vsel %vm817_vm11, %v1237_v37, %v1238_v58 }
 0x547   : > { %v1212_v60 = vadd.f32 %v1207_v57, %v1194_v51  ;;  %v1279_v5 = vadd.f32 %v1271_v61, %v1261_v52  ;;  %v1255_v16 = vsel %vm834_vm12, %v1253_v43, %v1254_v3  ;;  %v1257_v26 = vsel %vm834_vm12, %v1254_v3, %v1256_v7 }
 0x548   : > { %v1231_v11 = vadd.f32 %v1224_v47, %v1213_v1  ;;  %v1273_v27 = vsel %vm853_vm13, %v1271_v61, %v1272_v10  ;;  %v1292_v29 = vrot.slane %v1285_v12, 6  ;;  %v1275_v31 = vsel %vm853_vm13, %v1272_v10, %v1274_v17  ;;  %v636_v10 = vld [vmem:[%s3238_s9 + $0x70] sm:$0xff] }
 0x549   : > { %v1230_v2 = vadd.f32 %v1225_v0, %v1212_v60  ;;  %v1297_v23 = vadd.f32 %v1289_v15, %v1279_v5  ;;  %v1291_v32 = vsel %vm872_vm14, %v1289_v15, %v1290_v20  ;;  %v1304_v46 = vperm.slane %v2810_v44, 2  ;;  %v634_v15 = vld [vmem:[%s3238_s9 + $0x60] sm:$0xff] }
 0x54a   : > { %v1245_v21 = vadd.f32 %v1238_v58, %v1231_v11  ;;  %v1293_v35 = vsel %vm872_vm14, %v1290_v20, %v1292_v29  ;;  %v635_v11 = vld [vmem:[%s3238_s9 + $0x68] sm:$0xff] }
 0x54b   : > { %v1244_v13 = vadd.f32 %v1239_v9, %v1230_v2  ;;  %v1301_v55 = vadd.f32 %v1300_v25, %v1297_v23  ;;  %v637_v9 = vld [vmem:[%s3238_s9 + $0x78] sm:$0xff] }
 0x54c   : > { %v1263_v49 = vadd.f32 %v1257_v26, %v1245_v21  ;;  %1537 = vmatpush.msrb.mxu1 %v637_v9 }
 0x54d   : > { %v1262_v22 = vadd.f32 %v1255_v16, %v1244_v13  ;;  %v1308_v38 = vrot.slane %v1301_v55, 5 }
 0x54e   : > { %v1281_v33 = vadd.f32 %v1275_v31, %v1263_v49  ;;  %1538 = vmatpush.msrb.mxu1 %v636_v10  ;;  %v1388_v49 = vperm.slane %v2753_v53, 3  ;;  %v1391_v31 = vperm.slane %v2758_v56, 3  ;;  %v620_v56 = vld [vmem:[%s3236_s7 + $0x18] sm:$0xf] }
 0x54f   : > { %v1280_v30 = vadd.f32 %v1273_v27, %v1262_v22 }
 0x550   : > { %v1299_v37 = vadd.f32 %v1293_v35, %v1281_v33  ;;  %1539 = vmatpush.msrb.mxu1 %v635_v11  ;;  %v1490_v11 = vperm.slane %v620_v56, 3 }
 0x551   : > { %v1298_v34 = vadd.f32 %v1291_v32, %v1280_v30 }
 0x552   : > { %v1303_v42 = vadd.f32 %v1300_v25, %v1299_v37  ;;  %1540 = vmatpush.msrb.mxu1 %v634_v15  ;;  %v1404_v37 = vperm.slane %v2917_v4, 6 }
 0x553   : > { %v1302_v36 = vadd.f32 %v1300_v25, %v1298_v34 }
 0x554   : > { %v1311_v43 = vrot.slane %v1303_v42, 5  ;;  %v1405_v42 = vmul.f32 %v1404_v37, %v2769_v8 }
 0x555   : > { %v1309_v39 = vrot.slane %v1302_v36, 5 }
 0x557   : > { %v1310_v40 = vsel %vm853_vm13, %v1308_v38, %v1309_v39  ;;  %v1312_v45 = vsel %vm853_vm13, %v1309_v39, %v1311_v43  ;;  %v1422_v39 = vperm.slane %v2917_v4, 7 }
 0x558   : > { %2266 = vmatmul.msk.f32.vlgmr.msra.gmra.mxu3 %vm698_vm1, %v1310_v40 }
 0x560   : > { %2267 = vmatmul.msk.f32.gmra.mxu3 %vm698_vm1, %v1312_v45  ;;  %v1423_v45 = vmul.f32 %v1422_v39, %v2769_v8 }
 0x5db   : > { %v1334_v48 = vpop.f32.mrf.mxu3 }
 0x5dc   : > { %v1335_v47 = vadd.f32 %v1334_v48, %v1304_v46  ;;  %v1400_v48 = vperm.slane %v2917_v4, 5 }
 0x5de   : > { %v1340_v50 = vmax.f32 %v1335_v47, 0.0  ;;  %v1440_v47 = vperm.slane %v620_v56, 0 }
 0x5e0   : > { %v2952_v51 = vadd.f32 %v1340_v50, %v2883_v18 }
 0x5e2   : > { %v1344_v52 = vsel %vm698_vm1, %v2952_v51, 0.0 }
 0x5e3   : > { %1345 = vadd.xlane.f32.xlu0 %v1344_v52  ;;  %v1337_v54 = vpop.f32.mrf.mxu3  ;;  %v1411_v52 = vrot.slane %v1405_v42, 1 }
 0x5e4   : > { %v1338_v57 = vadd.f32 %v1337_v54, %v1304_v46 }
 0x5e6   : > { %v1341_v58 = vmax.f32 %v1338_v57, 0.0  ;;  %v1401_v57 = vmul.f32 %v1400_v48, %v2769_v8 }
 0x5e8   : > { %v2957_v59 = vadd.f32 %v1341_v58, %v2888_v24  ;;  %v1454_v58 = vperm.slane %v620_v56, 1 }
 0x5ea   : > { %v1347_v14 = vsel %vm698_vm1, %v2957_v59, 0.0 }
 0x5eb   : > { %1348 = vadd.xlane.f32.xlu1 %v1347_v14 }
 0x656   : > { %v1346_v60 = vpop.xlane.xlu0 %1345 }
 0x657   : > { %v1350_v61 = vmul.f32 %v1346_v60, %v2728_v28  ;;  %v1429_v60 = vrot.slane %v1423_v45, 2 }
 0x659   : > { %v1352_v18 = vsub.f32 %v2952_v51, %v1350_v61 }
 0x65b   : > { %v1354_v62 = vmul.f32 %v1352_v18, %v1352_v18 }
 0x65d   : > { %v1356_v63 = vsel %vm698_vm1, %v1354_v62, 0.0 }
 0x65e   : > { %1357 = vadd.xlane.f32.xlu2 %v1356_v63  ;;  %v1349_v0 = vpop.xlane.xlu1 %1348 }
 0x65f   : > { %v1351_v3 = vmul.f32 %v1349_v0, %v2728_v28 }
 0x661   : > { %v1353_v19 = vsub.f32 %v2957_v59, %v1351_v3  ;;  %v1472_v3 = vperm.slane %v620_v56, 2 }
 0x663   : > { %v1355_v24 = vmul.f32 %v1353_v19, %v1353_v19 }
 0x665   : > { %v1359_v1 = vsel %vm698_vm1, %v1355_v24, 0.0 }
 0x666   : > { %1360 = vadd.xlane.f32.xlu0 %v1359_v1 }
 0x6d1   : > { %v1358_v2 = vpop.xlane.xlu2 %1357 }
 0x6d2   : > { %v1362_v5 = vmul.f32 %v1358_v2, %v2728_v28 }
 0x6d4   : > { %v1364_v7 = vadd.f32 1e-05, %v1362_v5 }
 0x6d6   : > { %2402 = vrsqrt.f32 %v1364_v7  ;;  %vm1372_vm4 = vweird.f32 %v1364_v7 }
 0x6d9   : > { %v1361_v12 = vpop.xlane.xlu0 %1360 }
 0x6da   : > { %v1363_v13 = vmul.f32 %v1361_v12, %v2728_v28 }
 0x6dc   : > { %v2403_v17 = vpop.eup %2402  ;;  %v1365_v16 = vadd.f32 1e-05, %v1363_v13 }
 0x6dd   : > { %v1367_v20 = vmul.f32 %v2403_v17, %v1364_v7  ;;  %vm1373_vm3 = vweird.f32 %v2403_v17 }
 0x6de   : > { %2404 = vrsqrt.f32 %v1365_v16  ;;  %vm1374_vm5 = vmor %vm1372_vm4, %vm1373_vm3  ;;  %vm1382_vm7 = vweird.f32 %v1365_v16 }
 0x6df   : > { %v1368_v21 = vmul.f32 %v2403_v17, %v1367_v20  ;;  %v1457_v20 = vmul.f32 %v1454_v58, %v2782_v41 }
 0x6e1   : > { %v1369_v22 = vmul.f32 0.5, %v1368_v21 }
 0x6e3   : > { %v1370_v23 = vsub.f32 1.5, %v1369_v22 }
 0x6e4   : > { %v2405_v25 = vpop.eup %2404 }
 0x6e5   : > { %v1371_v26 = vmul.f32 %v2403_v17, %v1370_v23  ;;  %v1377_v27 = vmul.f32 %v2405_v25, %v1365_v16  ;;  %vm1383_vm6 = vweird.f32 %v2405_v25 }
 0x6e6   : > { %vm1384_vm8 = vmor %vm1382_vm7, %vm1383_vm6 }
 0x6e7   : > { %v1375_v29 = vsel %vm1374_vm5, %v2403_v17, %v1371_v26  ;;  %v1378_v30 = vmul.f32 %v2405_v25, %v1377_v27 }
 0x6e8   : > { %v1386_v32 = vmul.f32 %v1375_v29, %v1352_v18  ;;  %v1475_v29 = vmul.f32 %v1472_v3, %v2782_v41 }
 0x6e9   : > { %v1379_v33 = vmul.f32 0.5, %v1378_v30 }
 0x6ea   : > { %v1389_v34 = vmul.f32 %v1388_v49, %v1386_v32  ;;  %v1482_v56 = vrot.slane %v1475_v29, 5  ;;  %v642_v29 = vld [vmem:[%s3242_s13 + $0x8] sm:$0xff] }
 0x6eb   : > { %v1380_v55 = vsub.f32 1.5, %v1379_v33 }
 0x6ec   : > { %v1392_v35 = vadd.f32 %v1391_v31, %v1389_v34 }
 0x6ed   : > { %v1381_v36 = vmul.f32 %v2405_v25, %v1380_v55 }
 0x6ee   : > { %1394 = vst.msk [vmem:[#allocation2 + $0x8] sm:$0xff] %vm698_vm1, %v1392_v35  ;;  %v1464_v35 = vrot.slane %v1457_v20, 4 }
 0x6ef   : > { %v1385_v38 = vsel %vm1384_vm8, %v2405_v25, %v1381_v36 }
 0x6f0   : > { %v1387_v53 = vmul.f32 %v1385_v38, %v1353_v19 }
 0x6f2   : > { %v1390_v40 = vmul.f32 %v1388_v49, %v1387_v53  ;;  %v1493_v53 = vmul.f32 %v1490_v11, %v2782_v41 }
 0x6f4   : > { %v1393_v43 = vadd.f32 %v1391_v31, %v1390_v40 }
 0x6f5   : > { %v1397_v46 = vld [vmem:[#allocation2 + $0x8] sm:$0xff] }
 0x6f6   : > { %1395 = vst.msk [vmem:[#allocation2 + $0x10] sm:$0xff] %vm698_vm1, %v1393_v43  ;;  %v1406_v50 = vmul.f32 %v1404_v37, %v1397_v46  ;;  %v1424_v54 = vmul.f32 %v1422_v39, %v1397_v46  ;;  %v1441_v18 = vmul.f32 %v1440_v47, %v1397_v46  ;;  %v1455_v0 = vmul.f32 %v1454_v58, %v1397_v46 }
 0x6f7   : > { %v1473_v10 = vmul.f32 %v1472_v3, %v1397_v46  ;;  %v1402_v17 = vmul.f32 %v1400_v48, %v1397_v46  ;;  %v1491_v49 = vmul.f32 %v1490_v11, %v1397_v46 }
 0x6f8   : > { %v1412_v14 = vrot.slane %v1406_v50, 1  ;;  %v1430_v61 = vrot.slane %v1424_v54, 2  ;;  %v1445_v1 = vrot.slane %v1441_v18, 3  ;;  %v1461_v8 = vrot.slane %v1455_v0, 4 }
 0x6f9   : > { %v1479_v27 = vrot.slane %v1473_v10, 5  ;;  %v1497_v40 = vrot.slane %v1491_v49, 6  ;;  %v643_v49 = vld [vmem:[%s3242_s13 + $0x10] sm:$0xff] }
 0x6fa   : > { %v1413_v62 = vsel %vm781_vm9, %v1411_v52, %v1412_v14  ;;  %v1431_v4 = vsel %vm800_vm10, %v1429_v60, %v1430_v61 }
 0x6fb   : > { %v1419_v63 = vadd.f32 %v1413_v62, %v1401_v57  ;;  %v1500_v57 = vrot.slane %v1493_v53, 6 }
 0x6fd   : > { %v1398_v19 = vld [vmem:[#allocation2 + $0x10] sm:$0xff]  ;;  %v1437_v24 = vadd.f32 %v1431_v4, %v1419_v63 }
 0x6fe   : > { %v1407_v2 = vmul.f32 %v1404_v37, %v1398_v19  ;;  %v1425_v5 = vmul.f32 %v1422_v39, %v1398_v19  ;;  %v1442_v7 = vmul.f32 %v1440_v47, %v1398_v19  ;;  %v1456_v15 = vmul.f32 %v1454_v58, %v1398_v19 }
 0x6ff   : > { %v1451_v9 = vadd.f32 %v1445_v1, %v1437_v24  ;;  %v1474_v23 = vmul.f32 %v1472_v3, %v1398_v19  ;;  %v1403_v25 = vmul.f32 %v1400_v48, %v1398_v19  ;;  %v1492_v32 = vmul.f32 %v1490_v11, %v1398_v19 }
 0x700   : > { %v1414_v12 = vrot.slane %v1407_v2, 1  ;;  %v1432_v13 = vrot.slane %v1425_v5, 2  ;;  %v1446_v22 = vrot.slane %v1442_v7, 3  ;;  %v1462_v31 = vrot.slane %v1456_v15, 4 }
 0x701   : > { %v1469_v16 = vadd.f32 %v1461_v8, %v1451_v9  ;;  %v1480_v37 = vrot.slane %v1474_v23, 5  ;;  %v1498_v43 = vrot.slane %v1492_v32, 6  ;;  %v1508_v47 = vperm.slane %v2792_v6, 3 }
 0x702   : > { %v1415_v21 = vsel %vm781_vm9, %v1412_v14, %v1414_v12  ;;  %v1433_v30 = vsel %vm800_vm10, %v1430_v61, %v1432_v13  ;;  %v1421_v33 = vadd.f32 %v1414_v12, %v1403_v25  ;;  %v1447_v36 = vsel %vm817_vm11, %v1445_v1, %v1446_v22 }
 0x703   : > { %v1420_v26 = vadd.f32 %v1415_v21, %v1402_v17  ;;  %v1487_v55 = vadd.f32 %v1479_v27, %v1469_v16  ;;  %v1463_v42 = vsel %vm834_vm12, %v1461_v8, %v1462_v31  ;;  %v1465_v50 = vsel %vm834_vm12, %v1462_v31, %v1464_v35 }
 0x704   : > { %v1439_v38 = vadd.f32 %v1432_v13, %v1421_v33  ;;  %v1481_v52 = vsel %vm853_vm13, %v1479_v27, %v1480_v37  ;;  %v1483_v41 = vsel %vm853_vm13, %v1480_v37, %v1482_v56  ;;  %v1499_v14 = vsel %vm872_vm14, %v1497_v40, %v1498_v43  ;;  %v644_v27 = vld [vmem:[%s3242_s13 + $0x18] sm:$0xff] }
 0x705   : > { %v1438_v34 = vadd.f32 %v1433_v30, %v1420_v26  ;;  %v1505_v48 = vadd.f32 %v1497_v40, %v1487_v55  ;;  %v1501_v62 = vsel %vm872_vm14, %v1498_v43, %v1500_v57  ;;  %v1512_v2 = vperm.slane %v2810_v44, 3  ;;  %1627 = vmatpush.msrb.mxu2 %v644_v27  ;;  %v641_v30 = vld [vmem:[%s3242_s13] sm:$0xff] }
 0x706   : > { %v1453_v45 = vadd.f32 %v1446_v22, %v1439_v38  ;;  %v2382_v43 = vld [vmem:[%s3240_s11] ss:$0 sm:$0xff] }
 0x707   : > { %v1452_v39 = vadd.f32 %v1447_v36, %v1438_v34  ;;  %v1509_v18 = vadd.f32 %v1508_v47, %v1505_v48  ;;  %1628 = vmatpush.msrb.mxu2 %v643_v49 }
 0x708   : > { %v1471_v54 = vadd.f32 %v1465_v50, %v1453_v45 }
 0x709   : > { %v1470_v46 = vadd.f32 %v1463_v42, %v1452_v39  ;;  %v1516_v3 = vrot.slane %v1509_v18, 5  ;;  %1629 = vmatpush.msrb.mxu2 %v642_v29  ;;  %v2384_v18 = vld [vmem:[%s3243_s14] ss:$0 sm:$0xff] }
 0x70a   : > { %v1489_v60 = vadd.f32 %v1483_v41, %v1471_v54 }
 0x70b   : > { %v1488_v58 = vadd.f32 %v1481_v52, %v1470_v46  ;;  %1630 = vmatpush.msrb.mxu2 %v641_v30 }
 0x70c   : > { %v1507_v0 = vadd.f32 %v1501_v62, %v1489_v60 }
 0x70d   : > { %v1506_v61 = vadd.f32 %v1499_v14, %v1488_v58 }
 0x70e   : > { %v1511_v19 = vadd.f32 %v1508_v47, %v1507_v0 }
 0x70f   : > { %v1510_v63 = vadd.f32 %v1508_v47, %v1506_v61  ;;  %v2383_v47 = vld [vmem:[%s3241_s12] ss:$0 sm:$0xff] }
 0x710   : > { %v1519_v24 = vrot.slane %v1511_v19, 5 }
 0x711   : > { %v1517_v6 = vrot.slane %v1510_v63, 5 }
 0x713   : > { %v1518_v4 = vsel %vm853_vm13, %v1516_v3, %v1517_v6  ;;  %v1520_v1 = vsel %vm853_vm13, %v1517_v6, %v1519_v24 }
 0x714   : > { %2268 = vmatmul.msk.f32.vlgmr.msrb.gmra.mxu1 %vm698_vm1, %v1518_v4 }
 0x71c   : > { %2269 = vmatmul.msk.f32.gmra.mxu1 %vm698_vm1, %v1520_v1 }
 0x791   : > { %v1542_v5 = vpop.f32.mrf.mxu1 }
 0x792   : > { %v1543_v7 = vadd.f32 %v1542_v5, %v1512_v2 }
 0x794   : > { %v1548_v9 = vmax.f32 %v1543_v7, 0.0 }
 0x796   : > { %v3015_v8 = vadd.f32 %v1548_v9, %v2952_v51 }
 0x798   : > { %v1552_v10 = vsel %vm698_vm1, %v3015_v8, 0.0 }
 0x799   : > { %1553 = vadd.xlane.f32.xlu1 %v1552_v10  ;;  %v1545_v11 = vpop.f32.mrf.mxu1 }
 0x79a   : > { %v1546_v12 = vadd.f32 %v1545_v11, %v1512_v2 }
 0x79c   : > { %v1549_v13 = vmax.f32 %v1546_v12, 0.0 }
 0x79e   : > { %v3020_v15 = vadd.f32 %v1549_v13, %v2957_v59 }
 0x7a0   : > { %v1555_v17 = vsel %vm698_vm1, %v3020_v15, 0.0 }
 0x7a1   : > { %1556 = vadd.xlane.f32.xlu2 %v1555_v17 }
 0x80c   : > { %v1554_v44 = vpop.xlane.xlu1 %1553 }
 0x80d   : > { %v1558_v16 = vmul.f32 %v1554_v44, %v2728_v28  ;;  %v697_v44 = vld [vmem:[%s614_s3] sm:$0x1] }
 0x80f   : > { %v1560_v51 = vsub.f32 %v3015_v8, %v1558_v16  ;;  %v1638_v16 = vsub.f32 1.0, %v697_v44 }
 0x811   : > { %v1562_v20 = vmul.f32 %v1560_v51, %v1560_v51 }
 0x813   : > { %v1564_v21 = vsel %vm698_vm1, %v1562_v20, 0.0 }
 0x814   : > { %1565 = vadd.xlane.f32.xlu0 %v1564_v21  ;;  %v1557_v22 = vpop.xlane.xlu2 %1556 }
 0x815   : > { %v1559_v23 = vmul.f32 %v1557_v22, %v2728_v28 }
 0x817   : > { %v1561_v25 = vsub.f32 %v3020_v15, %v1559_v23 }
 0x819   : > { %v1563_v59 = vmul.f32 %v1561_v25, %v1561_v25 }
 0x81b   : > { %v1567_v26 = vsel %vm698_vm1, %v1563_v59, 0.0 }
 0x81c   : > { %1568 = vadd.xlane.f32.xlu1 %v1567_v26 }
 0x887   : > { %v1566_v31 = vpop.xlane.xlu0 %1565 }
 0x888   : > { %v1570_v32 = vmul.f32 %v1566_v31, %v2728_v28 }
 0x88a   : > { %v1572_v33 = vadd.f32 1e-05, %v1570_v32 }
 0x88c   : > { %2406 = vrsqrt.f32 %v1572_v33  ;;  %vm1580_vm10 = vweird.f32 %v1572_v33 }
 0x88f   : > { %v1569_v34 = vpop.xlane.xlu1 %1568 }
 0x890   : > { %v1571_v55 = vmul.f32 %v1569_v34, %v2728_v28 }
 0x892   : > { %v2407_v35 = vpop.eup %2406  ;;  %v1573_v36 = vadd.f32 1e-05, %v1571_v55 }
 0x893   : > { %v1575_v37 = vmul.f32 %v2407_v35, %v1572_v33  ;;  %vm1581_vm9 = vweird.f32 %v2407_v35 }
 0x894   : > { %2408 = vrsqrt.f32 %v1573_v36  ;;  %vm1582_vm11 = vmor %vm1580_vm10, %vm1581_vm9  ;;  %vm1590_vm13 = vweird.f32 %v1573_v36 }
 0x895   : > { %v1576_v38 = vmul.f32 %v2407_v35, %v1575_v37 }
 0x897   : > { %v1577_v53 = vmul.f32 0.5, %v1576_v38 }
 0x899   : > { %v1578_v39 = vsub.f32 1.5, %v1577_v53 }
 0x89a   : > { %v2409_v40 = vpop.eup %2408 }
 0x89b   : > { %v1579_v56 = vmul.f32 %v2407_v35, %v1578_v39  ;;  %v1585_v42 = vmul.f32 %v2409_v40, %v1573_v36  ;;  %vm1591_vm12 = vweird.f32 %v2409_v40 }
 0x89c   : > { %vm1592_vm14 = vmor %vm1590_vm13, %vm1591_vm12 }
 0x89d   : > { %v1583_v45 = vsel %vm1582_vm11, %v2407_v35, %v1579_v56  ;;  %v1586_v46 = vmul.f32 %v2409_v40, %v1585_v42 }
 0x89e   : > { %v1594_v48 = vmul.f32 %v1583_v45, %v1560_v51  ;;  %v1639_v51 = vmul.f32 -1e+30, %v1638_v16 }
 0x89f   : > { %v1587_v50 = vmul.f32 0.5, %v1586_v46 }
 0x8a0   : > { %v1599_v52 = vmul.f32 %v2382_v43, %v1594_v48  ;;  %v1681_v20 = vperm.slane %v1639_v51, 0 }
 0x8a1   : > { %v1588_v54 = vsub.f32 1.5, %v1587_v50 }
 0x8a2   : > { %v1604_v57 = vadd.f32 %v2383_v47, %v1599_v52 }
 0x8a3   : > { %v1589_v58 = vmul.f32 %v2409_v40, %v1588_v54 }
 0x8a4   : > { %2270 = vmatmul.msk.f32.vlgmr.msrb.gmra.mxu2 %vm698_vm1, %v1604_v57 }
 0x8a5   : > { %v1593_v41 = vsel %vm1592_vm14, %v2409_v40, %v1589_v58 }
 0x8a6   : > { %v1595_v14 = vmul.f32 %v1593_v41, %v1561_v25 }
 0x8a8   : > { %v1600_v60 = vmul.f32 %v2382_v43, %v1595_v14 }
 0x8aa   : > { %v1605_v61 = vadd.f32 %v2383_v47, %v1600_v60 }
 0x8ac   : > { %2271 = vmatmul.msk.f32.gmra.mxu2 %vm698_vm1, %v1605_v61 }
 0x927   : > { %v1632_v62 = vpop.f32.mrf.mxu2 }
 0x928   : > { %v3055_v63 = vadd.f32 %v2384_v18, %v1632_v62 }
 0x92a   : > { %1747 = vrot.lane.b32.xlu2 %v3055_v63, %s2512_s25  ;;  %1642 = vrot.lane.b32.xlu1 %v3055_v63, %s2513_s24 }
 0x92f   : > { %v1635_v0 = vpop.f32.mrf.mxu2 }
 0x930   : > { %v3059_v3 = vadd.f32 %v2384_v18, %v1635_v0 }
 0x932   : > { %1849 = vrot.lane.b32.xlu1 %v3059_v3, %s2514_s2  ;;  %1749 = vrot.lane.b32.xlu0 %v3059_v3, %s2512_s25  ;;  %v2361_v57 = vpack.i.bf16 %v3055_v63, %v3059_v3  ;;  %s2521_s25 = smov 40  }
 0x933   : > { %1644 = vrot.lane.b32.xlu2 %v3059_v3, %s2513_s24  ;;  %s2522_s24 = smov 48  }
 0x93a   : > { %1947 = vrot.lane.b32.xlu1 %v3055_v63, %s2515_s26  ;;  %1743 = vrot.lane.b32.xlu0 %v3055_v63, %s2516_s0 }
 0x93b   : > { %1847 = vrot.lane.b32.xlu2 %v3055_v63, %s2514_s2  ;;  %s3260_s2 = smov 8  }
 0x942   : > { %1845 = vrot.lane.b32.xlu1 %v3059_v3, %s2517_s27  ;;  %1949 = vrot.lane.b32.xlu0 %v3059_v3, %s2515_s26  ;;  %s2524_s26 = smov 24  }
 0x943   : > { %1745 = vrot.lane.b32.xlu2 %v3059_v3, %s2516_s0  ;;  %s2525_s0 = smov 16  }
 0x94a   : > { %1843 = vrot.lane.b32.xlu0 %v3055_v63, %s2517_s27  ;;  %s604_s27 = sand.u32 1, %s2500_s30  }
 0x94b   : > { %1943 = vrot.lane.b32.xlu2 %v3055_v63, %s2518_s28  ;;  %s2257_s19 = sshll.u32 %s604_s27, 4 }
 0x94c   : > { %s606_s3 = scalar_lea.vmem [#allocation3], %s2257_s19 }
 0x952   : > { %1945 = vrot.lane.b32.xlu0 %v3059_v3, %s2518_s28  ;;  %s2167_s28 = scalar_lea.sflag [#allocation4], %s604_s27 }
 0x984   : > { %v1748_v6 = vpop.permute.xlu2 %1747 }
 0x98d   : > { %v1645_v4 = vpop.permute.xlu2 %1644 }
 0x98e   : > { %2272 = vmatpush.xpose.msk.msrb.mxu3 %vm1646_vm15, %v1645_v4 }
 0x995   : > { %v1848_v2 = vpop.permute.xlu2 %1847 }
 0x99c   : > { %v1643_v19 = vpop.permute.xlu1 %1642 }
 0x99d   : > { %2273 = vmatpush.xpose.msk.msrb.mxu3 %vm1646_vm15, %v1643_v19  ;;  %v1746_v7 = vpop.permute.xlu2 %1745 }
 0x9a0   : > { %2274 = vmatmul.msk.f32.vlgmr.msrb.gmra.mxu3 %vm1646_vm15, %v3055_v63 }
 0x9a4   : > { %v1750_v24 = vpop.permute.xlu0 %1749  ;;  %v1850_v1 = vpop.permute.xlu1 %1849 }
 0x9a5   : > { %2278 = vmatpush.xpose.msk.msra.mxu1 %vm1646_vm15, %v1750_v24  ;;  %2284 = vmatpush.xpose.msk.msra.mxu3 %vm1646_vm15, %v1850_v1  ;;  %v1944_v11 = vpop.permute.xlu2 %1943 }
 0x9a8   : > { %2275 = vmatmul.msk.f32.gmra.mxu3 %vm1646_vm15, %v3059_v3 }
 0x9a9   : > { %2279 = vmatpush.xpose.msk.msra.mxu1 %vm1646_vm15, %v1748_v6  ;;  %2285 = vmatpush.xpose.msk.msra.mxu3 %vm1646_vm15, %v1848_v2 }
 0x9ac   : > { %v1744_v5 = vpop.permute.xlu0 %1743  ;;  %v1948_v10 = vpop.permute.xlu1 %1947 }
 0x9ad   : > { %2280 = vmatmul.msk.f32.vlgmr.msra.gmra.mxu1 %vm1646_vm15, %v1744_v5 }
 0x9b4   : > { %v1950_v9 = vpop.permute.xlu0 %1949  ;;  %v1846_v13 = vpop.permute.xlu1 %1845 }
 0x9b5   : > { %2281 = vmatmul.msk.f32.gmra.mxu1 %vm1646_vm15, %v1746_v7 }
 0x9b6   : > { %2290 = vmatpush.xpose.msk.msrb.mxu1 %vm1646_vm15, %v1950_v9 }
 0x9ba   : > { %2291 = vmatpush.xpose.msk.msrb.mxu1 %vm1646_vm15, %v1948_v10 }
 0x9bc   : > { %v1844_v12 = vpop.permute.xlu0 %1843 }
 0x9bd   : > { %2286 = vmatmul.msk.f32.vlgmr.msra.gmra.mxu3 %vm1646_vm15, %v1844_v12  ;;  %2292 = vmatmul.msk.f32.vlgmr.msrb.gmra.mxu1 %vm1646_vm15, %v1944_v11 }
 0x9c4   : > { %v1946_v17 = vpop.permute.xlu0 %1945 }
 0x9c5   : > { %2287 = vmatmul.msk.f32.gmra.mxu3 %vm1646_vm15, %v1846_v13  ;;  %2293 = vmatmul.msk.f32.gmra.mxu1 %vm1646_vm15, %v1946_v17 }
 0xa23   : > { %v1672_v21 = vpop.f32.mrf.mxu3 }
 0xa24   : > { %v1678_v22 = vmul.f32 0.35355338, %v1672_v21 }
 0xa26   : > { %v1683_v23 = vadd.f32 %v1681_v20, %v1678_v22 }
 0xa28   : > { %v1686_v25 = vsel %vm1685_vm0, %v1683_v23, -inf }
 0xa29   : > { %1687 = vmax.xlane.f32.xlu1 %v1686_v25 }
 0xa2a   : > { %v1776_v59 = vpop.f32.mrf.mxu1 }
 0xa2b   : > { %v1782_v26 = vmul.f32 0.35355338, %v1776_v59  ;;  %v1675_v27 = vpop.f32.mrf.mxu3 }
 0xa2c   : > { %v1679_v29 = vmul.f32 0.35355338, %v1675_v27 }
 0xa2d   : > { %v1784_v49 = vadd.f32 %v1782_v26, %v1681_v20 }
 0xa2e   : > { %v1684_v33 = vadd.f32 %v1681_v20, %v1679_v29 }
 0xa2f   : > { %v1786_v30 = vsel %vm1685_vm0, %v1784_v49, -inf }
 0xa30   : > { %1787 = vmax.xlane.f32.xlu2 %v1786_v30  ;;  %v1689_v55 = vsel %vm1685_vm0, %v1684_v33, -inf }
 0xa32   : > { %v1779_v31 = vpop.f32.mrf.mxu1 }
 0xa33   : > { %v1783_v32 = vmul.f32 0.35355338, %v1779_v31 }
 0xa35   : > { %v1785_v34 = vadd.f32 %v1783_v32, %v1681_v20 }
 0xa37   : > { %v1789_v35 = vsel %vm1685_vm0, %v1785_v34, -inf }
 0xa38   : > { %1690 = vmax.xlane.f32.xlu2 %v1689_v55  ;;  %1790 = vmax.xlane.f32.xlu0 %v1789_v35 }
 0xa3a   : > { %v1976_v36 = vpop.f32.mrf.mxu1 }
 0xa3b   : > { %v1982_v37 = vmul.f32 0.35355338, %v1976_v36 }
 0xa3d   : > { %v1984_v38 = vadd.f32 %v1982_v37, %v1681_v20 }
 0xa3f   : > { %v1986_v53 = vsel %vm1685_vm0, %v1984_v38, -inf }
 0xa40   : > { %v1876_v39 = vpop.f32.mrf.mxu3  ;;  %1987 = vmax.xlane.f32.xlu1 %v1986_v53 }
 0xa41   : > { %v1882_v40 = vmul.f32 0.35355338, %v1876_v39 }
 0xa42   : > { %v1979_v56 = vpop.f32.mrf.mxu1 }
 0xa43   : > { %v1983_v42 = vmul.f32 0.35355338, %v1979_v56  ;;  %v1884_v43 = vadd.f32 %v1882_v40, %v1681_v20 }
 0xa45   : > { %v1985_v45 = vadd.f32 %v1983_v42, %v1681_v20  ;;  %v1886_v46 = vsel %vm1685_vm0, %v1884_v43, -inf }
 0xa46   : > { %1887 = vmax.xlane.f32.xlu0 %v1886_v46 }
 0xa47   : > { %v1989_v48 = vsel %vm1685_vm0, %v1985_v45, -inf }
 0xa48   : > { %v1879_v47 = vpop.f32.mrf.mxu3  ;;  %1990 = vmax.xlane.f32.xlu2 %v1989_v48 }
 0xa49   : > { %v1883_v50 = vmul.f32 0.35355338, %v1879_v47 }
 0xa4b   : > { %v3102_v52 = vadd.f32 %v1883_v50, %v1681_v20 }
 0xa4d   : > { %v1889_v54 = vsel %vm1685_vm0, %v3102_v52, -inf }
 0xa4e   : > { %1890 = vmax.xlane.f32.xlu1 %v1889_v54 }
 0xa67   : > { %2362 = vrot.lane.b32.xlu1 %v2361_v57, %s2519_s20 }
 0xa9c   : > { %v1688_v58 = vpop.xlane.xlu1 %1687 }
 0xa9d   : > { %v1692_v41 = vsub.f32 %v1683_v23, %v1688_v58 }
 0xa9f   : > { %v1694_v14 = vmul.f32 1.442695, %v1692_v41 }
 0xaa1   : > { %2410 = vpow2.f32 %v1694_v14 }
 0xaa3   : > { %v1788_v60 = vpop.xlane.xlu2 %1787 }
 0xaa4   : > { %v1792_v61 = vsub.f32 %v1784_v49, %v1788_v60 }
 0xaa6   : > { %v1794_v18 = vmul.f32 1.442695, %v1792_v61 }
 0xaa7   : > { %v3108_v62 = vpop.eup %2410 }
 0xaa8   : > { %2412 = vpow2.f32 %v1794_v18  ;;  %v1698_v0 = vsel %vm1685_vm0, %v3108_v62, 0.0 }
 0xaa9   : > { %1699 = vadd.xlane.f32.xlu2 %v1698_v0 }
 0xaab   : > { %v1791_v6 = vpop.xlane.xlu0 %1790  ;;  %v1691_v4 = vpop.xlane.xlu2 %1690 }
 0xaac   : > { %v1793_v19 = vsub.f32 %v1785_v34, %v1791_v6  ;;  %v1693_v24 = vsub.f32 %v1684_v33, %v1691_v4 }
 0xaae   : > { %v3112_v63 = vpop.eup %2412  ;;  %v1796_v3 = vmul.f32 1.442695, %v1793_v19  ;;  %v1696_v2 = vmul.f32 1.442695, %v1693_v24 }
 0xaaf   : > { %v1798_v1 = vsel %vm1685_vm0, %v3112_v63, 0.0 }
 0xab0   : > { %2414 = vpow2.f32 %v1796_v3  ;;  %1799 = vadd.xlane.f32.xlu0 %v1798_v1 }
 0xab1   : > { %2416 = vpow2.f32 %v1696_v2 }
 0xab3   : > { %v1988_v5 = vpop.xlane.xlu1 %1987 }
 0xab4   : > { %v1992_v7 = vsub.f32 %v1984_v38, %v1988_v5 }
 0xab6   : > { %v3116_v9 = vpop.eup %2414  ;;  %v1994_v11 = vmul.f32 1.442695, %v1992_v7 }
 0xab7   : > { %v1801_v10 = vsel %vm1685_vm0, %v3116_v9, 0.0  ;;  %v2417_v17 = vpop.eup %2416 }
 0xab8   : > { %1802 = vadd.xlane.f32.xlu0 %v1801_v10  ;;  %2418 = vpow2.f32 %v1994_v11  ;;  %v1701_v16 = vsel %vm1685_vm0, %v2417_v17, 0.0 }
 0xab9   : > { %v1888_v12 = vpop.xlane.xlu0 %1887 }
 0xaba   : > { %v1892_v13 = vsub.f32 %v1884_v43, %v1888_v12 }
 0xabb   : > { %v1991_v25 = vpop.xlane.xlu2 %1990 }
 0xabc   : > { %v1894_v44 = vmul.f32 1.442695, %v1892_v13  ;;  %v1993_v59 = vsub.f32 %v1985_v45, %v1991_v25 }
 0xabe   : > { %2420 = vpow2.f32 %v1894_v44  ;;  %v3121_v51 = vpop.eup %2418  ;;  %v1996_v49 = vmul.f32 1.442695, %v1993_v59 }
 0xabf   : > { %v1998_v22 = vsel %vm1685_vm0, %v3121_v51, 0.0 }
 0xac0   : > { %1702 = vadd.xlane.f32.xlu0 %v1701_v16  ;;  %2422 = vpow2.f32 %v1996_v49 }
 0xac1   : > { %2367 = vrot.lane.b32.xlu2 %v2361_v57, %s2520_s23  ;;  %v1891_v23 = vpop.xlane.xlu1 %1890  ;;  %s2304_s23 = sshll.u32 %s2648_s1, 4 }
 0xac2   : > { %v1893_v32 = vsub.f32 %v3102_v52, %v1891_v23 }
 0xac4   : > { %v3123_v20 = vpop.eup %2420  ;;  %v1896_v33 = vmul.f32 1.442695, %v1893_v32 }
 0xac5   : > { %v1898_v21 = vsel %vm1685_vm0, %v3123_v20, 0.0 }
 0xac6   : > { %1899 = vadd.xlane.f32.xlu1 %v1898_v21  ;;  %v2423_v30 = vpop.eup %2422  ;;  %2424 = vpow2.f32 %v1896_v33 }
 0xac7   : > { %v2001_v31 = vsel %vm1685_vm0, %v2423_v30, 0.0 }
 0xac8   : > { %1999 = vadd.xlane.f32.xlu0 %v1998_v22 }
 0xacc   : > { %v2425_v34 = vpop.eup %2424 }
 0xacd   : > { %v1901_v55 = vsel %vm1685_vm0, %v2425_v34, 0.0 }
 0xad9   : > { %v2363_v26 = vpop.permute.xlu1 %2362 }
 0xada   : > { %v2364_v27 = vunpack.i.l.bf16 %v2363_v26  ;;  %v2365_v29 = vunpack.i.h.bf16 %v2363_v26 }
 0xadc   : > { %1834 = vmatpush.msra.mxu2 %v2364_v27  ;;  %2372 = vrot.lane.b32.xlu0 %v2361_v57, %s2521_s25 }
 0xade   : > { %1835 = vmatpush.msra.mxu2 %v2365_v29 }
 0xae4   : > { %2377 = vrot.lane.b32.xlu0 %v2361_v57, %s2522_s24 }
 0xaea   : > { %2002 = vadd.xlane.f32.xlu2 %v2001_v31 }
 0xb0e   : > { %1902 = vadd.xlane.f32.xlu0 %v1901_v55 }
 0xb1c   : > { %v1700_v35 = vpop.xlane.xlu2 %1699 }
 0xb1d   : > { %2426 = vrcp.f32 %v1700_v35 }
 0xb23   : > { %v1800_v36 = vpop.xlane.xlu0 %1799  ;;  %v2427_v38 = vpop.eup %2426 }
 0xb24   : > { %2428 = vrcp.f32 %v1800_v36  ;;  %v2368_v37 = vpop.permute.xlu2 %2367  ;;  %v1706_v40 = vmul.f32 %v2427_v38, %v3108_v62 }
 0xb25   : > { %v2369_v53 = vunpack.i.l.bf16 %v2368_v37  ;;  %v2370_v39 = vunpack.i.h.bf16 %v2368_v37 }
 0xb27   : > { %1734 = vmatpush.msrb.mxu0 %v2369_v53  ;;  %v651_v53 = vld [vmem:[%s3246_s17 + $0x18] sm:$0xff] }
 0xb28   : > { %2151 = vmatpush.msrb.mxu3 %v651_v53 }
 0xb29   : > { %1735 = vmatpush.msrb.mxu0 %v2370_v39  ;;  %v650_v39 = vld [vmem:[%s3246_s17 + $0x10] sm:$0xff] }
 0xb2a   : > { %v2429_v56 = vpop.eup %2428  ;;  %2276 = vmatmul.msk.f32.vlgmr.msrb.gmra.mxu0 %vm1685_vm0, %v1706_v40  ;;  %v649_v40 = vld [vmem:[%s3246_s17 + $0x8] sm:$0xff]  ;;  %2152 = vmatpush.msrb.mxu3 %v650_v39 }
 0xb2b   : > { %v1806_v42 = vmul.f32 %v2429_v56, %v3112_v63  ;;  %v1803_v43 = vpop.xlane.xlu0 %1802  ;;  %v648_v56 = vld [vmem:[%s3246_s17] sm:$0xff] }
 0xb2c   : > { %2430 = vrcp.f32 %v1803_v43  ;;  %2153 = vmatpush.msrb.mxu3 %v649_v40 }
 0xb2d   : > { %2282 = vmatmul.msk.f32.vlgmr.msra.gmra.mxu2 %vm1685_vm0, %v1806_v42 }
 0xb2e   : > { %2154 = vmatpush.msrb.mxu3 %v648_v56 }
 0xb32   : > { %v2431_v45 = vpop.eup %2430 }
 0xb33   : > { %v1703_v46 = vpop.xlane.xlu0 %1702  ;;  %v1807_v48 = vmul.f32 %v2431_v45, %v3116_v9 }
 0xb34   : > { %2432 = vrcp.f32 %v1703_v46 }
 0xb35   : > { %2283 = vmatmul.msk.f32.gmra.mxu2 %vm1685_vm0, %v1807_v48 }
 0xb39   : > { %v1900_v54 = vpop.xlane.xlu1 %1899 }
 0xb3a   : > { %v2433_v47 = vpop.eup %2432 }
 0xb3b   : > { %v1707_v50 = vmul.f32 %v2433_v47, %v2417_v17  ;;  %v2000_v52 = vpop.xlane.xlu0 %1999 }
 0xb3c   : > { %2434 = vrcp.f32 %v2000_v52 }
 0xb3d   : > { %2277 = vmatmul.msk.f32.gmra.mxu0 %vm1685_vm0, %v1707_v50  ;;  %2436 = vrcp.f32 %v1900_v54 }
 0xb42   : > { %v2435_v58 = vpop.eup %2434 }
 0xb43   : > { %v2006_v60 = vmul.f32 %v2435_v58, %v3121_v51  ;;  %v2437_v18 = vpop.eup %2436 }
 0xb44   : > { %v1906_v6 = vmul.f32 %v2437_v18, %v3123_v20 }
 0xb4e   : > { %v2373_v57 = vpop.permute.xlu0 %2372 }
 0xb4f   : > { %v2374_v41 = vunpack.i.l.bf16 %v2373_v57  ;;  %v2375_v14 = vunpack.i.h.bf16 %v2373_v57  ;;  %v2385_v57 = vld [vmem:[%s3244_s15] ss:$0 sm:$0xff] }
 0xb51   : > { %2034 = vmatpush.msrb.mxu2 %v2374_v41 }
 0xb53   : > { %2035 = vmatpush.msrb.mxu2 %v2375_v14  ;;  %v2386_v14 = vld [vmem:[%s3245_s16] ss:$0 sm:$0xff] }
 0xb54   : > { %2294 = vmatmul.msk.f32.vlgmr.msrb.gmra.mxu2 %vm1685_vm0, %v2006_v60 }
 0xb56   : > { %v2378_v61 = vpop.permute.xlu0 %2377 }
 0xb57   : > { %v2379_v62 = vunpack.i.l.bf16 %v2378_v61  ;;  %v2380_v0 = vunpack.i.h.bf16 %v2378_v61 }
 0xb59   : > { %1934 = vmatpush.msra.mxu0 %v2379_v62 }
 0xb5b   : > { %1935 = vmatpush.msra.mxu0 %v2380_v0 }
 0xb5c   : > { %2288 = vmatmul.msk.f32.vlgmr.msra.gmra.mxu0 %vm1685_vm0, %v1906_v6 }
 0xb5d   : > { %v2003_v4 = vpop.xlane.xlu2 %2002 }
 0xb5e   : > { %2438 = vrcp.f32 %v2003_v4 }
 0xb64   : > { %v2439_v19 = vpop.eup %2438 }
 0xb65   : > { %v2007_v63 = vmul.f32 %v2439_v19, %v2423_v30 }
 0xb67   : > { %2295 = vmatmul.msk.f32.gmra.mxu2 %vm1685_vm0, %v2007_v63 }
 0xb81   : > { %v1903_v3 = vpop.xlane.xlu0 %1902 }
 0xb82   : > { %2440 = vrcp.f32 %v1903_v3 }
 0xb88   : > { %v2441_v24 = vpop.eup %2440 }
 0xb89   : > { %v1907_v1 = vmul.f32 %v2441_v24, %v2425_v34 }
 0xb8b   : > { %2289 = vmatmul.msk.f32.gmra.mxu0 %vm1685_vm0, %v1907_v1 }
 0xba7   : > { %v1737_v5 = vpop.f32.mrf.mxu0 }
 0xbb0   : > { %v1837_v2 = vpop.f32.mrf.mxu2 }
 0xbb1   : > { %2045 = vrot.lane.b32.xlu1 %v1837_v2, %s3260_s2 }
 0xbb8   : > { %v1840_v7 = vpop.f32.mrf.mxu2 }
 0xbba   : > { %v1740_v9 = vpop.f32.mrf.mxu0 }
 0xbd7   : > { %v2037_v10 = vpop.f32.mrf.mxu2 }
 0xbd8   : > { %2061 = vrot.lane.b32.xlu1 %v2037_v10, %s2524_s26 }
 0xbd9   : > { %v1937_v11 = vpop.f32.mrf.mxu0 }
 0xbda   : > { %2053 = vrot.lane.b32.xlu2 %v1937_v11, %s2525_s0 }
 0xbe2   : > { %2047 = vrot.lane.b32.xlu2 %v1840_v7, %s3260_s2  ;;  %s2179_s2 = sshll.u32 %s606_s3, 4  ;;  %s2180_s2 = int_to_ptr.vmem [resolvable:$true] %s2179_s2 }
 0xbea   : > { %v2040_v12 = vpop.f32.mrf.mxu2 }
 0xbeb   : > { %2063 = vrot.lane.b32.xlu1 %v2040_v12, %s2524_s26  ;;  %s3288_s26 = sld [smem:[#allocation21_spill]] }
 0xc08   : > { %v1940_v13 = vpop.f32.mrf.mxu0 }
 0xc09   : > { %2055 = vrot.lane.b32.xlu0 %v1940_v13, %s2525_s0  ;;  %s2178_s0 = scalar_lea.hbm %s3288_s26, %s2304_s23  ;;  %s2466_s23 = scalar_lea.hbm %s3288_s26, 32 }
 0xc0a   : > { %s2181_s4 = sshll.u32 %s2178_s0, 4  ;;  %s2182_s4 = int_to_ptr.hbm [resolvable:$true] %s2181_s4 }
 0xc0b   : > { %s2460_s21 = sshra.s32 %s2182_s4, 4  ;;  %s2461_s21 = int_to_ptr.hbm [resolvable:$true] %s2460_s21 }
 0xc0c   : > { %p2467_p0 = scmp.lt.s32.totalorder %s2461_s21, %s3288_s26 }
 0xc23   : > { %v2046_v17 = vpop.permute.xlu1 %2045 }
 0xc24   : > { %v2067_v16 = vsel %vm1646_vm15, %v1737_v5, %v2046_v17 }
 0xc34   : > { %v2054_v44 = vpop.permute.xlu2 %2053 }
 0xc35   : > { %v2069_v51 = vsel %vm1685_vm0, %v2067_v16, %v2054_v44 }
 0xc3c   : > { %v2048_v25 = vpop.permute.xlu2 %2047 }
 0xc3d   : > { %v2068_v59 = vsel %vm1646_vm15, %v1740_v9, %v2048_v25 }
 0xc4a   : > { %v2062_v20 = vpop.permute.xlu1 %2061 }
 0xc4b   : > { %v2072_v21 = vsel %vm2071_vm2, %v2069_v51, %v2062_v20 }
 0xc4c   : > { %v3150_v22 = vadd.f32 %v2072_v21, %v3015_v8 }
 0xc4e   : > { %v2076_v23 = vsel %vm698_vm1, %v3150_v22, 0.0 }
 0xc4f   : > { %2077 = vadd.xlane.f32.xlu2 %v2076_v23 }
 0xc5d   : > { %v2064_v27 = vpop.permute.xlu1 %2063 }
 0xc7b   : > { %v2056_v26 = vpop.permute.xlu0 %2055 }
 0xc7c   : > { %v2070_v49 = vsel %vm1685_vm0, %v2068_v59, %v2056_v26 }
 0xc7d   : > { %v2073_v29 = vsel %vm2071_vm2, %v2070_v49, %v2064_v27 }
 0xc7e   : > { %v3157_v30 = vadd.f32 %v2073_v29, %v3020_v15 }
 0xc80   : > { %v2079_v31 = vsel %vm698_vm1, %v3157_v30, 0.0 }
 0xc81   : > { %2080 = vadd.xlane.f32.xlu1 %v2079_v31 }
 0xcc2   : > { %v2078_v8 = vpop.xlane.xlu2 %2077 }
 0xcc3   : > { %v2082_v32 = vmul.f32 %v2078_v8, %v2728_v28 }
 0xcc5   : > { %v2084_v33 = vsub.f32 %v3150_v22, %v2082_v32 }
 0xcc7   : > { %v2086_v34 = vmul.f32 %v2084_v33, %v2084_v33 }
 0xcc9   : > { %v2088_v55 = vsel %vm698_vm1, %v2086_v34, 0.0 }
 0xcca   : > { %2089 = vadd.xlane.f32.xlu0 %v2088_v55 }
 0xcf4   : > { %v2081_v35 = vpop.xlane.xlu1 %2080 }
 0xcf5   : > { %v2083_v36 = vmul.f32 %v2081_v35, %v2728_v28 }
 0xcf7   : > { %v2085_v37 = vsub.f32 %v3157_v30, %v2083_v36 }
 0xcf9   : > { %v2087_v15 = vmul.f32 %v2085_v37, %v2085_v37 }
 0xcfb   : > { %v2091_v38 = vsel %vm698_vm1, %v2087_v15, 0.0 }
 0xcfc   : > { %2092 = vadd.xlane.f32.xlu2 %v2091_v38 }
 0xd3d   : > { %v2090_v42 = vpop.xlane.xlu0 %2089 }
 0xd3e   : > { %v2094_v43 = vmul.f32 %v2090_v42, %v2728_v28 }
 0xd40   : > { %v2096_v45 = vadd.f32 1e-05, %v2094_v43 }
 0xd42   : > { %2442 = vrsqrt.f32 %v2096_v45  ;;  %vm2104_vm4 = vweird.f32 %v2096_v45 }
 0xd48   : > { %v2443_v46 = vpop.eup %2442 }
 0xd49   : > { %v2099_v48 = vmul.f32 %v2443_v46, %v2096_v45  ;;  %vm2105_vm3 = vweird.f32 %v2443_v46 }
 0xd4a   : > { %vm2106_vm5 = vmor %vm2104_vm4, %vm2105_vm3 }
 0xd4b   : > { %v2100_v47 = vmul.f32 %v2443_v46, %v2099_v48 }
 0xd4d   : > { %v2101_v50 = vmul.f32 0.5, %v2100_v47 }
 0xd4f   : > { %v2102_v52 = vsub.f32 1.5, %v2101_v50 }
 0xd51   : > { %v2103_v54 = vmul.f32 %v2443_v46, %v2102_v52 }
 0xd53   : > { %v2107_v58 = vsel %vm2106_vm5, %v2443_v46, %v2103_v54 }
 0xd54   : > { %v2118_v41 = vmul.f32 %v2107_v58, %v2084_v33 }
 0xd56   : > { %v2123_v60 = vmul.f32 %v2385_v57, %v2118_v41 }
 0xd58   : > { %v2128_v61 = vadd.f32 %v2386_v14, %v2123_v60 }
 0xd5a   : > { %2296 = vmatmul.msk.f32.vlgmr.msrb.gmra.mxu3 %vm698_vm1, %v2128_v61 }
 0xd6f   : > { %v2093_v18 = vpop.xlane.xlu2 %2092 }
 0xd70   : > { %v2095_v62 = vmul.f32 %v2093_v18, %v2728_v28  ;;  %v2387_v28 = vld [vmem:[%s3286_s18] ss:$0 sm:$0xff]  ;;  %s2462_s18 = scalar_lea.hbm %s2461_s21, 16 }
 0xd71   : > { %p2463_p11 = scmp.ne.s32.totalorder %s2461_s21, %s2462_s18  ;;  %p2468_p1 = scmp.lt.s32.totalorder %s2466_s23, %s2462_s18 }
 0xd72   : > { %v2097_v0 = vadd.f32 1e-05, %v2095_v62 }
 0xd73   : > { %p2464_p12 = pnand %p2463_p11, %p2665_p5  ;;  %p2469_p2 = por %p2468_p1, %p2467_p0 }
 0xd74   : > { %2444 = vrsqrt.f32 %v2097_v0  ;;  %vm2114_vm7 = vweird.f32 %v2097_v0 }
 0xd75   : > { %p2465_p13 = pneg %p2464_p12 }
 0xd77   : > { %p2470_p3 = pnand %p2469_p2, %p2465_p13 }
 0xd7a   : > { %v2445_v6 = vpop.eup %2444 }
 0xd7b   : > { %v2109_v4 = vmul.f32 %v2445_v6, %v2097_v0  ;;  %vm2115_vm6 = vweird.f32 %v2445_v6 }
 0xd7c   : > { %vm2116_vm8 = vmor %vm2114_vm7, %vm2115_vm6 }
 0xd7d   : > { %v2110_v19 = vmul.f32 %v2445_v6, %v2109_v4 }
 0xd7f   : > { %v2111_v63 = vmul.f32 0.5, %v2110_v19 }
 0xd81   : > { %v2112_v3 = vsub.f32 1.5, %v2111_v63 }
 0xd83   : > { %v2113_v24 = vmul.f32 %v2445_v6, %v2112_v3 }
 0xd85   : > { %v2117_v1 = vsel %vm2116_vm8, %v2445_v6, %v2113_v24 }
 0xd86   : > { %v2119_v2 = vmul.f32 %v2117_v1, %v2085_v37 }
 0xd88   : > { %v2124_v5 = vmul.f32 %v2385_v57, %v2119_v2 }
 0xd8a   : > { %v2129_v7 = vadd.f32 %v2386_v14, %v2124_v5 }
 0xd8c   : > { %2297 = vmatmul.msk.f32.gmra.mxu3 %vm698_vm1, %v2129_v7 }
 0xddd   : > { %v2156_v9 = vpop.f32.mrf.mxu3 }
 0xdde   : > { %v2157_v10 = vadd.f32 %v2387_v28, %v2156_v9 }
 0xde0   : > { %v2162_v11 = vadd.f32 %v2157_v10, %v3150_v22 }
 0xde2   : > { %2164 = vst.msk [vmem:[%s606_s3] sm:$0xff] %vm698_vm1, %v2162_v11 }
 0xe0f   : > { %v2159_v12 = vpop.f32.mrf.mxu3 }
 0xe10   : > { %v2160_v13 = vadd.f32 %v2387_v28, %v2159_v12 }
 0xe12   : > { %v2163_v17 = vadd.f32 %v2160_v13, %v3157_v30 }
 0xe14   : > { %2165 = vst.msk [vmem:[%s606_s3 + $0x8] sm:$0xff] %vm698_vm1, %v2163_v17 }
 0xe15   : > { %2473 = shalt.err (!%p2470_p3)
}
 0xe16   : > { %s2526_s27 = smov 128   ;;  %s3289_s3 = smov 8  }
 0xe17   : > { %2305 = dma.vmem_to_hbm [thread:$0]  (%p2665_p5), %s2180_s2, 256, %s2182_s4, %s2167_s28, %s2526_s27, %s2526_s27, %s3289_s3  }
 0xe18 PF: > { %s3290_s0 = sld [smem:[#allocation8_spill]] }
 0xe19   : > { %s3291_s5 = sld [smem:[#allocation6_spill]] }
 0xe1e   : > { %p2311_p4 = scmp.ge.s32.totalorder %s3290_s0, 2 }
 0xe1f   : > { %s2196_s1 = sand.u32 1, %s3291_s5  }
 0xe20   : > { %p2308_p7 = pnand %p2311_p4, %p2669_p6  ;;  %s2197_s19 = scalar_lea.sflag [#allocation4], %s2196_s1 }
 0xe22   : > { %p2309_p8 = pneg %p2308_p7 }
 0xe24   : > { %2491 = dma.done.wait (%p2309_p8), %s2197_s19, 256  }
 0xe25   : > { %2493 = vsyncadd (%p2309_p8), %s2197_s19, 4294967040  ;;  %s3293_s21 = sld [smem:[#allocation9_spill]]  ;;  %s3296_s0 = smov %s2500_s30 }
 0xe26   : > { %s3294_s18 = sld [smem:[#allocation7_spill]] }
 0xe27   : > { %s3295_s20 = sld [smem:[#allocation10_spill]] }
 0xe2b   : > { %p29_p9 = scmp.ge.s32.totalorder %s3293_s21, 4  }
 0xe2c   : > { %s3297_s30 = smov %s3294_s18 }
 0xe2d   :  { %31 = sbr.rel (!%p29_p9) target bundleno = 13 (0xd), region = 134 }
 0xe32   :  { %2203 = vsyncpa [#allocation4], 1 }
 0xe33   :  { %2205 = vsyncpa [#allocation4 + $0x1], 1 }

</bundles_post_ra>
